<compile_context>
chip_gen: v7x
topology: tpu7x:2x2x1
jax: 0.10.0
libtpu: 0.0.40
codegen_flags: <defaults>
</compile_context>

<pallas_src>
import functools

import jax
import jax.numpy as jnp
from jax.experimental import pallas as pl
from jax.experimental.pallas import tpu as pltpu


def _cdiv(a, b):
    return -(-a // b)


def _round_up(a, b):
    return _cdiv(a, b) * b


# ---------------------------------------------------------------------------
# stride1 == 1 kernel: collapsed displacement axis, flat row-major layout,
# single widening pass, batched separable box-sum + requant.
# ---------------------------------------------------------------------------
def _corr_s1_kernel(p1_ref, p2_ref, out_ref,
                    a32_ref, b32_ref, prod_ref, rs_ref, cs_ref, *,
                    k, stride2, D, Wp, base, slab_len, l_rs, l_out_pad,
                    zp1, zp2, rescale):
    R = (D - 1) // 2

    # --- widen int8 -> int32 exactly once (feedback: no per-displacement cast)
    a = p1_ref[0, :, pl.ds(base, slab_len)].astype(jnp.int32)
    if zp1 != 0:
        a = a - zp1
    a32_ref[...] = a                                   # (C, slab_len) scratch
    b32_ref[...] = p2_ref[0].astype(jnp.int32)         # (C, Lflat)  scratch
    if zp2 != 0:
        # column sum of (a - zp1); used to fold the zp2 correction into prod
        cs_ref[...] = jnp.sum(a32_ref[...], axis=0, keepdims=True)

    # --- per-displacement channel dot product -> one int32 row of prod_ref.
    # Static Python unroll so every lane slice has a compile-time offset
    # (no dynamic unaligned lane slicing); live ranges are bounded because the
    # only cross-iteration state lives in the VMEM scratches.
    # TODO(synk): a fori_loop over d would shrink code size further but needs
    # dynamic unaligned lane offsets on the b32 slab.
    for dy_i in range(D):
        dys = (dy_i - R) * stride2
        for dx_i in range(D):
            dxs = (dx_i - R) * stride2
            d = dy_i * D + dx_i
            off = dys * Wp + dxs
            b = b32_ref[:, pl.ds(base + off, slab_len)]
            prod = jnp.sum(a32_ref[...] * b, axis=0, keepdims=True)
            if zp2 != 0:
                prod = prod - zp2 * cs_ref[...]
            prod_ref[d:d + 1, :] = prod

    # --- separable k x k box sum + requant, batched over ALL D*D rows.
    # Chunked along the lane axis to bound vreg live ranges at large sizes
    # (single chunk at the test sizes). Output lane axis is >=128-dense.
    CH = 512
    # horizontal (k-wide) pass: prod -> rs
    for t0 in range(0, l_rs, CH):
        w = min(CH, l_rs - t0)
        rs = prod_ref[:, pl.ds(t0, w)]
        for i in range(1, k):
            rs = rs + prod_ref[:, pl.ds(t0 + i, w)]
        rs_ref[:, pl.ds(t0, w)] = rs
    # vertical (k-tall) pass + requant + lane-dense store
    for t0 in range(0, l_out_pad, CH):
        w = min(CH, l_out_pad - t0)
        acc = rs_ref[:, pl.ds(t0, w)]
        for j in range(1, k):
            acc = acc + rs_ref[:, pl.ds(t0 + j * Wp, w)]
        q = jnp.round(acc.astype(jnp.float32) * rescale)
        q = jnp.clip(q, -128.0, 127.0)
        out_ref[0, :, pl.ds(t0, w)] = q.astype(jnp.int8)


def _correlation_s1(x1, x2, *, kernel_size, max_displacement, stride2,
                    pad_size, disp_grid, ho, wo, zp1, zp2, rescale):
    """Dense (stride1 == 1) quantized correlation. ho/wo are the stride-1 extents."""
    B, C, H, W = x1.shape
    Hp, Wp = H + 2 * pad_size, W + 2 * pad_size
    k = kernel_size
    md = max_displacement
    D = disp_grid
    DD = D * D

    # flat row-major layout sizes (lane axis of the output padded to 128)
    l_out = ho * Wp
    l_out_pad = _round_up(l_out, 128)
    l_rs = l_out_pad + (k - 1) * Wp          # horizontal box-sum length
    slab_len = l_rs + (k - 1)                # per-displacement slab length

    # guard rows so every (static) shifted slab read stays in bounds; the box
    # sum deliberately wraps across padded row boundaries for the columns that
    # the host-side crop (md : md + wo) discards.
    gt = _cdiv(md, Wp) if md > 0 else 0
    gb = max(0, _cdiv(2 * md * Wp + md + slab_len - Hp * Wp, Wp))
    Lflat = (Hp + gt + gb) * Wp
    base = (gt + md) * Wp

    # single pad per input (spatial pad + flat guard merged), stays int8
    pad = ((0, 0), (0, 0), (pad_size + gt, pad_size + gb), (pad_size, pad_size))
    p1 = jnp.pad(x1, pad).reshape(B, C, Lflat)
    p2 = jnp.pad(x2, pad).reshape(B, C, Lflat)

    kernel = functools.partial(
        _corr_s1_kernel, k=k, stride2=stride2, D=D, Wp=Wp, base=base,
        slab_len=slab_len, l_rs=l_rs, l_out_pad=l_out_pad,
        zp1=zp1, zp2=zp2, rescale=rescale)

    # explicit VMEM budget (double-buffered int8 inputs/outputs + int32 scratch),
    # clamped against the actual chip capacity (64 MiB on v7x, 128 MiB v5e/v6e)
    in_bytes = C * Lflat                              # int8, per input per buffer
    out_bytes = DD * l_out_pad                        # int8
    scratch_bytes = 4 * (C * slab_len + C * Lflat + DD * slab_len + DD * l_rs
                         + slab_len)
    vmem_need = 2 * 2 * in_bytes + 2 * out_bytes + scratch_bytes
    try:
        cap = int(pltpu.get_tpu_info().vmem_capacity_bytes)
    except Exception:
        cap = 64 * 1024 * 1024
    vmem_limit = int(min(int(0.9 * cap),
                         max(2 * vmem_need + (4 << 20), 32 << 20)))

    out_flat = pl.pallas_call(
        kernel,
        out_shape=jax.ShapeDtypeStruct((B, DD, l_out_pad), jnp.int8),
        grid_spec=pltpu.PrefetchScalarGridSpec(
            num_scalar_prefetch=0,
            grid=(B,),
            in_specs=[
                pl.BlockSpec((1, C, Lflat), lambda b: (b, 0, 0)),
                pl.BlockSpec((1, C, Lflat), lambda b: (b, 0, 0)),
            ],
            out_specs=pl.BlockSpec((1, DD, l_out_pad), lambda b: (b, 0, 0)),
            scratch_shapes=[
                pltpu.VMEM((C, slab_len), jnp.int32),   # widened p1 slab (zp1 folded)
                pltpu.VMEM((C, Lflat), jnp.int32),      # widened p2 (whole flat)
                pltpu.VMEM((DD, slab_len), jnp.int32),  # per-displacement channel dot
                pltpu.VMEM((DD, l_rs), jnp.int32),      # horizontal box sums
                pltpu.VMEM((1, slab_len), jnp.int32),   # column sums (zp2 path)
            ]),
        compiler_params=pltpu.CompilerParams(
            dimension_semantics=("parallel",),
            vmem_limit_bytes=vmem_limit),
    )(p1, p2)
    # TODO(synk): when B == 1 on v7x, split the displacement rows over a second
    # "parallel" grid axis so both TensorCores are used.

    # [B, D*D, l_out_pad] -> keep the ho*Wp valid lanes -> [B, D*D, ho, Wp]
    # -> crop the wo valid columns.
    return out_flat[:, :, :l_out].reshape(B, DD, ho, Wp)[:, :, :, md:md + wo]


# ---------------------------------------------------------------------------
# Public wrapper
# ---------------------------------------------------------------------------
def correlation_pallas(x1, x2, *, kernel_size, max_displacement, stride1,
                       stride2, pad_size, is_multiply=True,
                       scale1=1.0, zero_point1=0, scale2=1.0, zero_point2=0,
                       inter_scale=1.0, out_scale=1.0):
    """Quantized correlation forward (returns the output int_repr, dtype int8)."""
    assert is_multiply, "Only multiplication correlation is supported"
    assert kernel_size > 0 and kernel_size % 2 == 1
    assert max_displacement >= 0 and stride1 > 0 and stride2 > 0 and pad_size >= 0
    B, C, H, W = x1.shape
    assert x2.shape == x1.shape

    kr = (kernel_size - 1) // 2
    border = max_displacement + kr
    Hp, Wp = H + 2 * pad_size, W + 2 * pad_size
    ho1 = Hp - 2 * border
    wo1 = Wp - 2 * border
    assert ho1 > 0 and wo1 > 0, "invalid output extent"
    R = max_displacement // stride2
    D = 2 * R + 1
    sumelems = kernel_size * kernel_size * C
    # int32 accumulator headroom (|a - zp| <= 255)
    assert sumelems * 255 * 255 < 2 ** 31, "int32 accumulator would overflow"

    # TODO(synk): the BPU two-stage fixed-point requantization (intermediate
    # requant with inter_scale, then final requant with the output scale) is
    # collapsed into a single float32 rescale here (jnp.round = half-to-even).
    del inter_scale
    rescale = float(scale1) * float(scale2) / (float(sumelems) * float(out_scale))

    dense = _correlation_s1(
        x1, x2, kernel_size=kernel_size, max_displacement=max_displacement,
        stride2=stride2, pad_size=pad_size, disp_grid=D, ho=ho1, wo=wo1,
        zp1=int(zero_point1), zp2=int(zero_point2), rescale=rescale)

    if stride1 == 1:
        return dense
    # TODO(synk): stride1 > 1 computes the dense map and subsamples on host;
    # wasteful for large stride1 but reuses the optimized int8/lane-dense kernel.
    return dense[:, :, ::stride1, ::stride1]


# ---------------------------------------------------------------------------
# Pure-JAX reference (same quantized semantics)
# ---------------------------------------------------------------------------
def correlation_ref(x1, x2, *, kernel_size, max_displacement, stride1, stride2,
                    pad_size, scale1, zero_point1, scale2, zero_point2,
                    out_scale):
    B, C, H, W = x1.shape
    kr = (kernel_size - 1) // 2
    border = max_displacement + kr
    Hp, Wp = H + 2 * pad_size, W + 2 * pad_size
    ho = -(-(Hp - 2 * border) // stride1)
    wo = -(-(Wp - 2 * border) // stride1)
    R = max_displacement // stride2
    sumelems = kernel_size * kernel_size * C
    rescale = float(scale1) * float(scale2) / (float(sumelems) * float(out_scale))

    pad = ((0, 0), (0, 0), (pad_size, pad_size), (pad_size, pad_size))
    p1 = jnp.pad(x1, pad).astype(jnp.int32) - zero_point1
    p2 = jnp.pad(x2, pad).astype(jnp.int32) - zero_point2

    outs = []
    for dy in range(-R, R + 1):
        for dx in range(-R, R + 1):
            acc = jnp.zeros((B, ho, wo), jnp.int32)
            for j in range(kernel_size):
                for i in range(kernel_size):
                    y1 = max_displacement + j
                    x1p = max_displacement + i
                    y2 = y1 + dy * stride2
                    x2p = x1p + dx * stride2
                    a = p1[:, :, y1:y1 + (ho - 1) * stride1 + 1:stride1,
                           x1p:x1p + (wo - 1) * stride1 + 1:stride1]
                    b = p2[:, :, y2:y2 + (ho - 1) * stride1 + 1:stride1,
                           x2p:x2p + (wo - 1) * stride1 + 1:stride1]
                    acc = acc + jnp.sum(a * b, axis=1)
            outs.append(acc)
    acc = jnp.stack(outs, axis=1)
    q = jnp.round(acc.astype(jnp.float32) * rescale)
    q = jnp.clip(q, -128.0, 127.0)
    return q.astype(jnp.int8)


if __name__ == "__main__":
    # Module config (deterministic, in-script).
    kernel_size = 3
    max_displacement = 4
    stride2 = 2
    pad_size = 4

    B, C, H, W = 2, 8, 16, 16
    key = jax.random.PRNGKey(0)
    ka, kb = jax.random.split(key)
    data1 = jax.random.randint(ka, (B, C, H, W), -128, 128,
                               dtype=jnp.int32).astype(jnp.int8)
    data2 = jax.random.randint(kb, (B, C, H, W), -128, 128,
                               dtype=jnp.int32).astype(jnp.int8)

    cases = [
        # symmetric qint8, stride1 == 1 (main optimized path)
        dict(stride1=1, zp1=0, zp2=0, scale1=0.05, scale2=0.05, out_scale=0.025),
        # nonzero zero-points + stride1 > 1 (exercises zp folding + subsample path)
        dict(stride1=2, zp1=3, zp2=-2, scale1=0.04, scale2=0.06, out_scale=0.02),
    ]

    for cfg in cases:
        out = correlation_pallas(
            data1, data2,
            kernel_size=kernel_size, max_displacement=max_displacement,
            stride1=cfg["stride1"], stride2=stride2, pad_size=pad_size,
            is_multiply=True,
            scale1=cfg["scale1"], zero_point1=cfg["zp1"],
            scale2=cfg["scale2"], zero_point2=cfg["zp2"],
            inter_scale=1.0, out_scale=cfg["out_scale"])
        out = jax.block_until_ready(out)

        ref = correlation_ref(
            data1, data2,
            kernel_size=kernel_size, max_displacement=max_displacement,
            stride1=cfg["stride1"], stride2=stride2, pad_size=pad_size,
            scale1=cfg["scale1"], zero_point1=cfg["zp1"],
            scale2=cfg["scale2"], zero_point2=cfg["zp2"],
            out_scale=cfg["out_scale"])
        ref = jax.block_until_ready(ref)

        assert out.shape == ref.shape and out.dtype == jnp.int8
        assert bool(jnp.array_equal(out, ref)), \
            f"Pallas kernel mismatch vs JAX reference for cfg={cfg}"

    print("KERNEL_OK")
</pallas_src>

<mosaic_0001>
module attributes {stable_mosaic.version = 11 : i64} {
  func.func @_corr_s1_kernel(%arg0: i32, %arg1: memref<1x8x672xi8, #tpu.memory_space<vmem>>, %arg2: memref<1x8x672xi8, #tpu.memory_space<vmem>>, %arg3: memref<1x25x384xi8, #tpu.memory_space<vmem>>, %arg4: memref<8x434xi32, #tpu.memory_space<vmem>>, %arg5: memref<8x672xi32, #tpu.memory_space<vmem>>, %arg6: memref<25x434xi32, #tpu.memory_space<vmem>>, %arg7: memref<25x432xi32, #tpu.memory_space<vmem>>, %arg8: memref<1x434xi32, #tpu.memory_space<vmem>>) attributes {dimension_semantics = [#tpu.dimension_semantics<parallel>], iteration_bounds = array<i64: 2>, scalar_prefetch = 0 : i64, scratch_operands = 5 : i64, tpu.core_type = #tpu.core_type<tc>, window_params = [{transform_indices = @transform_0, window_bounds = array<i64: 1, 8, 672>}, {transform_indices = @transform_1, window_bounds = array<i64: 1, 8, 672>}, {transform_indices = @transform_2, window_bounds = array<i64: 1, 25, 384>}]} {
    %c0 = arith.constant 0 : index
    %c0_0 = arith.constant 0 : index
    %c120 = arith.constant 120 : index
    %0 = vector.load %arg1[%c0, %c0_0, %c120] : memref<1x8x672xi8, #tpu.memory_space<vmem>>, vector<1x8x434xi8>
    %1 = vector.shape_cast %0 : vector<1x8x434xi8> to vector<8x434xi8>
    %2 = arith.extsi %1 : vector<8x434xi8> to vector<8x434xi32>
    %c0_1 = arith.constant 0 : index
    %c0_2 = arith.constant 0 : index
    %3 = vector.load %arg4[%c0_1, %c0_2] : memref<8x434xi32, #tpu.memory_space<vmem>>, vector<8x434xi32>
    tpu.vector_store %arg4[%c0_1, %c0_2], %2 {strides = array<i32>} : memref<8x434xi32, #tpu.memory_space<vmem>>, vector<8x434xi32>,
    %c0_3 = arith.constant 0 : index
    %c0_4 = arith.constant 0 : index
    %c0_5 = arith.constant 0 : index
    %4 = vector.load %arg2[%c0_3, %c0_4, %c0_5] : memref<1x8x672xi8, #tpu.memory_space<vmem>>, vector<1x8x672xi8>
    %5 = vector.shape_cast %4 : vector<1x8x672xi8> to vector<8x672xi8>
    %6 = arith.extsi %5 : vector<8x672xi8> to vector<8x672xi32>
    %c0_6 = arith.constant 0 : index
    %c0_7 = arith.constant 0 : index
    %7 = vector.load %arg5[%c0_6, %c0_7] : memref<8x672xi32, #tpu.memory_space<vmem>>, vector<8x672xi32>
    tpu.vector_store %arg5[%c0_6, %c0_7], %6 {strides = array<i32>} : memref<8x672xi32, #tpu.memory_space<vmem>>, vector<8x672xi32>,
    %c0_8 = arith.constant 0 : index
    %c20 = arith.constant 20 : index
    %8 = vector.load %arg5[%c0_8, %c20] : memref<8x672xi32, #tpu.memory_space<vmem>>, vector<8x434xi32>
    %c0_9 = arith.constant 0 : index
    %c0_10 = arith.constant 0 : index
    %9 = vector.load %arg4[%c0_9, %c0_10] : memref<8x434xi32, #tpu.memory_space<vmem>>, vector<8x434xi32>
    %10 = arith.muli %9, %8 : vector<8x434xi32>
    %cst = arith.constant dense<0> : vector<434xi32>
    %11 = vector.multi_reduction <add>, %10, %cst [0] : vector<8x434xi32> to vector<434xi32>
    %12 = vector.shape_cast %11 : vector<434xi32> to vector<1x434xi32>
    %c0_11 = arith.constant 0 : index
    %c0_12 = arith.constant 0 : index
    %13 = vector.load %arg6[%c0_11, %c0_12] : memref<25x434xi32, #tpu.memory_space<vmem>>, vector<1x434xi32>
    tpu.vector_store %arg6[%c0_11, %c0_12], %12 {strides = array<i32>} : memref<25x434xi32, #tpu.memory_space<vmem>>, vector<1x434xi32>,
    %c0_13 = arith.constant 0 : index
    %c22 = arith.constant 22 : index
    %14 = vector.load %arg5[%c0_13, %c22] : memref<8x672xi32, #tpu.memory_space<vmem>>, vector<8x434xi32>
    %c0_14 = arith.constant 0 : index
    %c0_15 = arith.constant 0 : index
    %15 = vector.load %arg4[%c0_14, %c0_15] : memref<8x434xi32, #tpu.memory_space<vmem>>, vector<8x434xi32>
    %16 = arith.muli %15, %14 : vector<8x434xi32>
    %cst_16 = arith.constant dense<0> : vector<434xi32>
    %17 = vector.multi_reduction <add>, %16, %cst_16 [0] : vector<8x434xi32> to vector<434xi32>
    %18 = vector.shape_cast %17 : vector<434xi32> to vector<1x434xi32>
    %c1 = arith.constant 1 : index
    %c0_17 = arith.constant 0 : index
    %19 = vector.load %arg6[%c1, %c0_17] : memref<25x434xi32, #tpu.memory_space<vmem>>, vector<1x434xi32>
    tpu.vector_store %arg6[%c1, %c0_17], %18 {strides = array<i32>} : memref<25x434xi32, #tpu.memory_space<vmem>>, vector<1x434xi32>,
    %c0_18 = arith.constant 0 : index
    %c24 = arith.constant 24 : index
    %20 = vector.load %arg5[%c0_18, %c24] : memref<8x672xi32, #tpu.memory_space<vmem>>, vector<8x434xi32>
    %c0_19 = arith.constant 0 : index
    %c0_20 = arith.constant 0 : index
    %21 = vector.load %arg4[%c0_19, %c0_20] : memref<8x434xi32, #tpu.memory_space<vmem>>, vector<8x434xi32>
    %22 = arith.muli %21, %20 : vector<8x434xi32>
    %cst_21 = arith.constant dense<0> : vector<434xi32>
    %23 = vector.multi_reduction <add>, %22, %cst_21 [0] : vector<8x434xi32> to vector<434xi32>
    %24 = vector.shape_cast %23 : vector<434xi32> to vector<1x434xi32>
    %c2 = arith.constant 2 : index
    %c0_22 = arith.constant 0 : index
    %25 = vector.load %arg6[%c2, %c0_22] : memref<25x434xi32, #tpu.memory_space<vmem>>, vector<1x434xi32>
    tpu.vector_store %arg6[%c2, %c0_22], %24 {strides = array<i32>} : memref<25x434xi32, #tpu.memory_space<vmem>>, vector<1x434xi32>,
    %c0_23 = arith.constant 0 : index
    %c26 = arith.constant 26 : index
    %26 = vector.load %arg5[%c0_23, %c26] : memref<8x672xi32, #tpu.memory_space<vmem>>, vector<8x434xi32>
    %c0_24 = arith.constant 0 : index
    %c0_25 = arith.constant 0 : index
    %27 = vector.load %arg4[%c0_24, %c0_25] : memref<8x434xi32, #tpu.memory_space<vmem>>, vector<8x434xi32>
    %28 = arith.muli %27, %26 : vector<8x434xi32>
    %cst_26 = arith.constant dense<0> : vector<434xi32>
    %29 = vector.multi_reduction <add>, %28, %cst_26 [0] : vector<8x434xi32> to vector<434xi32>
    %30 = vector.shape_cast %29 : vector<434xi32> to vector<1x434xi32>
    %c3 = arith.constant 3 : index
    %c0_27 = arith.constant 0 : index
    %31 = vector.load %arg6[%c3, %c0_27] : memref<25x434xi32, #tpu.memory_space<vmem>>, vector<1x434xi32>
    tpu.vector_store %arg6[%c3, %c0_27], %30 {strides = array<i32>} : memref<25x434xi32, #tpu.memory_space<vmem>>, vector<1x434xi32>,
    %c0_28 = arith.constant 0 : index
    %c28 = arith.constant 28 : index
    %32 = vector.load %arg5[%c0_28, %c28] : memref<8x672xi32, #tpu.memory_space<vmem>>, vector<8x434xi32>
    %c0_29 = arith.constant 0 : index
    %c0_30 = arith.constant 0 : index
    %33 = vector.load %arg4[%c0_29, %c0_30] : memref<8x434xi32, #tpu.memory_space<vmem>>, vector<8x434xi32>
    %34 = arith.muli %33, %32 : vector<8x434xi32>
    %cst_31 = arith.constant dense<0> : vector<434xi32>
    %35 = vector.multi_reduction <add>, %34, %cst_31 [0] : vector<8x434xi32> to vector<434xi32>
    %36 = vector.shape_cast %35 : vector<434xi32> to vector<1x434xi32>
    %c4 = arith.constant 4 : index
    %c0_32 = arith.constant 0 : index
    %37 = vector.load %arg6[%c4, %c0_32] : memref<25x434xi32, #tpu.memory_space<vmem>>, vector<1x434xi32>
    tpu.vector_store %arg6[%c4, %c0_32], %36 {strides = array<i32>} : memref<25x434xi32, #tpu.memory_space<vmem>>, vector<1x434xi32>,
    %c0_33 = arith.constant 0 : index
    %c68 = arith.constant 68 : index
    %38 = vector.load %arg5[%c0_33, %c68] : memref<8x672xi32, #tpu.memory_space<vmem>>, vector<8x434xi32>
    %c0_34 = arith.constant 0 : index
    %c0_35 = arith.constant 0 : index
    %39 = vector.load %arg4[%c0_34, %c0_35] : memref<8x434xi32, #tpu.memory_space<vmem>>, vector<8x434xi32>
    %40 = arith.muli %39, %38 : vector<8x434xi32>
    %cst_36 = arith.constant dense<0> : vector<434xi32>
    %41 = vector.multi_reduction <add>, %40, %cst_36 [0] : vector<8x434xi32> to vector<434xi32>
    %42 = vector.shape_cast %41 : vector<434xi32> to vector<1x434xi32>
    %c5 = arith.constant 5 : index
    %c0_37 = arith.constant 0 : index
    %43 = vector.load %arg6[%c5, %c0_37] : memref<25x434xi32, #tpu.memory_space<vmem>>, vector<1x434xi32>
    tpu.vector_store %arg6[%c5, %c0_37], %42 {strides = array<i32>} : memref<25x434xi32, #tpu.memory_space<vmem>>, vector<1x434xi32>,
    %c0_38 = arith.constant 0 : index
    %c70 = arith.constant 70 : index
    %44 = vector.load %arg5[%c0_38, %c70] : memref<8x672xi32, #tpu.memory_space<vmem>>, vector<8x434xi32>
    %c0_39 = arith.constant 0 : index
    %c0_40 = arith.constant 0 : index
    %45 = vector.load %arg4[%c0_39, %c0_40] : memref<8x434xi32, #tpu.memory_space<vmem>>, vector<8x434xi32>
    %46 = arith.muli %45, %44 : vector<8x434xi32>
    %cst_41 = arith.constant dense<0> : vector<434xi32>
    %47 = vector.multi_reduction <add>, %46, %cst_41 [0] : vector<8x434xi32> to vector<434xi32>
    %48 = vector.shape_cast %47 : vector<434xi32> to vector<1x434xi32>
    %c6 = arith.constant 6 : index
    %c0_42 = arith.constant 0 : index
    %49 = vector.load %arg6[%c6, %c0_42] : memref<25x434xi32, #tpu.memory_space<vmem>>, vector<1x434xi32>
    tpu.vector_store %arg6[%c6, %c0_42], %48 {strides = array<i32>} : memref<25x434xi32, #tpu.memory_space<vmem>>, vector<1x434xi32>,
    %c0_43 = arith.constant 0 : index
    %c72 = arith.constant 72 : index
    %50 = vector.load %arg5[%c0_43, %c72] : memref<8x672xi32, #tpu.memory_space<vmem>>, vector<8x434xi32>
    %c0_44 = arith.constant 0 : index
    %c0_45 = arith.constant 0 : index
    %51 = vector.load %arg4[%c0_44, %c0_45] : memref<8x434xi32, #tpu.memory_space<vmem>>, vector<8x434xi32>
    %52 = arith.muli %51, %50 : vector<8x434xi32>
    %cst_46 = arith.constant dense<0> : vector<434xi32>
    %53 = vector.multi_reduction <add>, %52, %cst_46 [0] : vector<8x434xi32> to vector<434xi32>
    %54 = vector.shape_cast %53 : vector<434xi32> to vector<1x434xi32>
    %c7 = arith.constant 7 : index
    %c0_47 = arith.constant 0 : index
    %55 = vector.load %arg6[%c7, %c0_47] : memref<25x434xi32, #tpu.memory_space<vmem>>, vector<1x434xi32>
    tpu.vector_store %arg6[%c7, %c0_47], %54 {strides = array<i32>} : memref<25x434xi32, #tpu.memory_space<vmem>>, vector<1x434xi32>,
    %c0_48 = arith.constant 0 : index
    %c74 = arith.constant 74 : index
    %56 = vector.load %arg5[%c0_48, %c74] : memref<8x672xi32, #tpu.memory_space<vmem>>, vector<8x434xi32>
    %c0_49 = arith.constant 0 : index
    %c0_50 = arith.constant 0 : index
    %57 = vector.load %arg4[%c0_49, %c0_50] : memref<8x434xi32, #tpu.memory_space<vmem>>, vector<8x434xi32>
    %58 = arith.muli %57, %56 : vector<8x434xi32>
    %cst_51 = arith.constant dense<0> : vector<434xi32>
    %59 = vector.multi_reduction <add>, %58, %cst_51 [0] : vector<8x434xi32> to vector<434xi32>
    %60 = vector.shape_cast %59 : vector<434xi32> to vector<1x434xi32>
    %c8 = arith.constant 8 : index
    %c0_52 = arith.constant 0 : index
    %61 = vector.load %arg6[%c8, %c0_52] : memref<25x434xi32, #tpu.memory_space<vmem>>, vector<1x434xi32>
    tpu.vector_store %arg6[%c8, %c0_52], %60 {strides = array<i32>} : memref<25x434xi32, #tpu.memory_space<vmem>>, vector<1x434xi32>,
    %c0_53 = arith.constant 0 : index
    %c76 = arith.constant 76 : index
    %62 = vector.load %arg5[%c0_53, %c76] : memref<8x672xi32, #tpu.memory_space<vmem>>, vector<8x434xi32>
    %c0_54 = arith.constant 0 : index
    %c0_55 = arith.constant 0 : index
    %63 = vector.load %arg4[%c0_54, %c0_55] : memref<8x434xi32, #tpu.memory_space<vmem>>, vector<8x434xi32>
    %64 = arith.muli %63, %62 : vector<8x434xi32>
    %cst_56 = arith.constant dense<0> : vector<434xi32>
    %65 = vector.multi_reduction <add>, %64, %cst_56 [0] : vector<8x434xi32> to vector<434xi32>
    %66 = vector.shape_cast %65 : vector<434xi32> to vector<1x434xi32>
    %c9 = arith.constant 9 : index
    %c0_57 = arith.constant 0 : index
    %67 = vector.load %arg6[%c9, %c0_57] : memref<25x434xi32, #tpu.memory_space<vmem>>, vector<1x434xi32>
    tpu.vector_store %arg6[%c9, %c0_57], %66 {strides = array<i32>} : memref<25x434xi32, #tpu.memory_space<vmem>>, vector<1x434xi32>,
    %c0_58 = arith.constant 0 : index
    %c116 = arith.constant 116 : index
    %68 = vector.load %arg5[%c0_58, %c116] : memref<8x672xi32, #tpu.memory_space<vmem>>, vector<8x434xi32>
    %c0_59 = arith.constant 0 : index
    %c0_60 = arith.constant 0 : index
    %69 = vector.load %arg4[%c0_59, %c0_60] : memref<8x434xi32, #tpu.memory_space<vmem>>, vector<8x434xi32>
    %70 = arith.muli %69, %68 : vector<8x434xi32>
    %cst_61 = arith.constant dense<0> : vector<434xi32>
    %71 = vector.multi_reduction <add>, %70, %cst_61 [0] : vector<8x434xi32> to vector<434xi32>
    %72 = vector.shape_cast %71 : vector<434xi32> to vector<1x434xi32>
    %c10 = arith.constant 10 : index
    %c0_62 = arith.constant 0 : index
    %73 = vector.load %arg6[%c10, %c0_62] : memref<25x434xi32, #tpu.memory_space<vmem>>, vector<1x434xi32>
    tpu.vector_store %arg6[%c10, %c0_62], %72 {strides = array<i32>} : memref<25x434xi32, #tpu.memory_space<vmem>>, vector<1x434xi32>,
    %c0_63 = arith.constant 0 : index
    %c118 = arith.constant 118 : index
    %74 = vector.load %arg5[%c0_63, %c118] : memref<8x672xi32, #tpu.memory_space<vmem>>, vector<8x434xi32>
    %c0_64 = arith.constant 0 : index
    %c0_65 = arith.constant 0 : index
    %75 = vector.load %arg4[%c0_64, %c0_65] : memref<8x434xi32, #tpu.memory_space<vmem>>, vector<8x434xi32>
    %76 = arith.muli %75, %74 : vector<8x434xi32>
    %cst_66 = arith.constant dense<0> : vector<434xi32>
    %77 = vector.multi_reduction <add>, %76, %cst_66 [0] : vector<8x434xi32> to vector<434xi32>
    %78 = vector.shape_cast %77 : vector<434xi32> to vector<1x434xi32>
    %c11 = arith.constant 11 : index
    %c0_67 = arith.constant 0 : index
    %79 = vector.load %arg6[%c11, %c0_67] : memref<25x434xi32, #tpu.memory_space<vmem>>, vector<1x434xi32>
    tpu.vector_store %arg6[%c11, %c0_67], %78 {strides = array<i32>} : memref<25x434xi32, #tpu.memory_space<vmem>>, vector<1x434xi32>,
    %c0_68 = arith.constant 0 : index
    %c120_69 = arith.constant 120 : index
    %80 = vector.load %arg5[%c0_68, %c120_69] : memref<8x672xi32, #tpu.memory_space<vmem>>, vector<8x434xi32>
    %c0_70 = arith.constant 0 : index
    %c0_71 = arith.constant 0 : index
    %81 = vector.load %arg4[%c0_70, %c0_71] : memref<8x434xi32, #tpu.memory_space<vmem>>, vector<8x434xi32>
    %82 = arith.muli %81, %80 : vector<8x434xi32>
    %cst_72 = arith.constant dense<0> : vector<434xi32>
    %83 = vector.multi_reduction <add>, %82, %cst_72 [0] : vector<8x434xi32> to vector<434xi32>
    %84 = vector.shape_cast %83 : vector<434xi32> to vector<1x434xi32>
    %c12 = arith.constant 12 : index
    %c0_73 = arith.constant 0 : index
    %85 = vector.load %arg6[%c12, %c0_73] : memref<25x434xi32, #tpu.memory_space<vmem>>, vector<1x434xi32>
    tpu.vector_store %arg6[%c12, %c0_73], %84 {strides = array<i32>} : memref<25x434xi32, #tpu.memory_space<vmem>>, vector<1x434xi32>,
    %c0_74 = arith.constant 0 : index
    %c122 = arith.constant 122 : index
    %86 = vector.load %arg5[%c0_74, %c122] : memref<8x672xi32, #tpu.memory_space<vmem>>, vector<8x434xi32>
    %c0_75 = arith.constant 0 : index
    %c0_76 = arith.constant 0 : index
    %87 = vector.load %arg4[%c0_75, %c0_76] : memref<8x434xi32, #tpu.memory_space<vmem>>, vector<8x434xi32>
    %88 = arith.muli %87, %86 : vector<8x434xi32>
    %cst_77 = arith.constant dense<0> : vector<434xi32>
    %89 = vector.multi_reduction <add>, %88, %cst_77 [0] : vector<8x434xi32> to vector<434xi32>
    %90 = vector.shape_cast %89 : vector<434xi32> to vector<1x434xi32>
    %c13 = arith.constant 13 : index
    %c0_78 = arith.constant 0 : index
    %91 = vector.load %arg6[%c13, %c0_78] : memref<25x434xi32, #tpu.memory_space<vmem>>, vector<1x434xi32>
    tpu.vector_store %arg6[%c13, %c0_78], %90 {strides = array<i32>} : memref<25x434xi32, #tpu.memory_space<vmem>>, vector<1x434xi32>,
    %c0_79 = arith.constant 0 : index
    %c124 = arith.constant 124 : index
    %92 = vector.load %arg5[%c0_79, %c124] : memref<8x672xi32, #tpu.memory_space<vmem>>, vector<8x434xi32>
    %c0_80 = arith.constant 0 : index
    %c0_81 = arith.constant 0 : index
    %93 = vector.load %arg4[%c0_80, %c0_81] : memref<8x434xi32, #tpu.memory_space<vmem>>, vector<8x434xi32>
    %94 = arith.muli %93, %92 : vector<8x434xi32>
    %cst_82 = arith.constant dense<0> : vector<434xi32>
    %95 = vector.multi_reduction <add>, %94, %cst_82 [0] : vector<8x434xi32> to vector<434xi32>
    %96 = vector.shape_cast %95 : vector<434xi32> to vector<1x434xi32>
    %c14 = arith.constant 14 : index
    %c0_83 = arith.constant 0 : index
    %97 = vector.load %arg6[%c14, %c0_83] : memref<25x434xi32, #tpu.memory_space<vmem>>, vector<1x434xi32>
    tpu.vector_store %arg6[%c14, %c0_83], %96 {strides = array<i32>} : memref<25x434xi32, #tpu.memory_space<vmem>>, vector<1x434xi32>,
    %c0_84 = arith.constant 0 : index
    %c164 = arith.constant 164 : index
    %98 = vector.load %arg5[%c0_84, %c164] : memref<8x672xi32, #tpu.memory_space<vmem>>, vector<8x434xi32>
    %c0_85 = arith.constant 0 : index
    %c0_86 = arith.constant 0 : index
    %99 = vector.load %arg4[%c0_85, %c0_86] : memref<8x434xi32, #tpu.memory_space<vmem>>, vector<8x434xi32>
    %100 = arith.muli %99, %98 : vector<8x434xi32>
    %cst_87 = arith.constant dense<0> : vector<434xi32>
    %101 = vector.multi_reduction <add>, %100, %cst_87 [0] : vector<8x434xi32> to vector<434xi32>
    %102 = vector.shape_cast %101 : vector<434xi32> to vector<1x434xi32>
    %c15 = arith.constant 15 : index
    %c0_88 = arith.constant 0 : index
    %103 = vector.load %arg6[%c15, %c0_88] : memref<25x434xi32, #tpu.memory_space<vmem>>, vector<1x434xi32>
    tpu.vector_store %arg6[%c15, %c0_88], %102 {strides = array<i32>} : memref<25x434xi32, #tpu.memory_space<vmem>>, vector<1x434xi32>,
    %c0_89 = arith.constant 0 : index
    %c166 = arith.constant 166 : index
    %104 = vector.load %arg5[%c0_89, %c166] : memref<8x672xi32, #tpu.memory_space<vmem>>, vector<8x434xi32>
    %c0_90 = arith.constant 0 : index
    %c0_91 = arith.constant 0 : index
    %105 = vector.load %arg4[%c0_90, %c0_91] : memref<8x434xi32, #tpu.memory_space<vmem>>, vector<8x434xi32>
    %106 = arith.muli %105, %104 : vector<8x434xi32>
    %cst_92 = arith.constant dense<0> : vector<434xi32>
    %107 = vector.multi_reduction <add>, %106, %cst_92 [0] : vector<8x434xi32> to vector<434xi32>
    %108 = vector.shape_cast %107 : vector<434xi32> to vector<1x434xi32>
    %c16 = arith.constant 16 : index
    %c0_93 = arith.constant 0 : index
    %109 = vector.load %arg6[%c16, %c0_93] : memref<25x434xi32, #tpu.memory_space<vmem>>, vector<1x434xi32>
    tpu.vector_store %arg6[%c16, %c0_93], %108 {strides = array<i32>} : memref<25x434xi32, #tpu.memory_space<vmem>>, vector<1x434xi32>,
    %c0_94 = arith.constant 0 : index
    %c168 = arith.constant 168 : index
    %110 = vector.load %arg5[%c0_94, %c168] : memref<8x672xi32, #tpu.memory_space<vmem>>, vector<8x434xi32>
    %c0_95 = arith.constant 0 : index
    %c0_96 = arith.constant 0 : index
    %111 = vector.load %arg4[%c0_95, %c0_96] : memref<8x434xi32, #tpu.memory_space<vmem>>, vector<8x434xi32>
    %112 = arith.muli %111, %110 : vector<8x434xi32>
    %cst_97 = arith.constant dense<0> : vector<434xi32>
    %113 = vector.multi_reduction <add>, %112, %cst_97 [0] : vector<8x434xi32> to vector<434xi32>
    %114 = vector.shape_cast %113 : vector<434xi32> to vector<1x434xi32>
    %c17 = arith.constant 17 : index
    %c0_98 = arith.constant 0 : index
    %115 = vector.load %arg6[%c17, %c0_98] : memref<25x434xi32, #tpu.memory_space<vmem>>, vector<1x434xi32>
    tpu.vector_store %arg6[%c17, %c0_98], %114 {strides = array<i32>} : memref<25x434xi32, #tpu.memory_space<vmem>>, vector<1x434xi32>,
    %c0_99 = arith.constant 0 : index
    %c170 = arith.constant 170 : index
    %116 = vector.load %arg5[%c0_99, %c170] : memref<8x672xi32, #tpu.memory_space<vmem>>, vector<8x434xi32>
    %c0_100 = arith.constant 0 : index
    %c0_101 = arith.constant 0 : index
    %117 = vector.load %arg4[%c0_100, %c0_101] : memref<8x434xi32, #tpu.memory_space<vmem>>, vector<8x434xi32>
    %118 = arith.muli %117, %116 : vector<8x434xi32>
    %cst_102 = arith.constant dense<0> : vector<434xi32>
    %119 = vector.multi_reduction <add>, %118, %cst_102 [0] : vector<8x434xi32> to vector<434xi32>
    %120 = vector.shape_cast %119 : vector<434xi32> to vector<1x434xi32>
    %c18 = arith.constant 18 : index
    %c0_103 = arith.constant 0 : index
    %121 = vector.load %arg6[%c18, %c0_103] : memref<25x434xi32, #tpu.memory_space<vmem>>, vector<1x434xi32>
    tpu.vector_store %arg6[%c18, %c0_103], %120 {strides = array<i32>} : memref<25x434xi32, #tpu.memory_space<vmem>>, vector<1x434xi32>,
    %c0_104 = arith.constant 0 : index
    %c172 = arith.constant 172 : index
    %122 = vector.load %arg5[%c0_104, %c172] : memref<8x672xi32, #tpu.memory_space<vmem>>, vector<8x434xi32>
    %c0_105 = arith.constant 0 : index
    %c0_106 = arith.constant 0 : index
    %123 = vector.load %arg4[%c0_105, %c0_106] : memref<8x434xi32, #tpu.memory_space<vmem>>, vector<8x434xi32>
    %124 = arith.muli %123, %122 : vector<8x434xi32>
    %cst_107 = arith.constant dense<0> : vector<434xi32>
    %125 = vector.multi_reduction <add>, %124, %cst_107 [0] : vector<8x434xi32> to vector<434xi32>
    %126 = vector.shape_cast %125 : vector<434xi32> to vector<1x434xi32>
    %c19 = arith.constant 19 : index
    %c0_108 = arith.constant 0 : index
    %127 = vector.load %arg6[%c19, %c0_108] : memref<25x434xi32, #tpu.memory_space<vmem>>, vector<1x434xi32>
    tpu.vector_store %arg6[%c19, %c0_108], %126 {strides = array<i32>} : memref<25x434xi32, #tpu.memory_space<vmem>>, vector<1x434xi32>,
    %c0_109 = arith.constant 0 : index
    %c212 = arith.constant 212 : index
    %128 = vector.load %arg5[%c0_109, %c212] : memref<8x672xi32, #tpu.memory_space<vmem>>, vector<8x434xi32>
    %c0_110 = arith.constant 0 : index
    %c0_111 = arith.constant 0 : index
    %129 = vector.load %arg4[%c0_110, %c0_111] : memref<8x434xi32, #tpu.memory_space<vmem>>, vector<8x434xi32>
    %130 = arith.muli %129, %128 : vector<8x434xi32>
    %cst_112 = arith.constant dense<0> : vector<434xi32>
    %131 = vector.multi_reduction <add>, %130, %cst_112 [0] : vector<8x434xi32> to vector<434xi32>
    %132 = vector.shape_cast %131 : vector<434xi32> to vector<1x434xi32>
    %c20_113 = arith.constant 20 : index
    %c0_114 = arith.constant 0 : index
    %133 = vector.load %arg6[%c20_113, %c0_114] : memref<25x434xi32, #tpu.memory_space<vmem>>, vector<1x434xi32>
    tpu.vector_store %arg6[%c20_113, %c0_114], %132 {strides = array<i32>} : memref<25x434xi32, #tpu.memory_space<vmem>>, vector<1x434xi32>,
    %c0_115 = arith.constant 0 : index
    %c214 = arith.constant 214 : index
    %134 = vector.load %arg5[%c0_115, %c214] : memref<8x672xi32, #tpu.memory_space<vmem>>, vector<8x434xi32>
    %c0_116 = arith.constant 0 : index
    %c0_117 = arith.constant 0 : index
    %135 = vector.load %arg4[%c0_116, %c0_117] : memref<8x434xi32, #tpu.memory_space<vmem>>, vector<8x434xi32>
    %136 = arith.muli %135, %134 : vector<8x434xi32>
    %cst_118 = arith.constant dense<0> : vector<434xi32>
    %137 = vector.multi_reduction <add>, %136, %cst_118 [0] : vector<8x434xi32> to vector<434xi32>
    %138 = vector.shape_cast %137 : vector<434xi32> to vector<1x434xi32>
    %c21 = arith.constant 21 : index
    %c0_119 = arith.constant 0 : index
    %139 = vector.load %arg6[%c21, %c0_119] : memref<25x434xi32, #tpu.memory_space<vmem>>, vector<1x434xi32>
    tpu.vector_store %arg6[%c21, %c0_119], %138 {strides = array<i32>} : memref<25x434xi32, #tpu.memory_space<vmem>>, vector<1x434xi32>,
    %c0_120 = arith.constant 0 : index
    %c216 = arith.constant 216 : index
    %140 = vector.load %arg5[%c0_120, %c216] : memref<8x672xi32, #tpu.memory_space<vmem>>, vector<8x434xi32>
    %c0_121 = arith.constant 0 : index
    %c0_122 = arith.constant 0 : index
    %141 = vector.load %arg4[%c0_121, %c0_122] : memref<8x434xi32, #tpu.memory_space<vmem>>, vector<8x434xi32>
    %142 = arith.muli %141, %140 : vector<8x434xi32>
    %cst_123 = arith.constant dense<0> : vector<434xi32>
    %143 = vector.multi_reduction <add>, %142, %cst_123 [0] : vector<8x434xi32> to vector<434xi32>
    %144 = vector.shape_cast %143 : vector<434xi32> to vector<1x434xi32>
    %c22_124 = arith.constant 22 : index
    %c0_125 = arith.constant 0 : index
    %145 = vector.load %arg6[%c22_124, %c0_125] : memref<25x434xi32, #tpu.memory_space<vmem>>, vector<1x434xi32>
    tpu.vector_store %arg6[%c22_124, %c0_125], %144 {strides = array<i32>} : memref<25x434xi32, #tpu.memory_space<vmem>>, vector<1x434xi32>,
    %c0_126 = arith.constant 0 : index
    %c218 = arith.constant 218 : index
    %146 = vector.load %arg5[%c0_126, %c218] : memref<8x672xi32, #tpu.memory_space<vmem>>, vector<8x434xi32>
    %c0_127 = arith.constant 0 : index
    %c0_128 = arith.constant 0 : index
    %147 = vector.load %arg4[%c0_127, %c0_128] : memref<8x434xi32, #tpu.memory_space<vmem>>, vector<8x434xi32>
    %148 = arith.muli %147, %146 : vector<8x434xi32>
    %cst_129 = arith.constant dense<0> : vector<434xi32>
    %149 = vector.multi_reduction <add>, %148, %cst_129 [0] : vector<8x434xi32> to vector<434xi32>
    %150 = vector.shape_cast %149 : vector<434xi32> to vector<1x434xi32>
    %c23 = arith.constant 23 : index
    %c0_130 = arith.constant 0 : index
    %151 = vector.load %arg6[%c23, %c0_130] : memref<25x434xi32, #tpu.memory_space<vmem>>, vector<1x434xi32>
    tpu.vector_store %arg6[%c23, %c0_130], %150 {strides = array<i32>} : memref<25x434xi32, #tpu.memory_space<vmem>>, vector<1x434xi32>,
    %c0_131 = arith.constant 0 : index
    %c220 = arith.constant 220 : index
    %152 = vector.load %arg5[%c0_131, %c220] : memref<8x672xi32, #tpu.memory_space<vmem>>, vector<8x434xi32>
    %c0_132 = arith.constant 0 : index
    %c0_133 = arith.constant 0 : index
    %153 = vector.load %arg4[%c0_132, %c0_133] : memref<8x434xi32, #tpu.memory_space<vmem>>, vector<8x434xi32>
    %154 = arith.muli %153, %152 : vector<8x434xi32>
    %cst_134 = arith.constant dense<0> : vector<434xi32>
    %155 = vector.multi_reduction <add>, %154, %cst_134 [0] : vector<8x434xi32> to vector<434xi32>
    %156 = vector.shape_cast %155 : vector<434xi32> to vector<1x434xi32>
    %c24_135 = arith.constant 24 : index
    %c0_136 = arith.constant 0 : index
    %157 = vector.load %arg6[%c24_135, %c0_136] : memref<25x434xi32, #tpu.memory_space<vmem>>, vector<1x434xi32>
    tpu.vector_store %arg6[%c24_135, %c0_136], %156 {strides = array<i32>} : memref<25x434xi32, #tpu.memory_space<vmem>>, vector<1x434xi32>,
    %c0_137 = arith.constant 0 : index
    %c0_138 = arith.constant 0 : index
    %158 = vector.load %arg6[%c0_137, %c0_138] : memref<25x434xi32, #tpu.memory_space<vmem>>, vector<25x432xi32>
    %c0_139 = arith.constant 0 : index
    %c1_140 = arith.constant 1 : index
    %159 = vector.load %arg6[%c0_139, %c1_140] : memref<25x434xi32, #tpu.memory_space<vmem>>, vector<25x432xi32>
    %160 = arith.addi %158, %159 : vector<25x432xi32>
    %c0_141 = arith.constant 0 : index
    %c2_142 = arith.constant 2 : index
    %161 = vector.load %arg6[%c0_141, %c2_142] : memref<25x434xi32, #tpu.memory_space<vmem>>, vector<25x432xi32>
    %162 = arith.addi %160, %161 : vector<25x432xi32>
    %c0_143 = arith.constant 0 : index
    %c0_144 = arith.constant 0 : index
    %163 = vector.load %arg7[%c0_143, %c0_144] : memref<25x432xi32, #tpu.memory_space<vmem>>, vector<25x432xi32>
    tpu.vector_store %arg7[%c0_143, %c0_144], %162 {strides = array<i32>} : memref<25x432xi32, #tpu.memory_space<vmem>>, vector<25x432xi32>,
    %c0_145 = arith.constant 0 : index
    %c0_146 = arith.constant 0 : index
    %164 = vector.load %arg7[%c0_145, %c0_146] : memref<25x432xi32, #tpu.memory_space<vmem>>, vector<25x384xi32>
    %c0_147 = arith.constant 0 : index
    %c24_148 = arith.constant 24 : index
    %165 = vector.load %arg7[%c0_147, %c24_148] : memref<25x432xi32, #tpu.memory_space<vmem>>, vector<25x384xi32>
    %166 = arith.addi %164, %165 : vector<25x384xi32>
    %c0_149 = arith.constant 0 : index
    %c48 = arith.constant 48 : index
    %167 = vector.load %arg7[%c0_149, %c48] : memref<25x432xi32, #tpu.memory_space<vmem>>, vector<25x384xi32>
    %168 = arith.addi %166, %167 : vector<25x384xi32>
    %169 = arith.sitofp %168 : vector<25x384xi32> to vector<25x384xf32>
    %cst_150 = arith.constant 0.00138888892 : f32
    %170 = vector.broadcast %cst_150 : f32 to vector<25x384xf32>
    %171 = arith.mulf %169, %170 : vector<25x384xf32>
    %172 = math.roundeven %171 : vector<25x384xf32>
    %cst_151 = arith.constant -1.280000e+02 : f32
    %cst_152 = arith.constant 1.270000e+02 : f32
    %173 = vector.broadcast %cst_151 : f32 to vector<25x384xf32>
    %174 = arith.maximumf %173, %172 : vector<25x384xf32>
    %175 = vector.broadcast %cst_152 : f32 to vector<25x384xf32>
    %176 = arith.minimumf %175, %174 : vector<25x384xf32>
    %177 = arith.fptosi %176 : vector<25x384xf32> to vector<25x384xi8>
    %c0_153 = arith.constant 0 : index
    %c0_154 = arith.constant 0 : index
    %c0_155 = arith.constant 0 : index
    %178 = vector.load %arg3[%c0_153, %c0_154, %c0_155] : memref<1x25x384xi8, #tpu.memory_space<vmem>>, vector<1x25x384xi8>
    %179 = vector.shape_cast %178 : vector<1x25x384xi8> to vector<25x384xi8>
    %180 = vector.shape_cast %177 : vector<25x384xi8> to vector<1x25x384xi8>
    tpu.vector_store %arg3[%c0_153, %c0_154, %c0_155], %180 {strides = array<i32>} : memref<1x25x384xi8, #tpu.memory_space<vmem>>, vector<1x25x384xi8>,
    return
  }
  func.func @transform_0(%arg0: i32) -> (i32, i32, i32) {
    %c0_i32 = arith.constant 0 : i32
    %c0_i32_0 = arith.constant 0 : i32
    %c0_i32_1 = arith.constant 0 : i32
    return %arg0, %c0_i32, %c0_i32_0 : i32, i32, i32
  }
  func.func @transform_1(%arg0: i32) -> (i32, i32, i32) {
    %c0_i32 = arith.constant 0 : i32
    %c0_i32_0 = arith.constant 0 : i32
    %c0_i32_1 = arith.constant 0 : i32
    return %arg0, %c0_i32, %c0_i32_0 : i32, i32, i32
  }
  func.func @transform_2(%arg0: i32) -> (i32, i32, i32) {
    %c0_i32 = arith.constant 0 : i32
    %c0_i32_0 = arith.constant 0 : i32
    %c0_i32_1 = arith.constant 0 : i32
    return %arg0, %c0_i32, %c0_i32_0 : i32, i32, i32
  }
}

</mosaic_0001>

<bundles_post_ra>
// kernel: tpu_custom_call.1
= control target key start
LH: loop header
LB: loop body
LE: loop exit
PB: predicated region body
PF: predicated region fallthrough
CT: control target
= control target key end

     0   :  { %7 = vsyncpa [#allocation8], 0  ;;  %s4192_s0 = inlined_call_operand.hbm [shape: s8[2,8,672], index: 0, kind: input, shape index: {}]   ;;  %s4193_s1 = inlined_call_operand.hbm [shape: s8[2,8,672], index: 1, kind: input, shape index: {}]   ;;  %s4194_s2 = inlined_call_operand.hbm [shape: s8[2,25,384], index: 2, kind: output, shape index: {}]  }
   0x1   :  { %9 = vsyncpa [#allocation8 + $0x1], 0 }
   0x2   :  { %10 = vsyncpa [#allocation11], 0 }
   0x3   :  { %12 = vsyncpa [#allocation11 + $0x1], 0 }
   0x4   :  { %13 = vsyncpa [#allocation9], 0 }
   0x5   :  { %15 = vsyncpa [#allocation9 + $0x1], 0  ;;  %s3013_s9 = smov 0   ;;  %s3015_s10 = smov 0  }
   0x6   :  { %s3017_s11 = smov 0   ;;  %s3019_s12 = smov 0  }
   0x7 LB: > { %s3034_s13 = sadd.s32 4294967295, %s2963_s12   ;;  %s2720_s14 = sadd.s32 4294967294, %s2963_s12   ;;  %s2963_s12 = sphi %s3019_s12, %s4220_s12   ;;  %s2959_s11 = sphi %s3017_s11, %s4219_s11   ;;  %s2955_s10 = sphi %s3015_s10, %s4218_s10   ;;  %s2951_s9 = sphi %s3013_s9, %s4217_s9  }
   0x8   : > { %s3038_s15 = sadd.s32 1, %s2963_s12   ;;  %s28_s16 = sadd.s32 1, %s2959_s11 }
   0x9   : > { %s25_s17 = ssub.s32 %s2963_s12, %s3038_s15  ;;  %p35_p0 = scmp.ne.s32.totalorder %s2959_s11, %s2955_s10 }
   0xa   : > { %p26_p1 = scmp.eq.s32.totalorder %s25_s17, 0  ;;  %p36_p2 = scmp.eq.s32.totalorder %s2963_s12, 0 }
   0xb   : > { %p41_p3 = scmp.ne.s32.totalorder %s2955_s10, %s2951_s9  ;;  %p42_p4 = scmp.eq.s32.totalorder %s3034_s13, 0 }
   0xc   : > { %s3050_s18 = scalar_select %p26_p1, %s2959_s11, %s28_s16  }
   0xd   : > { %p37_p5 = por %p36_p2, %p35_p0  ;;  %p3052_p6 = por %p42_p4, %p41_p3 }
   0xe   : > { %p91_p7 = scmp.eq.s32.totalorder %s3034_s13, 1  ;;  %p97_p8 = scmp.eq.s32.totalorder %s2720_s14, 1 }
   0xf   : > { %s4197_s19 = scalar_select %p3052_p6, 1, 0 }
  0x10   : > { %p2765_p10 = scmp.lt.s32.totalorder %s2963_s12, 2  ;;  %p3059_p11 = por %p91_p7, %p35_p0 }
  0x11   : > { %p3063_p12 = por %p97_p8, %p41_p3  ;;  %s3068_s22 = sand.u32 1, %s2959_s11  }
  0x12   : > { %s4198_s20 = scalar_select %p3059_p11, 1, 0 }
  0x13   : > { %s4199_s21 = scalar_select %p3063_p12, 1, 0 }
  0x14   : > { %s2730_s23 = smul.u32 192, %s2963_s12  ;;  %p3079_p13 = pnand %p2765_p10, %p37_p5 }
  0x15   : > { %s2729_s24 = smul.u32 12, %s3068_s22  ;;  %s118_s3 = scalar_lea.sflag [#allocation8], %s3068_s22 }
  0x16   : > { %s3077_s27 = scalar_lea.hbm %s4192_s0, %s2730_s23  ;;  %p2835_p3 = pneg %p3079_p13 }
  0x17   : > { %s121_s29 = scalar_lea.vmem [#allocation7], %s2729_s24  ;;  %s2833_s4 = scalar_lea.hbm %s3077_s27, 192 }
  0x18   : > { %s129_s30 = sshll.u32 %s121_s29, 4  ;;  %p2834_p2 = scmp.ne.s32.totalorder %s3077_s27, %s2833_s4  ;;  %s3086_s30 = int_to_ptr.vmem [resolvable:$true] %s129_s30 }
  0x19   : > { %s2838_s7 = scalar_lea.hbm %s4192_s0, 384  ;;  %p2839_p7 = scmp.lt.u32.totalorder %s3077_s27, %s4192_s0 }
  0x1a   : > { %p2836_p4 = pnand %p2835_p3, %p2834_p2  ;;  %p2840_p8 = scmp.lt.u32.totalorder %s2838_s7, %s2833_s4 }
  0x1b   : > { %p2842_p9 = scmp.lt.u32.totalorder %s2833_s4, %s3077_s27 }
  0x1c   : > { %p2837_p5 = pneg %p2836_p4  ;;  %p2841_p10 = por %p2840_p8, %p2839_p7 }
  0x1e   : > { %p2843_p0 = por %p2842_p9, %p2841_p10 }
  0x20   : > { %p2844_p1 = pnand %p2843_p0, %p2837_p5 }
  0x22   : > { %2847 = shalt.err (!%p2844_p1)
}
  0x23   : > { %s2848_s16 = scalar_lea.vmem %s3086_s30, 192  ;;  %s2965_s17 = smov [#allocation7]  }
  0x24   : > { %p2849_p2 = scmp.ne.s32.totalorder %s3086_s30, %s2848_s16  ;;  %s2853_s25 = sshll.u32 %s2965_s17, 4  ;;  %s2854_s25 = int_to_ptr.vmem [resolvable:$false] %s2853_s25 }
  0x25   : > { %s2855_s26 = scalar_lea.vmem %s2854_s25, 384  ;;  %p2856_p11 = scmp.lt.s32.totalorder %s3086_s30, %s2854_s25 }
  0x26   : > { %p2851_p4 = pnand %p2849_p2, %p2835_p3  ;;  %p2857_p7 = scmp.lt.s32.totalorder %s2855_s26, %s2848_s16 }
  0x28   : > { %p2852_p12 = pneg %p2851_p4  ;;  %p2858_p8 = por %p2857_p7, %p2856_p11 }
  0x2a   : > { %p2859_p9 = pnand %p2858_p8, %p2852_p12 }
  0x2c   : > { %2862 = shalt.err (!%p2859_p9)
}
  0x2d   : > { %2757 = dma.hbm_to_vmem [thread:$0]  (!%p3079_p13), %s3077_s27, 192, %s3086_s30, %s118_s3  }
  0x2e   : > { %p4201_p0 = scmp.lt.s32.totalorder %s2963_s12, 3  ;;  %p4202_p1 = scmp.ge.s32.totalorder %s2963_s12, 1 }
  0x2f   : > { %s3128_s6 = scalar_lea.hbm %s4193_s1, %s2730_s23  ;;  %s140_s7 = scalar_lea.vmem [#allocation10], %s2729_s24 }
  0x30   : > { %p3119_p5 = pnand %p4202_p1, %p4201_p0  ;;  %s148_s8 = sshll.u32 %s140_s7, 4  ;;  %s149_s8 = int_to_ptr.vmem [resolvable:$true] %s148_s8 }
  0x31   : > { %s137_s27 = scalar_lea.sflag [#allocation11], %s3068_s22  ;;  %s2863_s30 = scalar_lea.hbm %s3128_s6, 192 }
  0x32   : > { %s4203_s29 = scalar_select %p3119_p5, 1, 0 }
  0x33   : > { %p2864_p11 = scmp.ne.s32.totalorder %s3128_s6, %s2863_s30  ;;  %s2868_s23 = scalar_lea.hbm %s4193_s1, 384 }
  0x34   : > { %p2869_p2 = scmp.lt.u32.totalorder %s3128_s6, %s4193_s1  ;;  %p2870_p4 = scmp.lt.u32.totalorder %s2868_s23, %s2863_s30 }
  0x35   : > { %p2866_p12 = pnand %p2864_p11, %p2835_p3  ;;  %p2872_p8 = scmp.lt.u32.totalorder %s2863_s30, %s3128_s6 }
  0x36   : > { %p2871_p7 = por %p2870_p4, %p2869_p2 }
  0x37   : > { %p2867_p10 = pneg %p2866_p12 }
  0x38   : > { %p2873_p9 = por %p2872_p8, %p2871_p7 }
  0x3a   : > { %p2874_p0 = pnand %p2873_p9, %p2867_p10 }
  0x3c   : > { %2877 = shalt.err (!%p2874_p0)
}
  0x3d   : > { %s2878_s22 = scalar_lea.vmem %s149_s8, 192  ;;  %s2966_s24 = smov [#allocation10]  }
  0x3e   : > { %p2879_p1 = scmp.ne.s32.totalorder %s149_s8, %s2878_s22  ;;  %s2883_s25 = sshll.u32 %s2966_s24, 4  ;;  %s2884_s25 = int_to_ptr.vmem [resolvable:$false] %s2883_s25 }
  0x3f   : > { %s2885_s26 = scalar_lea.vmem %s2884_s25, 384  ;;  %p2886_p6 = scmp.lt.s32.totalorder %s149_s8, %s2884_s25 }
  0x40   : > { %p2881_p11 = pnand %p2879_p1, %p2835_p3  ;;  %p2887_p5 = scmp.lt.s32.totalorder %s2885_s26, %s2878_s22 }
  0x42   : > { %p2882_p12 = pneg %p2881_p11  ;;  %p2888_p2 = por %p2887_p5, %p2886_p6 }
  0x44   : > { %p2889_p4 = pnand %p2888_p2, %p2882_p12 }
  0x46   : > { %2892 = shalt.err (!%p2889_p4)
}
  0x47   : > { %2760 = dma.hbm_to_vmem [thread:$0]  (!%p3079_p13), %s3128_s6, 192, %s149_s8, %s137_s27  }
  0x48   : > { %p4204_p10 = scmp.ne.s32.totalorder %s4203_s29, 0 }
  0x49   : > { %s3155_s4 = sand.u32 (!%p4204_p10), 1, %s2955_s10   ;;  %p4205_p3 = scmp.ne.s32.totalorder (!%p4204_p10), %s4197_s19, 0 }
  0x4a   : > { %157 = sbr.rel (%p4204_p10) target bundleno = 836 (0x344), region = 28  ;;  %s160_s7 = scalar_lea.sflag (!%p4204_p10), [#allocation8], %s3155_s4 }
  0x4b   : > { %s2733_s5 = smul.u32 (!%p4204_p10), 12, %s3155_s4 }
  0x4d   : > { %s163_s30 = scalar_lea.vmem (!%p4204_p10), [#allocation7], %s2733_s5 }
  0x51   : > { %2938 = dma.done.wait (%p4205_p3), %s160_s7, 192  }
  0x52   : > { %2940 = vsyncadd (%p4205_p3), %s160_s7, 4294967104  ;;  %s169_s28 = scalar_lea.sflag [#allocation11], %s3155_s4  ;;  %s172_s6 = scalar_lea.vmem [#allocation10], %s2733_s5 }
  0x53   : > { %2942 = dma.done.wait (%p4205_p3), %s169_s28, 192  }
  0x54   : > { %2944 = vsyncadd (%p4205_p3), %s169_s28, 4294967104  ;;  %v198_v0 = vld [vmem:[%s163_s30] sm:$0xff]  ;;  %v225_v1 = vld [vmem:[%s172_s6] sm:$0xff]  ;;  %vm238_vm0 = vcmask 261120   ;;  %s2967_s29 = smov 8   ;;  %s2968_s19 = smov 108   ;;  %v294_v34 = vlaneseq }
  0x55   : > { %v202_v2 = vunpack.c.2.s8 %v198_v0  ;;  %v200_v3 = vunpack.c.0.s8 %v198_v0  ;;  %v226_v4 = vld [vmem:[%s172_s6 + $0x8] sm:$0xf]  ;;  %v203_v5 = vunpack.c.3.s8 %v198_v0  ;;  %v3168_v6 = vunpack.c.0.s8 %v225_v1  ;;  %v199_v13 = vld [vmem:[%s163_s30 + $0x8] sm:$0x3]  ;;  %s2969_s8 = smov 106   ;;  %s2970_s27 = smov 104  }
  0x56   : > { %v3170_v7 = vunpack.c.2.s8 %v225_v1  ;;  %v3172_v8 = vunpack.c.1.s8 %v225_v1  ;;  %v201_v9 = vunpack.c.1.s8 %v198_v0  ;;  %v3176_v10 = vunpack.c.3.s8 %v225_v1  ;;  %s2971_s3 = smov 102   ;;  %s2972_s14 = smov 100  }
  0x57   : > { %209 = vrot.lane.b32.xlu1 %v202_v2, %s2967_s29  ;;  %205 = vrot.lane.b32.xlu0 %v200_v3, %s2967_s29  ;;  %v3178_v11 = vunpack.c.0.s8 %v226_v4  ;;  %v232_v12 = vunpack.c.1.s8 %v226_v4  ;;  %v204_v14 = vunpack.c.0.s8 %v199_v13  ;;  %s2973_s23 = smov 60   ;;  %s2974_s16 = smov 58   ;;  %vm215_vm1 = vcmask 64512  }
  0x58   : > { %235 = vst [vmem:[#allocation3 + $0x10] sm:$0xff] %v3170_v7  ;;  %234 = vst [vmem:[#allocation3 + $0x8] sm:$0xff] %v3172_v8  ;;  %s2975_s17 = smov 56   ;;  %s2976_s22 = smov 54   ;;  %vm223_vm2 = vcmask 408576   ;;  %vm256_vm3 = vcmask 883712  }
  0x59   : > { %236 = vst [vmem:[#allocation3 + $0x18] sm:$0xff] %v3176_v10  ;;  %237 = vst [vmem:[#allocation3 + $0x20] sm:$0xff] %v3178_v11  ;;  %s2977_s24 = smov 52   ;;  %s2978_s25 = smov 12   ;;  %v2985_v32 = vmov 1966171168  }
  0x5a   : > { %239 = vst.msk [vmem:[#allocation3 + $0x28] sm:$0xff] %vm238_vm0, %v232_v12  ;;  %s2979_s26 = smov 10   ;;  %s2980_s5 = smov 6   ;;  %v292_v33 = vunpack.c.l.s4 %v2985_v32  ;;  %vm335_vm4 = vcmask 867328   ;;  %v295_v46 = vshrl.u32 %v294_v34, 7  ;;  %vm411_vm5 = vcmask 850944  }
  0x5b   : > { %211 = vrot.lane.b32.xlu1 %v203_v5, %s2967_s29  ;;  %207 = vrot.lane.b32.xlu0 %v201_v9, %s2967_s29  ;;  %s2981_s7 = smov 4   ;;  %s2982_s30 = smov 44   ;;  %vm487_vm6 = vcmask 834560   ;;  %vm3316_vm7 = vcmp.lt.s32.totalorder %v294_v34, 434  ;;  %vm563_vm8 = vcmask 818176   ;;  %vm639_vm9 = vcmask 490496  }
  0x5c   : > { %s2983_s28 = smov 42   ;;  %s2984_s6 = smov 40   ;;  %v293_v45 = vunpack.c.0.s8 %v292_v33  ;;  %vm715_vm10 = vcmask 474112   ;;  %vm791_vm11 = vcmask 457728   ;;  %vm867_vm12 = vcmask 441344  }
  0x5d   : > { %vm943_vm13 = vcmask 424960   ;;  %vm1022_vm14 = vcmask 97280   ;;  %vm1102_vm15 = vcmask 80896   ;;  %vm1261_vm0 = vcmask 48128   ;;  %p4214_p13 = scmp.ne.s32.totalorder %s4198_s20, 0 }
  0x5e   : > { %v3300_v60 = vsub.s32 %v293_v45, %v295_v46 }
  0x5f   : > { %248 = vrot.lane.b32.xlu1 %v3168_v6, %s2968_s19  ;;  %213 = vrot.lane.b32.xlu0 %v204_v14, %s2967_s29 }
  0x61   : > { %v3268_v22 = vld [vmem:[#allocation3 + $0x28] sm:$0xff] }
  0x63   : > { %252 = vrot.lane.b32.xlu1 %v3170_v7, %s2968_s19  ;;  %250 = vrot.lane.b32.xlu0 %v3172_v8, %s2968_s19 }
  0x67   : > { %327 = vrot.lane.b32.xlu1 %v3168_v6, %s2969_s8  ;;  %254 = vrot.lane.b32.xlu0 %v3176_v10, %s2968_s19  ;;  %s2986_s19 = smov 38  }
  0x6b   : > { %331 = vrot.lane.b32.xlu1 %v3170_v7, %s2969_s8  ;;  %329 = vrot.lane.b32.xlu0 %v3172_v8, %s2969_s8 }
  0x6f   : > { %403 = vrot.lane.b32.xlu1 %v3168_v6, %s2970_s27  ;;  %333 = vrot.lane.b32.xlu0 %v3176_v10, %s2969_s8  ;;  %s2987_s8 = smov 36  }
  0x73   : > { %407 = vrot.lane.b32.xlu1 %v3170_v7, %s2970_s27  ;;  %405 = vrot.lane.b32.xlu0 %v3172_v8, %s2970_s27 }
  0x77   : > { %479 = vrot.lane.b32.xlu1 %v3168_v6, %s2971_s3  ;;  %409 = vrot.lane.b32.xlu0 %v3176_v10, %s2970_s27 }
  0x7b   : > { %483 = vrot.lane.b32.xlu1 %v3170_v7, %s2971_s3  ;;  %481 = vrot.lane.b32.xlu0 %v3172_v8, %s2971_s3 }
  0x7f   : > { %555 = vrot.lane.b32.xlu1 %v3168_v6, %s2972_s14  ;;  %485 = vrot.lane.b32.xlu0 %v3176_v10, %s2971_s3  ;;  %s2989_s3 = smov 90  }
  0x83   : > { %559 = vrot.lane.b32.xlu1 %v3170_v7, %s2972_s14  ;;  %557 = vrot.lane.b32.xlu0 %v3172_v8, %s2972_s14 }
  0x87   : > { %631 = vrot.lane.b32.xlu1 %v3168_v6, %s2973_s23  ;;  %561 = vrot.lane.b32.xlu0 %v3176_v10, %s2972_s14  ;;  %s2990_s14 = smov 88  }
  0x8b   : > { %635 = vrot.lane.b32.xlu1 %v3170_v7, %s2973_s23  ;;  %633 = vrot.lane.b32.xlu0 %v3172_v8, %s2973_s23 }
  0x8f   : > { %707 = vrot.lane.b32.xlu1 %v3168_v6, %s2974_s16  ;;  %637 = vrot.lane.b32.xlu0 %v3176_v10, %s2973_s23  ;;  %s2991_s23 = smov 86  }
  0x93   : > { %711 = vrot.lane.b32.xlu1 %v3170_v7, %s2974_s16  ;;  %709 = vrot.lane.b32.xlu0 %v3172_v8, %s2974_s16 }
  0x97   : > { %783 = vrot.lane.b32.xlu1 %v3168_v6, %s2975_s17  ;;  %713 = vrot.lane.b32.xlu0 %v3176_v10, %s2974_s16  ;;  %s2992_s16 = smov 84  }
  0x9b   : > { %787 = vrot.lane.b32.xlu1 %v3170_v7, %s2975_s17  ;;  %785 = vrot.lane.b32.xlu0 %v3172_v8, %s2975_s17 }
  0x9f   : > { %859 = vrot.lane.b32.xlu1 %v3168_v6, %s2976_s22  ;;  %789 = vrot.lane.b32.xlu0 %v3176_v10, %s2975_s17  ;;  %s2993_s17 = smov 127  }
  0xa3   : > { %863 = vrot.lane.b32.xlu1 %v3170_v7, %s2976_s22  ;;  %861 = vrot.lane.b32.xlu0 %v3172_v8, %s2976_s22 }
  0xa7   : > { %935 = vrot.lane.b32.xlu1 %v3168_v6, %s2977_s24  ;;  %865 = vrot.lane.b32.xlu0 %v3176_v10, %s2976_s22  ;;  %s2994_s22 = smov 126  }
  0xab   : > { %939 = vrot.lane.b32.xlu1 %v3170_v7, %s2977_s24  ;;  %937 = vrot.lane.b32.xlu0 %v3172_v8, %s2977_s24 }
  0xaf   : > { %1012 = vrot.lane.b32.xlu1 %v3168_v6, %s2978_s25  ;;  %941 = vrot.lane.b32.xlu0 %v3176_v10, %s2977_s24  ;;  %s2995_s24 = smov 80  }
  0xb3   : > { %1016 = vrot.lane.b32.xlu1 %v3170_v7, %s2978_s25  ;;  %1014 = vrot.lane.b32.xlu0 %v3172_v8, %s2978_s25 }
  0xb7   : > { %1020 = vrot.lane.b32.xlu1 %v3178_v11, %s2978_s25  ;;  %1018 = vrot.lane.b32.xlu0 %v3176_v10, %s2978_s25  ;;  %s2747_s25 = smul.u32 384, %s3034_s13 }
  0xbb   : > { %1094 = vrot.lane.b32.xlu1 %v3172_v8, %s2979_s26  ;;  %1092 = vrot.lane.b32.xlu0 %v3168_v6, %s2979_s26 }
  0xbf   : > { %1098 = vrot.lane.b32.xlu1 %v3176_v10, %s2979_s26  ;;  %1096 = vrot.lane.b32.xlu0 %v3170_v7, %s2979_s26 }
  0xc3   : > { %1178 = vrot.lane.b32.xlu1 %v3176_v10, %s2967_s29  ;;  %1100 = vrot.lane.b32.xlu0 %v3178_v11, %s2979_s26 }
  0xc7   : > { %1257 = vrot.lane.b32.xlu1 %v3176_v10, %s2980_s5  ;;  %1180 = vrot.lane.b32.xlu0 %v3178_v11, %s2967_s29 }
  0xc9   : > { %v210_v15 = vpop.permute.xlu1 %209  ;;  %v206_v16 = vpop.permute.xlu0 %205 }
  0xcb   : > { %1337 = vrot.lane.b32.xlu1 %v3176_v10, %s2981_s7  ;;  %1259 = vrot.lane.b32.xlu0 %v3178_v11, %s2980_s5 }
  0xcd   : > { %v212_v17 = vpop.permute.xlu1 %211  ;;  %v208_v18 = vpop.permute.xlu0 %207 }
  0xce   : > { %v3253_v19 = vsel %vm215_vm1, %v210_v15, %v212_v17  ;;  %v3256_v20 = vsel %vm215_vm1, %v206_v16, %v208_v18  ;;  %v3259_v21 = vsel %vm215_vm1, %v208_v18, %v210_v15 }
  0xcf   : > { %222 = vst [vmem:[#allocation2 + $0x10] sm:$0xff] %v3253_v19  ;;  %220 = vst [vmem:[#allocation2] sm:$0xff] %v3256_v20  ;;  %1797 = vrot.lane.b32.xlu1 %v3178_v11, %s2982_s30  ;;  %1339 = vrot.lane.b32.xlu0 %v3178_v11, %s2981_s7 }
  0xd0   : > { %221 = vst [vmem:[#allocation2 + $0x8] sm:$0xff] %v3259_v21 }
  0xd1   : > { %v249_v23 = vpop.permute.xlu1 %248  ;;  %v214_v24 = vpop.permute.xlu0 %213 }
  0xd2   : > { %v219_v25 = vsel %vm215_vm1, %v212_v17, %v214_v24 }
  0xd3   : > { %224 = vst.msk [vmem:[#allocation2 + $0x18] sm:$0xff] %vm223_vm2, %v219_v25  ;;  %1877 = vrot.lane.b32.xlu1 %v3178_v11, %s2983_s28  ;;  %1799 = vrot.lane.b32.xlu0 %v3268_v22, %s2982_s30 }
  0xd5   : > { %v253_v26 = vpop.permute.xlu1 %252  ;;  %v251_v27 = vpop.permute.xlu0 %250 }
  0xd6   : > { %v257_v28 = vsel %vm256_vm3, %v249_v23, %v251_v27  ;;  %v258_v29 = vsel %vm256_vm3, %v251_v27, %v253_v26 }
  0xd7   : > { %v260_v30 = vmul.u32 %v257_v28, %v3256_v20  ;;  %v261_v31 = vmul.u32 %v258_v29, %v3259_v21  ;;  %1957 = vrot.lane.b32.xlu1 %v3178_v11, %s2984_s6  ;;  %1879 = vrot.lane.b32.xlu0 %v3268_v22, %s2983_s28 }
  0xd9   : > { %v264_v35 = vrot.slane %v260_v30, 4  ;;  %v270_v36 = vrot.slane %v261_v31, 4  ;;  %v328_v37 = vpop.permute.xlu1 %327  ;;  %v255_v38 = vpop.permute.xlu0 %254 }
  0xda   : > { %v3284_v39 = vld [vmem:[#allocation2 + $0x18] sm:$0xff]  ;;  %v259_v40 = vsel %vm256_vm3, %v253_v26, %v255_v38  ;;  %vm1341_vm3 = vcmask 31744  }
  0xdb   : > { %v265_v41 = vadd.s32 %v264_v35, %v260_v30  ;;  %v271_v42 = vadd.s32 %v270_v36, %v261_v31  ;;  %v262_v43 = vmul.u32 %v259_v40, %v3253_v19  ;;  %v263_v44 = vmul.u32 %v255_v38, %v3284_v39  ;;  %2037 = vrot.lane.b32.xlu1 %v3178_v11, %s2986_s19 }
  0xdc   : > { %1959 = vrot.lane.b32.xlu0 %v3268_v22, %s2984_s6 }
  0xdd   : > { %v266_v47 = vrot.slane %v265_v41, 2  ;;  %v272_v48 = vrot.slane %v271_v42, 2  ;;  %v276_v49 = vrot.slane %v262_v43, 4  ;;  %v282_v50 = vsel %vm223_vm2, %v263_v44, 0  ;;  %v332_v51 = vpop.permute.xlu1 %331  ;;  %v330_v52 = vpop.permute.xlu0 %329 }
  0xde   : > { %v283_v53 = vrot.slane %v282_v50, 4  ;;  %v336_v54 = vsel %vm335_vm4, %v328_v37, %v330_v52  ;;  %v337_v55 = vsel %vm335_vm4, %v330_v52, %v332_v51 }
  0xdf   : > { %v267_v56 = vadd.s32 %v266_v47, %v265_v41  ;;  %v273_v57 = vadd.s32 %v272_v48, %v271_v42  ;;  %v277_v58 = vadd.s32 %v276_v49, %v262_v43  ;;  %v339_v59 = vmul.u32 %v336_v54, %v3256_v20  ;;  %2117 = vrot.lane.b32.xlu1 %v3178_v11, %s2987_s8 }
  0xe0   : > { %v284_v61 = vadd.s32 %v283_v53, %v282_v50  ;;  %v340_v62 = vmul.u32 %v337_v55, %v3259_v21  ;;  %2039 = vrot.lane.b32.xlu0 %v3268_v22, %s2986_s19 }
  0xe1   : > { %v268_v63 = vrot.slane %v267_v56, 1  ;;  %v274_v0 = vrot.slane %v273_v57, 1  ;;  %v278_v1 = vrot.slane %v277_v58, 2  ;;  %v343_v2 = vrot.slane %v339_v59, 4  ;;  %v404_v3 = vpop.permute.xlu1 %403  ;;  %v334_v4 = vpop.permute.xlu0 %333 }
  0xe2   : > { %v285_v5 = vrot.slane %v284_v61, 2  ;;  %v349_v9 = vrot.slane %v340_v62, 4  ;;  %v338_v12 = vsel %vm335_vm4, %v332_v51, %v334_v4  ;;  %v342_v13 = vmul.u32 %v334_v4, %v3284_v39 }
  0xe3   : > { %v269_v14 = vadd.s32 %v268_v63, %v267_v56  ;;  %v275_v15 = vadd.s32 %v274_v0, %v273_v57  ;;  %v279_v16 = vadd.s32 %v278_v1, %v277_v58  ;;  %v344_v17 = vadd.s32 %v343_v2, %v339_v59  ;;  %1172 = vrot.lane.b32.xlu1 %v3168_v6, %s2967_s29 }
  0xe4   : > { %v286_v18 = vadd.s32 %v285_v5, %v284_v61  ;;  %v350_v23 = vadd.s32 %v349_v9, %v340_v62  ;;  %v341_v24 = vmul.u32 %v338_v12, %v3253_v19  ;;  %v361_v25 = vsel %vm223_vm2, %v342_v13, 0  ;;  %2119 = vrot.lane.b32.xlu0 %v3268_v22, %s2987_s8 }
  0xe5   : > { %v289_v26 = vcombine.low %v269_v14, %v275_v15  ;;  %v280_v27 = vrot.slane %v279_v16, 1  ;;  %v345_v28 = vrot.slane %v344_v17, 2  ;;  %v362_v29 = vrot.slane %v361_v25, 4  ;;  %v408_v30 = vpop.permute.xlu1 %407  ;;  %v406_v31 = vpop.permute.xlu0 %405 }
  0xe6   : > { %v287_v32 = vrot.slane %v286_v18, 1  ;;  %v351_v33 = vrot.slane %v350_v23, 2  ;;  %v355_v35 = vrot.slane %v341_v24, 4  ;;  %v412_v36 = vsel %vm411_vm5, %v404_v3, %v406_v31 }
  0xe7   : > { %v297_v37 = vrot.slane %v289_v26, %v3300_v60  ;;  %v281_v22 = vadd.s32 %v280_v27, %v279_v16  ;;  %v346_v40 = vadd.s32 %v345_v28, %v344_v17  ;;  %v363_v41 = vadd.s32 %v362_v29, %v361_v25  ;;  %1176 = vrot.lane.b32.xlu1 %v3170_v7, %s2967_s29 }
  0xe8   : > { %v288_v42 = vadd.s32 %v287_v32, %v286_v18  ;;  %v352_v43 = vadd.s32 %v351_v33, %v350_v23  ;;  %v356_v44 = vadd.s32 %v355_v35, %v341_v24  ;;  %v413_v45 = vsel %vm411_vm5, %v406_v31, %v408_v30  ;;  %1174 = vrot.lane.b32.xlu0 %v3172_v8, %s2967_s29  ;;  %s2988_s29 = smov 92  }
  0xe9   : > { %v347_v46 = vrot.slane %v346_v40, 1  ;;  %v364_v47 = vrot.slane %v363_v41, 2  ;;  %v415_v34 = vmul.u32 %v412_v36, %v3256_v20  ;;  %v416_v48 = vmul.u32 %v413_v45, %v3259_v21  ;;  %v480_v49 = vpop.permute.xlu1 %479  ;;  %v410_v50 = vpop.permute.xlu0 %409 }
  0xea   : > { %v290_v51 = vcombine.low %v281_v22, %v288_v42  ;;  %v353_v52 = vrot.slane %v352_v43, 1  ;;  %v357_v53 = vrot.slane %v356_v44, 2  ;;  %v414_v54 = vsel %vm411_vm5, %v408_v30, %v410_v50 }
  0xeb   : > { %v348_v55 = vadd.s32 %v347_v46, %v346_v40  ;;  %v365_v56 = vadd.s32 %v364_v47, %v363_v41  ;;  %v419_v57 = vrot.slane %v415_v34, 4  ;;  %v425_v58 = vrot.slane %v416_v48, 4  ;;  %1253 = vrot.lane.b32.xlu1 %v3172_v8, %s2980_s5 }
  0xec   : > { %v304_v59 = vrot.slane %v290_v51, %v3300_v60  ;;  %v354_v61 = vadd.s32 %v353_v52, %v352_v43  ;;  %v358_v62 = vadd.s32 %v357_v53, %v356_v44  ;;  %v417_v63 = vmul.u32 %v414_v54, %v3253_v19  ;;  %1251 = vrot.lane.b32.xlu0 %v3168_v6, %s2980_s5 }
  0xed   : > { %v366_v0 = vrot.slane %v365_v56, 1  ;;  %v420_v1 = vadd.s32 %v419_v57, %v415_v34  ;;  %v426_v2 = vadd.s32 %v425_v58, %v416_v48  ;;  %v418_v3 = vmul.u32 %v410_v50, %v3284_v39  ;;  %v484_v4 = vpop.permute.xlu1 %483  ;;  %v482_v5 = vpop.permute.xlu0 %481 }
  0xee   : > { %v305_v9 = vcombine.low %v297_v37, %v304_v59  ;;  %v368_v12 = vcombine.low %v348_v55, %v354_v61  ;;  %v359_v13 = vrot.slane %v358_v62, 1  ;;  %v431_v14 = vrot.slane %v417_v63, 4 }
  0xef   : > { %v367_v15 = vadd.s32 %v366_v0, %v365_v56  ;;  %v421_v16 = vrot.slane %v420_v1, 2  ;;  %v427_v17 = vrot.slane %v426_v2, 2  ;;  %v437_v18 = vsel %vm223_vm2, %v418_v3, 0  ;;  %1331 = vrot.lane.b32.xlu1 %v3168_v6, %s2981_s7 }
  0xf0   : > { %v312_v23 = vrot.slane %v305_v9, %v3300_v60  ;;  %v376_v24 = vrot.slane %v368_v12, %v3300_v60  ;;  %v360_v25 = vadd.s32 %v359_v13, %v358_v62  ;;  %v432_v26 = vadd.s32 %v431_v14, %v417_v63  ;;  %1255 = vrot.lane.b32.xlu0 %v3170_v7, %s2980_s5 }
  0xf1   : > { %v422_v27 = vadd.s32 %v421_v16, %v420_v1  ;;  %v428_v28 = vadd.s32 %v427_v17, %v426_v2  ;;  %v438_v29 = vrot.slane %v437_v18, 4  ;;  %v488_v30 = vsel %vm487_vm6, %v480_v49, %v482_v5  ;;  %v556_v31 = vpop.permute.xlu1 %555  ;;  %v486_v32 = vpop.permute.xlu0 %485 }
  0xf2   : > { %317 = vst.msk [vmem:[#allocation4] ss:$8 sm:$0xf] %vm3316_vm7, %v312_v23  ;;  %v369_v6 = vcombine.low %v360_v25, %v367_v15  ;;  %v433_v33 = vrot.slane %v432_v26, 2  ;;  %v489_v35 = vsel %vm487_vm6, %v482_v5, %v484_v4  ;;  %v491_v36 = vmul.u32 %v488_v30, %v3256_v20 }
  0xf3   : > { %v423_v37 = vrot.slane %v422_v27, 1  ;;  %v429_v22 = vrot.slane %v428_v28, 1  ;;  %v439_v40 = vadd.s32 %v438_v29, %v437_v18  ;;  %v492_v41 = vmul.u32 %v489_v35, %v3259_v21  ;;  %1335 = vrot.lane.b32.xlu1 %v3170_v7, %s2981_s7 }
  0xf4   : > { %v383_v42 = vrot.slane %v369_v6, %v3300_v60  ;;  %v434_v43 = vadd.s32 %v433_v33, %v432_v26  ;;  %v495_v44 = vrot.slane %v491_v36, 4  ;;  %v490_v45 = vsel %vm487_vm6, %v484_v4, %v486_v32  ;;  %1333 = vrot.lane.b32.xlu0 %v3172_v8, %s2981_s7 }
  0xf5   : > { %v424_v46 = vadd.s32 %v423_v37, %v422_v27  ;;  %v430_v47 = vadd.s32 %v429_v22, %v428_v28  ;;  %v440_v34 = vrot.slane %v439_v40, 2  ;;  %v501_v48 = vrot.slane %v492_v41, 4  ;;  %v560_v49 = vpop.permute.xlu1 %559  ;;  %v558_v50 = vpop.permute.xlu0 %557 }
  0xf6   : > { %v384_v51 = vcombine.low %v376_v24, %v383_v42  ;;  %v435_v52 = vrot.slane %v434_v43, 1  ;;  %v496_v53 = vadd.s32 %v495_v44, %v491_v36  ;;  %v493_v54 = vmul.u32 %v490_v45, %v3253_v19 }
  0xf7   : > { %v444_v55 = vcombine.low %v424_v46, %v430_v47  ;;  %v441_v56 = vadd.s32 %v440_v34, %v439_v40  ;;  %v502_v57 = vadd.s32 %v501_v48, %v492_v41  ;;  %v494_v58 = vmul.u32 %v486_v32, %v3284_v39  ;;  %1412 = vrot.lane.b32.xlu1 %v3170_v7, %s2988_s29 }
  0xf8   : > { %v391_v59 = vrot.slane %v384_v51, %v3300_v60  ;;  %v436_v61 = vadd.s32 %v435_v52, %v434_v43  ;;  %v497_v62 = vrot.slane %v496_v53, 2  ;;  %v507_v63 = vrot.slane %v493_v54, 4  ;;  %1410 = vrot.lane.b32.xlu0 %v3172_v8, %s2988_s29 }
  0xf9   : > { %v452_v0 = vrot.slane %v444_v55, %v3300_v60  ;;  %v442_v1 = vrot.slane %v441_v56, 1  ;;  %v503_v2 = vrot.slane %v502_v57, 2  ;;  %v513_v3 = vsel %vm223_vm2, %v494_v58, 0  ;;  %v632_v4 = vpop.permute.xlu1 %631  ;;  %v562_v5 = vpop.permute.xlu0 %561 }
  0xfa   : > { %393 = vst.msk [vmem:[#allocation4 + $0x1] ss:$8 sm:$0xf] %vm3316_vm7, %v391_v59  ;;  %v498_v9 = vadd.s32 %v497_v62, %v496_v53  ;;  %v508_v12 = vadd.s32 %v507_v63, %v493_v54  ;;  %v514_v13 = vrot.slane %v513_v3, 4  ;;  %v564_v14 = vsel %vm563_vm8, %v556_v31, %v558_v50  ;;  %v3383_v62 = vld [vmem:[#allocation3 + $0x10] sm:$0xff] }
  0xfb   : > { %v443_v15 = vadd.s32 %v442_v1, %v441_v56  ;;  %v504_v16 = vadd.s32 %v503_v2, %v502_v57  ;;  %v565_v17 = vsel %vm563_vm8, %v558_v50, %v560_v49  ;;  %v567_v18 = vmul.u32 %v564_v14, %v3256_v20  ;;  %1416 = vrot.lane.b32.xlu1 %v3178_v11, %s2988_s29 }
  0xfc   : > { %v499_v23 = vrot.slane %v498_v9, 1  ;;  %v509_v24 = vrot.slane %v508_v12, 2  ;;  %v515_v25 = vadd.s32 %v514_v13, %v513_v3  ;;  %v568_v26 = vmul.u32 %v565_v17, %v3259_v21  ;;  %1414 = vrot.lane.b32.xlu0 %v3176_v10, %s2988_s29 }
  0xfd   : > { %v445_v27 = vcombine.low %v436_v61, %v443_v15  ;;  %v505_v28 = vrot.slane %v504_v16, 1  ;;  %v571_v29 = vrot.slane %v567_v18, 4  ;;  %v566_v30 = vsel %vm563_vm8, %v560_v49, %v562_v5  ;;  %v636_v31 = vpop.permute.xlu1 %635  ;;  %v634_v32 = vpop.permute.xlu0 %633 }
  0xfe   : > { %v500_v6 = vadd.s32 %v499_v23, %v498_v9  ;;  %v510_v33 = vadd.s32 %v509_v24, %v508_v12  ;;  %v516_v35 = vrot.slane %v515_v25, 2  ;;  %v577_v36 = vrot.slane %v568_v26, 4  ;;  %v3389_v9 = vld [vmem:[#allocation3 + $0x8] sm:$0xff] }
  0xff   : > { %v459_v37 = vrot.slane %v445_v27, %v3300_v60  ;;  %v506_v22 = vadd.s32 %v505_v28, %v504_v16  ;;  %v572_v40 = vadd.s32 %v571_v29, %v567_v18  ;;  %v569_v41 = vmul.u32 %v566_v30, %v3253_v19  ;;  %1488 = vrot.lane.b32.xlu1 %v3170_v7, %s2989_s3 }
 0x100   : > { %v511_v42 = vrot.slane %v510_v33, 1  ;;  %v517_v43 = vadd.s32 %v516_v35, %v515_v25  ;;  %v578_v44 = vadd.s32 %v577_v36, %v568_v26  ;;  %v570_v45 = vmul.u32 %v562_v5, %v3284_v39  ;;  %1486 = vrot.lane.b32.xlu0 %v3172_v8, %s2989_s3 }
 0x101   : > { %v460_v46 = vcombine.low %v452_v0, %v459_v37  ;;  %v520_v47 = vcombine.low %v500_v6, %v506_v22  ;;  %v573_v34 = vrot.slane %v572_v40, 2  ;;  %v583_v48 = vrot.slane %v569_v41, 4  ;;  %v3375_v49 = vpop.permute.xlu1 %707  ;;  %v638_v50 = vpop.permute.xlu0 %637 }
 0x102   : > { %v512_v51 = vadd.s32 %v511_v42, %v510_v33  ;;  %v518_v52 = vrot.slane %v517_v43, 1  ;;  %v579_v53 = vrot.slane %v578_v44, 2  ;;  %v589_v54 = vsel %vm223_vm2, %v570_v45, 0 }
 0x103   : > { %v467_v7 = vrot.slane %v460_v46, %v3300_v60  ;;  %v528_v55 = vrot.slane %v520_v47, %v3300_v60  ;;  %v574_v56 = vadd.s32 %v573_v34, %v572_v40  ;;  %v584_v57 = vadd.s32 %v583_v48, %v569_v41  ;;  %1492 = vrot.lane.b32.xlu1 %v3178_v11, %s2989_s3 }
 0x104   : > { %v519_v8 = vadd.s32 %v518_v52, %v517_v43  ;;  %v580_v58 = vadd.s32 %v579_v53, %v578_v44  ;;  %v590_v59 = vrot.slane %v589_v54, 4  ;;  %v640_v61 = vsel %vm639_vm9, %v632_v4, %v634_v32  ;;  %1490 = vrot.lane.b32.xlu0 %v3176_v10, %s2989_s3 }
 0x105   : > { %469 = vst.msk [vmem:[#allocation4 + $0x2] ss:$8 sm:$0xf] %vm3316_vm7, %v467_v7  ;;  %v575_v63 = vrot.slane %v574_v56, 1  ;;  %v585_v0 = vrot.slane %v584_v57, 2  ;;  %v641_v1 = vsel %vm639_vm9, %v634_v32, %v636_v31  ;;  %v643_v2 = vmul.u32 %v640_v61, %v3256_v20  ;;  %v712_v3 = vpop.permute.xlu1 %711  ;;  %v710_v5 = vpop.permute.xlu0 %709  ;;  %v1633_v61 = vld [vmem:[#allocation3 + $0x20] sm:$0xff] }
 0x106   : > { %v521_v12 = vcombine.low %v512_v51, %v519_v8  ;;  %v581_v13 = vrot.slane %v580_v58, 1  ;;  %v591_v4 = vadd.s32 %v590_v59, %v589_v54  ;;  %v644_v10 = vmul.u32 %v641_v1, %v3259_v21 }
 0x107   : > { %v576_v14 = vadd.s32 %v575_v63, %v574_v56  ;;  %v586_v15 = vadd.s32 %v585_v0, %v584_v57  ;;  %v647_v16 = vrot.slane %v643_v2, 4  ;;  %v642_v17 = vsel %vm639_vm9, %v636_v31, %v638_v50  ;;  %1564 = vrot.lane.b32.xlu1 %v3383_v62, %s2990_s14  ;;  %v3402_v31 = vld [vmem:[#allocation3 + $0x18] sm:$0xff] }
 0x108   : > { %v535_v18 = vrot.slane %v521_v12, %v3300_v60  ;;  %v582_v23 = vadd.s32 %v581_v13, %v580_v58  ;;  %v592_v24 = vrot.slane %v591_v4, 2  ;;  %v653_v25 = vrot.slane %v644_v10, 4  ;;  %1562 = vrot.lane.b32.xlu0 %v3389_v9, %s2990_s14 }
 0x109   : > { %v587_v26 = vrot.slane %v586_v15, 1  ;;  %v648_v27 = vadd.s32 %v647_v16, %v643_v2  ;;  %v645_v28 = vmul.u32 %v642_v17, %v3253_v19  ;;  %v646_v29 = vmul.u32 %v638_v50, %v3284_v39  ;;  %v3398_v30 = vpop.permute.xlu1 %783  ;;  %v3400_v32 = vpop.permute.xlu0 %713 }
 0x10a   : > { %v536_v6 = vcombine.low %v528_v55, %v535_v18  ;;  %v596_v33 = vcombine.low %v576_v14, %v582_v23  ;;  %v593_v35 = vadd.s32 %v592_v24, %v591_v4  ;;  %v654_v36 = vadd.s32 %v653_v25, %v644_v10 }
 0x10b   : > { %v588_v37 = vadd.s32 %v587_v26, %v586_v15  ;;  %v649_v22 = vrot.slane %v648_v27, 2  ;;  %v659_v40 = vrot.slane %v645_v28, 4  ;;  %v665_v41 = vsel %vm223_vm2, %v646_v29, 0  ;;  %1568 = vrot.lane.b32.xlu1 %v3178_v11, %s2990_s14 }
 0x10c   : > { %v543_v42 = vrot.slane %v536_v6, %v3300_v60  ;;  %v604_v43 = vrot.slane %v596_v33, %v3300_v60  ;;  %v594_v44 = vrot.slane %v593_v35, 1  ;;  %v655_v45 = vrot.slane %v654_v36, 2  ;;  %1566 = vrot.lane.b32.xlu0 %v3402_v31, %s2990_s14 }
 0x10d   : > { %v650_v46 = vadd.s32 %v649_v22, %v648_v27  ;;  %v660_v47 = vadd.s32 %v659_v40, %v645_v28  ;;  %v666_v34 = vrot.slane %v665_v41, 4  ;;  %v716_v48 = vsel %vm715_vm10, %v3375_v49, %v710_v5  ;;  %v3411_v50 = vpop.permute.xlu1 %787  ;;  %v786_v51 = vpop.permute.xlu0 %785 }
 0x10e   : > { %545 = vst.msk [vmem:[#allocation4 + $0x3] ss:$8 sm:$0xf] %vm3316_vm7, %v543_v42  ;;  %v595_v11 = vadd.s32 %v594_v44, %v593_v35  ;;  %v656_v52 = vadd.s32 %v655_v45, %v654_v36  ;;  %v717_v53 = vsel %vm715_vm10, %v710_v5, %v712_v3  ;;  %v719_v54 = vmul.u32 %v716_v48, %v3256_v20 }
 0x10f   : > { %v651_v7 = vrot.slane %v650_v46, 1  ;;  %v661_v55 = vrot.slane %v660_v47, 2  ;;  %v667_v56 = vadd.s32 %v666_v34, %v665_v41  ;;  %v720_v57 = vmul.u32 %v717_v53, %v3259_v21  ;;  %1640 = vrot.lane.b32.xlu1 %v3383_v62, %s2991_s23 }
 0x110   : > { %v597_v49 = vcombine.low %v588_v37, %v595_v11  ;;  %v657_v8 = vrot.slane %v656_v52, 1  ;;  %v723_v58 = vrot.slane %v719_v54, 4  ;;  %v718_v59 = vsel %vm715_vm10, %v712_v3, %v3400_v32  ;;  %1638 = vrot.lane.b32.xlu0 %v3389_v9, %s2991_s23 }
 0x111   : > { %v652_v63 = vadd.s32 %v651_v7, %v650_v46  ;;  %v662_v0 = vadd.s32 %v661_v55, %v660_v47  ;;  %v668_v1 = vrot.slane %v667_v56, 2  ;;  %v729_v2 = vrot.slane %v720_v57, 4  ;;  %v3422_v5 = vpop.permute.xlu1 %859  ;;  %v3424_v12 = vpop.permute.xlu0 %789 }
 0x112   : > { %v611_v13 = vrot.slane %v597_v49, %v3300_v60  ;;  %v658_v4 = vadd.s32 %v657_v8, %v656_v52  ;;  %v724_v10 = vadd.s32 %v723_v58, %v719_v54  ;;  %v721_v14 = vmul.u32 %v718_v59, %v3253_v19 }
 0x113   : > { %v663_v15 = vrot.slane %v662_v0, 1  ;;  %v669_v16 = vadd.s32 %v668_v1, %v667_v56  ;;  %v730_v3 = vadd.s32 %v729_v2, %v720_v57  ;;  %v722_v17 = vmul.u32 %v3400_v32, %v3284_v39  ;;  %1644 = vrot.lane.b32.xlu1 %v1633_v61, %s2991_s23 }
 0x114   : > { %v612_v18 = vcombine.low %v604_v43, %v611_v13  ;;  %v672_v23 = vcombine.low %v652_v63, %v658_v4  ;;  %v725_v24 = vrot.slane %v724_v10, 2  ;;  %v735_v25 = vrot.slane %v721_v14, 4  ;;  %1642 = vrot.lane.b32.xlu0 %v3402_v31, %s2991_s23 }
 0x115   : > { %v664_v26 = vadd.s32 %v663_v15, %v662_v0  ;;  %v670_v27 = vrot.slane %v669_v16, 1  ;;  %v731_v28 = vrot.slane %v730_v3, 2  ;;  %v741_v29 = vsel %vm223_vm2, %v722_v17, 0  ;;  %v3432_v6 = vpop.permute.xlu1 %863  ;;  %v862_v33 = vpop.permute.xlu0 %861 }
 0x116   : > { %v619_v35 = vrot.slane %v612_v18, %v3300_v60  ;;  %v680_v32 = vrot.slane %v672_v23, %v3300_v60  ;;  %v726_v36 = vadd.s32 %v725_v24, %v724_v10  ;;  %v736_v37 = vadd.s32 %v735_v25, %v721_v14 }
 0x117   : > { %v671_v22 = vadd.s32 %v670_v27, %v669_v16  ;;  %v732_v40 = vadd.s32 %v731_v28, %v730_v3  ;;  %v742_v41 = vrot.slane %v741_v29, 4  ;;  %v792_v42 = vsel %vm791_vm11, %v3398_v30, %v786_v51  ;;  %1716 = vrot.lane.b32.xlu1 %v3383_v62, %s2992_s16 }
 0x118   : > { %621 = vst.msk [vmem:[#allocation4 + $0x4] ss:$8 sm:$0xf] %vm3316_vm7, %v619_v35  ;;  %v727_v43 = vrot.slane %v726_v36, 1  ;;  %v737_v44 = vrot.slane %v736_v37, 2  ;;  %v793_v45 = vsel %vm791_vm11, %v786_v51, %v3411_v50  ;;  %v795_v46 = vmul.u32 %v792_v42, %v3256_v20  ;;  %1714 = vrot.lane.b32.xlu0 %v3389_v9, %s2992_s16 }
 0x119   : > { %v673_v47 = vcombine.low %v664_v26, %v671_v22  ;;  %v733_v34 = vrot.slane %v732_v40, 1  ;;  %v743_v48 = vadd.s32 %v742_v41, %v741_v29  ;;  %v796_v30 = vmul.u32 %v793_v45, %v3259_v21  ;;  %v3446_v11 = vpop.permute.xlu1 %935  ;;  %v3448_v52 = vpop.permute.xlu0 %865  ;;  %v3486_v45 = vld [vmem:[#allocation2 + $0x10] sm:$0xff] }
 0x11a   : > { %v728_v53 = vadd.s32 %v727_v43, %v726_v36  ;;  %v738_v54 = vadd.s32 %v737_v44, %v736_v37  ;;  %v799_v7 = vrot.slane %v795_v46, 4  ;;  %v794_v51 = vsel %vm791_vm11, %v3411_v50, %v3424_v12 }
 0x11b   : > { %v687_v55 = vrot.slane %v673_v47, %v3300_v60  ;;  %v734_v56 = vadd.s32 %v733_v34, %v732_v40  ;;  %v744_v57 = vrot.slane %v743_v48, 2  ;;  %v805_v49 = vrot.slane %v796_v30, 4  ;;  %1720 = vrot.lane.b32.xlu1 %v1633_v61, %s2992_s16 }
 0x11c   : > { %v739_v8 = vrot.slane %v738_v54, 1  ;;  %v800_v58 = vadd.s32 %v799_v7, %v795_v46  ;;  %v797_v59 = vmul.u32 %v794_v51, %v3253_v19  ;;  %v798_v63 = vmul.u32 %v3424_v12, %v3284_v39  ;;  %1718 = vrot.lane.b32.xlu0 %v3402_v31, %s2992_s16 }
 0x11d   : > { %v688_v0 = vcombine.low %v680_v32, %v687_v55  ;;  %v748_v1 = vcombine.low %v728_v53, %v734_v56  ;;  %v745_v2 = vadd.s32 %v744_v57, %v743_v48  ;;  %v806_v13 = vadd.s32 %v805_v49, %v796_v30  ;;  %v3458_v50 = vpop.permute.xlu1 %939  ;;  %v3460_v4 = vpop.permute.xlu0 %937 }
 0x11e   : > { %v740_v10 = vadd.s32 %v739_v8, %v738_v54  ;;  %v801_v14 = vrot.slane %v800_v58, 2  ;;  %v811_v61 = vrot.slane %v797_v59, 4  ;;  %v817_v15 = vsel %vm223_vm2, %v798_v63, 0 }
 0x11f   : > { %v695_v19 = vrot.slane %v688_v0, %v3300_v60  ;;  %v756_v16 = vrot.slane %v748_v1, %v3300_v60  ;;  %v746_v12 = vrot.slane %v745_v2, 1  ;;  %v807_v3 = vrot.slane %v806_v13, 2  ;;  %1793 = vrot.lane.b32.xlu1 %v3383_v62, %s2982_s30 }
 0x120   : > { %v802_v17 = vadd.s32 %v801_v14, %v800_v58  ;;  %v812_v18 = vadd.s32 %v811_v61, %v797_v59  ;;  %v818_v23 = vrot.slane %v817_v15, 4  ;;  %v868_v24 = vsel %vm867_vm12, %v3422_v5, %v862_v33  ;;  %1791 = vrot.lane.b32.xlu0 %v3389_v9, %s2982_s30 }
 0x121   : > { %697 = vst.msk [vmem:[#allocation4 + $0x5] ss:$8 sm:$0xf] %vm3316_vm7, %v695_v19  ;;  %v747_v25 = vadd.s32 %v746_v12, %v745_v2  ;;  %v808_v26 = vadd.s32 %v807_v3, %v806_v13  ;;  %v869_v27 = vsel %vm867_vm12, %v862_v33, %v3432_v6  ;;  %v871_v28 = vmul.u32 %v868_v24, %v3256_v20  ;;  %v3476_v29 = vpop.permute.xlu1 %1012  ;;  %v3478_v35 = vpop.permute.xlu0 %941  ;;  %v3516_v3 = vld [vmem:[#allocation2 + $0x8] sm:$0xff] }
 0x122   : > { %v803_v32 = vrot.slane %v802_v17, 1  ;;  %v813_v36 = vrot.slane %v812_v18, 2  ;;  %v819_v5 = vadd.s32 %v818_v23, %v817_v15  ;;  %v872_v37 = vmul.u32 %v869_v27, %v3259_v21  ;;  %v3509_v15 = vld [vmem:[#allocation2] sm:$0xff] }
 0x123   : > { %v749_v22 = vcombine.low %v740_v10, %v747_v25  ;;  %v809_v40 = vrot.slane %v808_v26, 1  ;;  %v875_v41 = vrot.slane %v871_v28, 4  ;;  %v870_v42 = vsel %vm867_vm12, %v3432_v6, %v3448_v52  ;;  %1871 = vrot.lane.b32.xlu1 %v3389_v9, %s2983_s28 }
 0x124   : > { %v804_v20 = vadd.s32 %v803_v32, %v802_v17  ;;  %v814_v33 = vadd.s32 %v813_v36, %v812_v18  ;;  %v820_v43 = vrot.slane %v819_v5, 2  ;;  %v881_v44 = vrot.slane %v872_v37, 4  ;;  %1795 = vrot.lane.b32.xlu0 %v3402_v31, %s2982_s30 }
 0x125   : > { %v763_v21 = vrot.slane %v749_v22, %v3300_v60  ;;  %v810_v46 = vadd.s32 %v809_v40, %v808_v26  ;;  %v876_v47 = vadd.s32 %v875_v41, %v871_v28  ;;  %v873_v34 = vmul.u32 %v870_v42, %v3486_v45  ;;  %v3492_v48 = vpop.permute.xlu1 %1016  ;;  %v3494_v6 = vpop.permute.xlu0 %1014 }
 0x126   : > { %v815_v30 = vrot.slane %v814_v33, 1  ;;  %v821_v53 = vadd.s32 %v820_v43, %v819_v5  ;;  %v882_v54 = vadd.s32 %v881_v44, %v872_v37  ;;  %v874_v7 = vmul.u32 %v3448_v52, %v3284_v39 }
 0x127   : > { %v764_v51 = vcombine.low %v756_v16, %v763_v21  ;;  %v824_v55 = vcombine.low %v804_v20, %v810_v46  ;;  %v877_v56 = vrot.slane %v876_v47, 2  ;;  %v887_v57 = vrot.slane %v873_v34, 4  ;;  %1875 = vrot.lane.b32.xlu1 %v3402_v31, %s2983_s28 }
 0x128   : > { %v816_v49 = vadd.s32 %v815_v30, %v814_v33  ;;  %v822_v8 = vrot.slane %v821_v53, 1  ;;  %v883_v58 = vrot.slane %v882_v54, 2  ;;  %v893_v59 = vsel %vm223_vm2, %v874_v7, 0  ;;  %1873 = vrot.lane.b32.xlu0 %v3383_v62, %s2983_s28  ;;  %s4145_s28 = scalar_lea.hbm %s4194_s2, %s2747_s25 }
 0x129   : > { %v771_v63 = vrot.slane %v764_v51, %v3300_v60  ;;  %v832_v52 = vrot.slane %v824_v55, %v3300_v60  ;;  %v878_v0 = vadd.s32 %v877_v56, %v876_v47  ;;  %v888_v1 = vadd.s32 %v887_v57, %v873_v34  ;;  %v3505_v2 = vpop.permute.xlu1 %1020  ;;  %v3507_v13 = vpop.permute.xlu0 %1018 }
 0x12a   : > { %v823_v10 = vadd.s32 %v822_v8, %v821_v53  ;;  %v884_v14 = vadd.s32 %v883_v58, %v882_v54  ;;  %v894_v61 = vrot.slane %v893_v59, 4  ;;  %v944_v19 = vsel %vm943_vm13, %v3446_v11, %v3460_v4 }
 0x12b   : > { %773 = vst.msk [vmem:[#allocation4 + $0x6] ss:$8 sm:$0xf] %vm3316_vm7, %v771_v63  ;;  %v879_v16 = vrot.slane %v878_v0, 1  ;;  %v889_v12 = vrot.slane %v888_v1, 2  ;;  %v945_v17 = vsel %vm943_vm13, %v3460_v4, %v3458_v50  ;;  %v947_v18 = vmul.u32 %v944_v19, %v3509_v15  ;;  %1953 = vrot.lane.b32.xlu1 %v3383_v62, %s2984_s6 }
 0x12c   : > { %v825_v23 = vcombine.low %v816_v49, %v823_v10  ;;  %v885_v24 = vrot.slane %v884_v14, 1  ;;  %v895_v25 = vadd.s32 %v894_v61, %v893_v59  ;;  %v948_v11 = vmul.u32 %v945_v17, %v3516_v3  ;;  %1951 = vrot.lane.b32.xlu0 %v3389_v9, %s2984_s6 }
 0x12d   : > { %v880_v26 = vadd.s32 %v879_v16, %v878_v0  ;;  %v890_v27 = vadd.s32 %v889_v12, %v888_v1  ;;  %v951_v28 = vrot.slane %v947_v18, 4  ;;  %v946_v4 = vsel %vm943_vm13, %v3458_v50, %v3478_v35  ;;  %v3530_v32 = vpop.permute.xlu1 %1094  ;;  %v3532_v36 = vpop.permute.xlu0 %1092 }
 0x12e   : > { %v839_v5 = vrot.slane %v825_v23, %v3300_v60  ;;  %v886_v37 = vadd.s32 %v885_v24, %v884_v14  ;;  %v896_v22 = vrot.slane %v895_v25, 2  ;;  %v957_v40 = vrot.slane %v948_v11, 4 }
 0x12f   : > { %v891_v41 = vrot.slane %v890_v27, 1  ;;  %v952_v42 = vadd.s32 %v951_v28, %v947_v18  ;;  %v949_v20 = vmul.u32 %v946_v4, %v3486_v45  ;;  %v950_v33 = vmul.u32 %v3478_v35, %v3284_v39  ;;  %2031 = vrot.lane.b32.xlu1 %v3389_v9, %s2986_s19  ;;  %v3576_v4 = vld [vmem:[#allocation2 + $0x18] sm:$0xff] }
 0x130   : > { %v840_v50 = vcombine.low %v832_v52, %v839_v5  ;;  %v900_v43 = vcombine.low %v880_v26, %v886_v37  ;;  %v897_v44 = vadd.s32 %v896_v22, %v895_v25  ;;  %v958_v21 = vadd.s32 %v957_v40, %v948_v11  ;;  %1955 = vrot.lane.b32.xlu0 %v3402_v31, %s2984_s6  ;;  %s2611_s6 = scalar_lea.sflag [#allocation9], %s3155_s4 }
 0x131   : > { %v892_v46 = vadd.s32 %v891_v41, %v890_v27  ;;  %v953_v47 = vrot.slane %v952_v42, 2  ;;  %v963_v34 = vrot.slane %v949_v20, 4  ;;  %v969_v30 = vsel %vm223_vm2, %v950_v33, 0  ;;  %v3543_v53 = vpop.permute.xlu1 %1098  ;;  %v3545_v54 = vpop.permute.xlu0 %1096 }
 0x132   : > { %v847_v39 = vrot.slane %v840_v50, %v3300_v60  ;;  %v908_v35 = vrot.slane %v900_v43, %v3300_v60  ;;  %v898_v7 = vrot.slane %v897_v44, 1  ;;  %v959_v51 = vrot.slane %v958_v21, 2 }
 0x133   : > { %v954_v55 = vadd.s32 %v953_v47, %v952_v42  ;;  %v964_v56 = vadd.s32 %v963_v34, %v949_v20  ;;  %v970_v57 = vrot.slane %v969_v30, 4  ;;  %v1023_v49 = vsel %vm1022_vm14, %v3476_v29, %v3494_v6  ;;  %2035 = vrot.lane.b32.xlu1 %v3402_v31, %s2986_s19 }
 0x134   : > { %849 = vst.msk [vmem:[#allocation4 + $0x7] ss:$8 sm:$0xf] %vm3316_vm7, %v847_v39  ;;  %v899_v8 = vadd.s32 %v898_v7, %v897_v44  ;;  %v960_v58 = vadd.s32 %v959_v51, %v958_v21  ;;  %v1024_v59 = vsel %vm1022_vm14, %v3494_v6, %v3492_v48  ;;  %v1027_v63 = vmul.u32 %v1023_v49, %v3509_v15 }
 0x135   : > { %2033 = vrot.lane.b32.xlu0 %v3383_v62, %s2986_s19  ;;  %v955_v52 = vrot.slane %v954_v55, 1  ;;  %v965_v29 = vrot.slane %v964_v56, 2  ;;  %v971_v0 = vadd.s32 %v970_v57, %v969_v30  ;;  %v1028_v1 = vmul.u32 %v1024_v59, %v3516_v3  ;;  %v3563_v10 = vpop.permute.xlu1 %1178  ;;  %v1101_v14 = vpop.permute.xlu0 %1100 }
 0x136   : > { %v901_v61 = vcombine.low %v892_v46, %v899_v8  ;;  %v961_v19 = vrot.slane %v960_v58, 1  ;;  %v1031_v16 = vrot.slane %v1027_v63, 4  ;;  %v1025_v6 = vsel %vm1022_vm14, %v3492_v48, %v3507_v13 }
 0x137   : > { %v956_v12 = vadd.s32 %v955_v52, %v954_v55  ;;  %v966_v17 = vadd.s32 %v965_v29, %v964_v56  ;;  %v972_v18 = vrot.slane %v971_v0, 2  ;;  %v1037_v23 = vrot.slane %v1028_v1, 4  ;;  %2113 = vrot.lane.b32.xlu1 %v3383_v62, %s2987_s8 }
 0x138   : > { %v915_v24 = vrot.slane %v901_v61, %v3300_v60  ;;  %v962_v25 = vadd.s32 %v961_v19, %v960_v58  ;;  %v1032_v11 = vadd.s32 %v1031_v16, %v1027_v63  ;;  %v1026_v26 = vsel %vm1022_vm14, %v3507_v13, %v3505_v2 }
 0x139   : > { %2111 = vrot.lane.b32.xlu0 %v3389_v9, %s2987_s8  ;;  %v967_v27 = vrot.slane %v966_v17, 1  ;;  %v973_v48 = vadd.s32 %v972_v18, %v971_v0  ;;  %v1038_v28 = vadd.s32 %v1037_v23, %v1028_v1  ;;  %v1029_v5 = vmul.u32 %v1025_v6, %v3486_v45  ;;  %v3579_v37 = vpop.permute.xlu1 %1257  ;;  %v3581_v62 = vpop.permute.xlu0 %1180 }
 0x13a   : > { %v916_v22 = vcombine.low %v908_v35, %v915_v24  ;;  %v976_v40 = vcombine.low %v956_v12, %v962_v25  ;;  %v1033_v41 = vrot.slane %v1032_v11, 2  ;;  %v1030_v42 = vmul.u32 %v1026_v26, %v3576_v4 }
 0x13b   : > { %v968_v2 = vadd.s32 %v967_v27, %v966_v17  ;;  %v974_v13 = vrot.slane %v973_v48, 1  ;;  %v1039_v20 = vrot.slane %v1038_v28, 2  ;;  %v1043_v9 = vrot.slane %v1029_v5, 4  ;;  %v2182_v33 = vld [vmem:[#allocation4] sm:$0xff]  ;;  %v2183_v58 = vld [vmem:[#allocation4 + $0x8] sm:$0xff]  ;;  %v2185_v24 = vld [vmem:[#allocation4 + $0x18] sm:$0xff] }
 0x13c   : > { %v923_v50 = vrot.slane %v916_v22, %v3300_v60  ;;  %v984_v43 = vrot.slane %v976_v40, %v3300_v60  ;;  %v1034_v44 = vadd.s32 %v1033_v41, %v1032_v11  ;;  %v1049_v21 = vsel %vm223_vm2, %v1030_v42, 0  ;;  %2198 = vrot.lane.b32.xlu1 %v2182_v33, %s2993_s17 }
 0x13d   : > { %2115 = vrot.lane.b32.xlu0 %v3402_v31, %s2987_s8  ;;  %v975_v46 = vadd.s32 %v974_v13, %v973_v48  ;;  %v1040_v47 = vadd.s32 %v1039_v20, %v1038_v28  ;;  %v1044_v34 = vadd.s32 %v1043_v9, %v1029_v5  ;;  %v1050_v30 = vrot.slane %v1049_v21, 4  ;;  %v3590_v39 = vpop.permute.xlu1 %1337  ;;  %v1260_v35 = vpop.permute.xlu0 %1259  ;;  %s2996_s8 = smov [#allocation12]  }
 0x13e   : > { %925 = vst.msk [vmem:[#allocation4 + $0x20] ss:$8 sm:$0xf] %vm3316_vm7, %v923_v50  ;;  %v1035_v7 = vrot.slane %v1034_v44, 1  ;;  %v1103_v31 = vsel %vm1102_vm15, %v3532_v36, %v3530_v32  ;;  %v1104_v51 = vsel %vm1102_vm15, %v3530_v32, %v3545_v54  ;;  %v1105_v55 = vsel %vm1102_vm15, %v3545_v54, %v3543_v53  ;;  %v2184_v32 = vld [vmem:[#allocation4 + $0x10] sm:$0xff]  ;;  %s2897_s29 = sshll.u32 %s2996_s8, 4  ;;  %s2898_s29 = int_to_ptr.vmem [resolvable:$false] %s2897_s29 }
 0x13f   : > { %vm1801_vm4 = vcmask 359424   ;;  %v977_v56 = vcombine.low %v968_v2, %v975_v46  ;;  %v1041_v57 = vrot.slane %v1040_v47, 1  ;;  %v1045_v49 = vrot.slane %v1044_v34, 2  ;;  %s2899_s3 = scalar_lea.vmem %s2898_s29, 768 }
 0x140   : > { %v1051_v8 = vadd.s32 %v1050_v30, %v1049_v21  ;;  %v1036_v59 = vadd.s32 %v1035_v7, %v1034_v44  ;;  %v1107_v63 = vmul.u32 %v1103_v31, %v3509_v15  ;;  %v1108_v52 = vmul.u32 %v1104_v51, %v3516_v3  ;;  %2202 = vrot.lane.b32.xlu1 %v2184_v32, %s2993_s17 }
 0x141   : > { %v1106_v36 = vsel %vm1102_vm15, %v3543_v53, %v1101_v14  ;;  %2200 = vrot.lane.b32.xlu0 %v2183_v58, %s2993_s17  ;;  %v991_v29 = vrot.slane %v977_v56, %v3300_v60  ;;  %v1042_v54 = vadd.s32 %v1041_v57, %v1040_v47  ;;  %v1046_v0 = vadd.s32 %v1045_v49, %v1044_v34  ;;  %v3610_v61 = vpop.permute.xlu1 %1797  ;;  %v1340_v19 = vpop.permute.xlu0 %1339 }
 0x142   : > { %v1052_v1 = vrot.slane %v1051_v8, 2  ;;  %v1111_v16 = vrot.slane %v1107_v63, 4  ;;  %v1109_v6 = vmul.u32 %v1105_v55, %v3486_v45  ;;  %v1117_v12 = vrot.slane %v1108_v52, 4 }
 0x143   : > { %v1110_v17 = vmul.u32 %v1106_v36, %v3576_v4  ;;  %v992_v53 = vcombine.low %v984_v43, %v991_v29  ;;  %v1056_v14 = vcombine.low %v1036_v59, %v1042_v54  ;;  %v1047_v18 = vrot.slane %v1046_v0, 1 }
 0x144   : > { %v1053_v23 = vadd.s32 %v1052_v1, %v1051_v8  ;;  %v1112_v25 = vadd.s32 %v1111_v16, %v1107_v63  ;;  %v1118_v11 = vadd.s32 %v1117_v12, %v1108_v52  ;;  %v1123_v26 = vrot.slane %v1109_v6, 4 }
 0x145   : > { %v1129_v27 = vsel %vm223_vm2, %v1110_v17, 0  ;;  %2204 = vrot.lane.b32.xlu0 %v2185_v24, %s2993_s17  ;;  %v999_v48 = vrot.slane %v992_v53, %v3300_v60  ;;  %v1064_v28 = vrot.slane %v1056_v14, %v3300_v60  ;;  %v1048_v5 = vadd.s32 %v1047_v18, %v1046_v0  ;;  %v3618_v40 = vpop.permute.xlu1 %1877  ;;  %v1800_v41 = vpop.permute.xlu0 %1799 }
 0x146   : > { %v1054_v22 = vrot.slane %v1053_v23, 1  ;;  %vm1881_vm6 = vcmask 343040   ;;  %v1113_v42 = vrot.slane %v1112_v25, 2  ;;  %v1119_v2 = vrot.slane %v1118_v11, 2 }
 0x147   : > { %v1124_v13 = vadd.s32 %v1123_v26, %v1109_v6  ;;  %v1130_v20 = vrot.slane %v1129_v27, 4  ;;  %1001 = vst.msk [vmem:[#allocation4 + $0x21] ss:$8 sm:$0xf] %vm3316_vm7, %v999_v48  ;;  %v1185_v33 = vsel %vm215_vm1, %v3563_v10, %v3581_v62  ;;  %v1265_v50 = vsel %vm1261_vm0, %v3579_v37, %v1260_v35 }
 0x148   : > { %v1055_v9 = vadd.s32 %v1054_v22, %v1053_v23  ;;  %v1345_v43 = vsel %vm1341_vm3, %v3590_v39, %v1340_v19  ;;  %v1114_v44 = vadd.s32 %v1113_v42, %v1112_v25  ;;  %v1120_v21 = vadd.s32 %v1119_v2, %v1118_v11 }
 0x149   : > { %v1125_v46 = vrot.slane %v1124_v13, 2  ;;  %v1131_v47 = vadd.s32 %v1130_v20, %v1129_v27  ;;  %v1189_v30 = vmul.u32 %v1185_v33, %v3576_v4  ;;  %v1269_v7 = vmul.u32 %v1265_v50, %v3576_v4  ;;  %v3633_v51 = vpop.permute.xlu1 %1957  ;;  %v1880_v62 = vpop.permute.xlu0 %1879 }
 0x14a   : > { %v1057_v34 = vcombine.low %v1048_v5, %v1055_v9  ;;  %v1805_v31 = vsel %vm1801_vm4, %v3610_v61, %v1800_v41  ;;  %v1115_v55 = vrot.slane %v1114_v44, 1  ;;  %v1121_v35 = vrot.slane %v1120_v21, 1 }
 0x14b   : > { %v1126_v56 = vadd.s32 %v1125_v46, %v1124_v13  ;;  %v1132_v57 = vrot.slane %v1131_v47, 2  ;;  %v1208_v8 = vsel %vm223_vm2, %v1189_v30, 0  ;;  %v1288_v58 = vsel %vm223_vm2, %v1269_v7, 0 }
 0x14c   : > { %v1071_v49 = vrot.slane %v1057_v34, %v3300_v60  ;;  %v1349_v59 = vmul.u32 %v1345_v43, %v3576_v4  ;;  %v1116_v63 = vadd.s32 %v1115_v55, %v1114_v44  ;;  %v1122_v52 = vadd.s32 %v1121_v35, %v1120_v21 }
 0x14d   : > { %v1127_v36 = vrot.slane %v1126_v56, 1  ;;  %v1133_v32 = vadd.s32 %v1132_v57, %v1131_v47  ;;  %v1209_v54 = vrot.slane %v1208_v8, 4  ;;  %v1289_v0 = vrot.slane %v1288_v58, 4  ;;  %v3640_v19 = vpop.permute.xlu1 %2037 }
 0x14e   : > { %v1072_v29 = vcombine.low %v1064_v28, %v1071_v49  ;;  %v1368_v1 = vsel %vm223_vm2, %v1349_v59, 0  ;;  %v1136_v16 = vcombine.low %v1116_v63, %v1122_v52  ;;  %vm1961_vm8 = vcmask 326656   ;;  %v1960_v17 = vpop.permute.xlu0 %1959 }
 0x14f   : > { %v1134_v6 = vrot.slane %v1133_v32, 1  ;;  %v1369_v12 = vrot.slane %v1368_v1, 4  ;;  %v1210_v14 = vadd.s32 %v1209_v54, %v1208_v8  ;;  %v1290_v18 = vadd.s32 %v1289_v0, %v1288_v58 }
 0x150   : > { %v1079_v53 = vrot.slane %v1072_v29, %v3300_v60  ;;  %v1809_v23 = vmul.u32 %v1805_v31, %v3576_v4  ;;  %v1128_v24 = vadd.s32 %v1127_v36, %v1126_v56  ;;  %v1885_v26 = vsel %vm1881_vm6, %v3618_v40, %v1880_v62 }
 0x151   : > { %v1135_v25 = vadd.s32 %v1134_v6, %v1133_v32  ;;  %v1370_v11 = vadd.s32 %v1369_v12, %v1368_v1  ;;  %v1211_v27 = vrot.slane %v1210_v14, 2  ;;  %v1291_v48 = vrot.slane %v1290_v18, 2  ;;  %v3650_v22 = vpop.permute.xlu1 %2117 }
 0x152   : > { %1081 = vst.msk [vmem:[#allocation4 + $0x22] ss:$8 sm:$0xf] %vm3316_vm7, %v1079_v53  ;;  %v1828_v28 = vsel %vm223_vm2, %v1809_v23, 0  ;;  %v1889_v5 = vmul.u32 %v1885_v26, %v3576_v4  ;;  %v1965_v13 = vsel %vm1961_vm8, %v3633_v51, %v1960_v17  ;;  %v2040_v20 = vpop.permute.xlu0 %2039  ;;  %v1144_v9 = vrot.slane %v1136_v16, %v3300_v60 }
 0x153   : > { %v1137_v41 = vcombine.low %v1128_v24, %v1135_v25  ;;  %v1371_v42 = vrot.slane %v1370_v11, 2  ;;  %v1829_v2 = vrot.slane %v1828_v28, 4  ;;  %v1212_v33 = vadd.s32 %v1211_v27, %v1210_v14 }
 0x154   : > { %v1908_v50 = vsel %vm223_vm2, %v1889_v5, 0  ;;  %v1969_v43 = vmul.u32 %v1965_v13, %v3576_v4  ;;  %v1292_v21 = vadd.s32 %v1291_v48, %v1290_v18  ;;  %vm2041_vm9 = vcmask 310272  }
 0x155   : > { %v1151_v44 = vrot.slane %v1137_v41, %v3300_v60  ;;  %v1830_v46 = vadd.s32 %v1829_v2, %v1828_v28  ;;  %v1909_v47 = vrot.slane %v1908_v50, 4  ;;  %v1372_v34 = vadd.s32 %v1371_v42, %v1370_v11  ;;  %v1173_v7 = vpop.permute.xlu1 %1172 }
 0x156   : > { %v1988_v30 = vsel %vm223_vm2, %v1969_v43, 0  ;;  %v1213_v62 = vrot.slane %v1212_v33, 1  ;;  %v2120_v56 = vpop.permute.xlu0 %2119  ;;  %v2045_v49 = vsel %vm2041_vm9, %v3640_v19, %v2040_v20  ;;  %v1293_v58 = vrot.slane %v1292_v21, 1 }
 0x157   : > { %v1152_v31 = vcombine.low %v1144_v9, %v1151_v44  ;;  %v1831_v55 = vrot.slane %v1830_v46, 2  ;;  %v1910_v35 = vadd.s32 %v1909_v47, %v1908_v50  ;;  %v1989_v57 = vrot.slane %v1988_v30, 4 }
 0x158   : > { %v1373_v52 = vrot.slane %v1372_v34, 1  ;;  %v2049_v32 = vmul.u32 %v2045_v49, %v3576_v4  ;;  %vm2121_vm10 = vcmask 293888   ;;  %v3665_v54 = vadd.s32 %v1213_v62, %v1212_v33 }
 0x159   : > { %v1159_v8 = vrot.slane %v1152_v31, %v3300_v60  ;;  %v1832_v59 = vadd.s32 %v1831_v55, %v1830_v46  ;;  %v1911_v63 = vrot.slane %v1910_v35, 2  ;;  %v1990_v36 = vadd.s32 %v1989_v57, %v1988_v30  ;;  %v1177_v29 = vpop.permute.xlu1 %1176 }
 0x15a   : > { %v2125_v1 = vsel %vm2121_vm10, %v3650_v22, %v2120_v56  ;;  %v1184_v16 = vsel %vm215_vm1, %v1177_v29, %v3563_v10  ;;  %v1175_v6 = vpop.permute.xlu0 %1174  ;;  %v2068_v17 = vsel %vm223_vm2, %v2049_v32, 0  ;;  %v3674_v18 = vadd.s32 %v1293_v58, %v1292_v21 }
 0x15b   : > { %1161 = vst.msk [vmem:[#allocation4 + $0x23] ss:$8 sm:$0xf] %vm3316_vm7, %v1159_v8  ;;  %v1912_v0 = vadd.s32 %v1911_v63, %v1910_v35  ;;  %v1991_v12 = vrot.slane %v1990_v36, 2  ;;  %v2129_v53 = vmul.u32 %v2125_v1, %v3576_v4  ;;  %v1188_v14 = vmul.u32 %v1184_v16, %v3486_v45 }
 0x15c   : > { %v1833_v23 = vrot.slane %v1832_v59, 1  ;;  %v2069_v24 = vrot.slane %v2068_v17, 4  ;;  %v1182_v25 = vsel %vm215_vm1, %v1173_v7, %v1175_v6  ;;  %v1183_v10 = vsel %vm215_vm1, %v1175_v6, %v1177_v29 }
 0x15d   : > { %v1992_v11 = vadd.s32 %v1991_v12, %v1990_v36  ;;  %v2148_v26 = vsel %vm223_vm2, %v2129_v53, 0  ;;  %v1202_v27 = vrot.slane %v1188_v14, 4  ;;  %v1254_v48 = vpop.permute.xlu1 %1253  ;;  %v3679_v28 = vadd.s32 %v1373_v52, %v1372_v34 }
 0x15e   : > { %v2070_v5 = vadd.s32 %v2069_v24, %v2068_v17  ;;  %v2149_v41 = vrot.slane %v2148_v26, 4  ;;  %v1186_v42 = vmul.u32 %v1182_v25, %v3509_v15  ;;  %v1252_v2 = vpop.permute.xlu0 %1251  ;;  %v1913_v13 = vrot.slane %v1912_v0, 1 }
 0x15f   : > { %v1203_v20 = vadd.s32 %v1202_v27, %v1188_v14  ;;  %v1187_v9 = vmul.u32 %v1183_v10, %v3516_v3  ;;  %v1262_v33 = vsel %vm1261_vm0, %v1252_v2, %v1254_v48  ;;  %v3685_v46 = vadd.s32 %v1833_v23, %v1832_v59 }
 0x160   : > { %v2071_v50 = vrot.slane %v2070_v5, 2  ;;  %v2150_v43 = vadd.s32 %v2149_v41, %v2148_v26  ;;  %v1190_v44 = vrot.slane %v1186_v42, 4  ;;  %v1266_v21 = vmul.u32 %v1262_v33, %v3509_v15 }
 0x161   : > { %v1993_v47 = vrot.slane %v1992_v11, 1  ;;  %v1204_v34 = vrot.slane %v1203_v20, 2  ;;  %v1196_v30 = vrot.slane %v1187_v9, 4  ;;  %v1332_v7 = vpop.permute.xlu1 %1331  ;;  %vm1418_vm1 = vcmask 752640  }
 0x162   : > { %v2072_v31 = vadd.s32 %v2071_v50, %v2070_v5  ;;  %v2151_v62 = vrot.slane %v2150_v43, 2  ;;  %v1191_v55 = vadd.s32 %v1190_v44, %v1186_v42  ;;  %v1270_v35 = vrot.slane %v1266_v21, 4  ;;  %v1256_v56 = vpop.permute.xlu0 %1255 }
 0x163   : > { %v1205_v57 = vadd.s32 %v1204_v34, %v1203_v20  ;;  %v1197_v49 = vadd.s32 %v1196_v30, %v1187_v9  ;;  %v1263_v8 = vsel %vm1261_vm0, %v1254_v48, %v1256_v56  ;;  %v1264_v58 = vsel %vm1261_vm0, %v1256_v56, %v3579_v37 }
 0x164   : > { %v3690_v63 = vadd.s32 %v1913_v13, %v1912_v0  ;;  %v2073_v59 = vrot.slane %v2072_v31, 1  ;;  %v1192_v52 = vrot.slane %v1191_v55, 2  ;;  %v1271_v36 = vadd.s32 %v1270_v35, %v1266_v21 }
 0x165   : > { %v1206_v32 = vrot.slane %v1205_v57, 1  ;;  %v1198_v29 = vrot.slane %v1197_v49, 2  ;;  %v1267_v1 = vmul.u32 %v1263_v8, %v3516_v3  ;;  %v1268_v16 = vmul.u32 %v1264_v58, %v3486_v45  ;;  %v1336_v6 = vpop.permute.xlu1 %1335 }
 0x166   : > { %v3694_v12 = vadd.s32 %v1993_v47, %v1992_v11  ;;  %v3696_v17 = vadd.s32 %v2151_v62, %v2150_v43  ;;  %v1193_v53 = vadd.s32 %v1192_v52, %v1191_v55  ;;  %v1272_v14 = vrot.slane %v1271_v36, 2  ;;  %v1334_v37 = vpop.permute.xlu0 %1333 }
 0x167   : > { %v1207_v23 = vadd.s32 %v1206_v32, %v1205_v57  ;;  %v1199_v0 = vadd.s32 %v1198_v29, %v1197_v49  ;;  %v1276_v24 = vrot.slane %v1267_v1, 4  ;;  %v1282_v25 = vrot.slane %v1268_v16, 4 }
 0x168   : > { %v3698_v26 = vadd.s32 %v2073_v59, %v2072_v31  ;;  %v1194_v27 = vrot.slane %v1193_v53, 1  ;;  %v1273_v10 = vadd.s32 %v1272_v14, %v1271_v36  ;;  %v1344_v48 = vsel %vm1341_vm3, %v1336_v6, %v3590_v39 }
 0x169   : > { %v1216_v5 = vcombine.low %v1207_v23, %v3665_v54  ;;  %v1200_v11 = vrot.slane %v1199_v0, 1  ;;  %v1277_v41 = vadd.s32 %v1276_v24, %v1267_v1  ;;  %v1283_v42 = vadd.s32 %v1282_v25, %v1268_v16  ;;  %v1413_v2 = vpop.permute.xlu1 %1412 }
 0x16a   : > { %v1195_v13 = vadd.s32 %v1194_v27, %v1193_v53  ;;  %v1274_v20 = vrot.slane %v1273_v10, 1  ;;  %v1348_v9 = vmul.u32 %v1344_v48, %v3486_v45  ;;  %v1342_v33 = vsel %vm1341_vm3, %v1332_v7, %v1334_v37  ;;  %v1411_v50 = vpop.permute.xlu0 %1410 }
 0x16b   : > { %v1230_v43 = vrot.slane %v1216_v5, %v3300_v60  ;;  %v1201_v44 = vadd.s32 %v1200_v11, %v1199_v0  ;;  %v1278_v21 = vrot.slane %v1277_v41, 2  ;;  %v1284_v47 = vrot.slane %v1283_v42, 2 }
 0x16c   : > { %v1275_v34 = vadd.s32 %v1274_v20, %v1273_v10  ;;  %v1362_v39 = vrot.slane %v1348_v9, 4  ;;  %v1343_v54 = vsel %vm1341_vm3, %v1334_v37, %v1336_v6  ;;  %v1346_v30 = vmul.u32 %v1342_v33, %v3509_v15 }
 0x16d   : > { %v1215_v31 = vcombine.low %v1195_v13, %v1201_v44  ;;  %v1279_v62 = vadd.s32 %v1278_v21, %v1277_v41  ;;  %v1285_v55 = vadd.s32 %v1284_v47, %v1283_v42  ;;  %v1347_v35 = vmul.u32 %v1343_v54, %v3516_v3  ;;  %v1417_v56 = vpop.permute.xlu1 %1416 }
 0x16e   : > { %v1363_v57 = vadd.s32 %v1362_v39, %v1348_v9  ;;  %v1350_v7 = vrot.slane %v1346_v30, 4  ;;  %v1419_v49 = vsel %vm1418_vm1, %v1411_v50, %v1413_v2  ;;  %v1425_v8 = vmul.u32 %v1417_v56, %v3576_v4  ;;  %v1415_v58 = vpop.permute.xlu0 %1414 }
 0x16f   : > { %v1223_v59 = vrot.slane %v1215_v31, %v3300_v60  ;;  %v1280_v52 = vrot.slane %v1279_v62, 1  ;;  %v1286_v36 = vrot.slane %v1285_v55, 1  ;;  %v1356_v32 = vrot.slane %v1347_v35, 4 }
 0x170   : > { %vm1494_vm11 = vcmask 736256   ;;  %v1364_v29 = vrot.slane %v1363_v57, 2  ;;  %v1351_v1 = vadd.s32 %v1350_v7, %v1346_v30  ;;  %v1422_v16 = vmul.u32 %v1419_v49, %v3509_v15 }
 0x171   : > { %v1444_v6 = vsel %vm223_vm2, %v1425_v8, 0  ;;  %v1231_v53 = vcombine.low %v1223_v59, %v1230_v43  ;;  %v1281_v14 = vadd.s32 %v1280_v52, %v1279_v62  ;;  %v1287_v37 = vadd.s32 %v1286_v36, %v1285_v55  ;;  %v1489_v0 = vpop.permute.xlu1 %1488 }
 0x172   : > { %v1357_v23 = vadd.s32 %v1356_v32, %v1347_v35  ;;  %v1365_v24 = vadd.s32 %v1364_v29, %v1363_v57  ;;  %v1352_v25 = vrot.slane %v1351_v1, 2  ;;  %v1426_v27 = vrot.slane %v1422_v16, 4  ;;  %v1487_v48 = vpop.permute.xlu0 %1486 }
 0x173   : > { %v1445_v10 = vrot.slane %v1444_v6, 4  ;;  %v1238_v5 = vrot.slane %v1231_v53, %v3300_v60  ;;  %v1295_v11 = vcombine.low %v1275_v34, %v1281_v14  ;;  %v1296_v41 = vcombine.low %v1287_v37, %v3674_v18 }
 0x174   : > { %v1358_v42 = vrot.slane %v1357_v23, 2  ;;  %v1366_v13 = vrot.slane %v1365_v24, 1  ;;  %v1353_v20 = vadd.s32 %v1352_v25, %v1351_v1  ;;  %v1427_v9 = vadd.s32 %v1426_v27, %v1422_v16 }
 0x175   : > { %v1446_v33 = vadd.s32 %v1445_v10, %v1444_v6  ;;  %1240 = vst.msk [vmem:[#allocation4 + $0x24] ss:$8 sm:$0xf] %vm3316_vm7, %v1238_v5  ;;  %v1303_v50 = vrot.slane %v1295_v11, %v3300_v60  ;;  %v1310_v43 = vrot.slane %v1296_v41, %v3300_v60  ;;  %v1420_v21 = vsel %vm1418_vm1, %v1413_v2, %v1415_v58  ;;  %v1493_v47 = vpop.permute.xlu1 %1492 }
 0x176   : > { %v1359_v44 = vadd.s32 %v1358_v42, %v1357_v23  ;;  %v1367_v39 = vadd.s32 %v1366_v13, %v1365_v24  ;;  %v1354_v34 = vrot.slane %v1353_v20, 1  ;;  %v1428_v54 = vrot.slane %v1427_v9, 2  ;;  %v1491_v30 = vpop.permute.xlu0 %1490 }
 0x177   : > { %v1447_v18 = vrot.slane %v1446_v33, 2  ;;  %v1311_v31 = vcombine.low %v1303_v50, %v1310_v43  ;;  %v1421_v55 = vsel %vm1418_vm1, %v1415_v58, %v1417_v56  ;;  %v1423_v35 = vmul.u32 %v1420_v21, %v3516_v3 }
 0x178   : > { %v1360_v62 = vrot.slane %v1359_v44, 1  ;;  %v1376_v57 = vcombine.low %v1367_v39, %v3679_v28  ;;  %v1355_v7 = vadd.s32 %v1354_v34, %v1353_v20  ;;  %v1429_v49 = vadd.s32 %v1428_v54, %v1427_v9 }
 0x179   : > { %v1448_v8 = vadd.s32 %v1447_v18, %v1446_v33  ;;  %v1318_v59 = vrot.slane %v1311_v31, %v3300_v60  ;;  %v1424_v52 = vmul.u32 %v1421_v55, %v3486_v45  ;;  %v1432_v36 = vrot.slane %v1423_v35, 4  ;;  %v3726_v32 = vpop.permute.xlu1 %1564 }
 0x17a   : > { %v1361_v2 = vadd.s32 %v1360_v62, %v1359_v44  ;;  %v1390_v29 = vrot.slane %v1376_v57, %v3300_v60  ;;  %v1430_v1 = vrot.slane %v1429_v49, 1  ;;  %v1495_v56 = vsel %vm1494_vm11, %v1487_v48, %v1489_v0  ;;  %v1563_v58 = vpop.permute.xlu0 %1562 }
 0x17b   : > { %v1449_v16 = vrot.slane %v1448_v8, 1  ;;  %1320 = vst.msk [vmem:[#allocation4 + $0x25] ss:$8 sm:$0xf] %vm3316_vm7, %v1318_v59  ;;  %v1433_v6 = vadd.s32 %v1432_v36, %v1423_v35  ;;  %v1438_v53 = vrot.slane %v1424_v52, 4  ;;  %v1498_v14 = vmul.u32 %v1495_v56, %v3509_v15 }
 0x17c   : > { %v1375_v28 = vcombine.low %v1355_v7, %v1361_v2  ;;  %v1431_v37 = vadd.s32 %v1430_v1, %v1429_v49  ;;  %v1501_v24 = vmul.u32 %v1493_v47, %v3576_v4  ;;  %v1496_v25 = vsel %vm1494_vm11, %v1489_v0, %v1491_v30 }
 0x17d   : > { %v1450_v23 = vadd.s32 %v1449_v16, %v1448_v8  ;;  %v1434_v10 = vrot.slane %v1433_v6, 2  ;;  %v1439_v5 = vadd.s32 %v1438_v53, %v1424_v52  ;;  %v1502_v48 = vrot.slane %v1498_v14, 4  ;;  %v1569_v11 = vpop.permute.xlu1 %1568 }
 0x17e   : > { %v1383_v27 = vrot.slane %v1375_v28, %v3300_v60  ;;  %v1520_v41 = vsel %vm223_vm2, %v1501_v24, 0  ;;  %v1497_v42 = vsel %vm1494_vm11, %v1491_v30, %v1493_v47  ;;  %v1499_v13 = vmul.u32 %v1496_v25, %v3516_v3  ;;  %v1567_v20 = vpop.permute.xlu0 %1566 }
 0x17f   : > { %vm1570_vm12 = vcmask 719872   ;;  %v1435_v33 = vadd.s32 %v1434_v10, %v1433_v6  ;;  %v1440_v50 = vrot.slane %v1439_v5, 2  ;;  %v1503_v43 = vadd.s32 %v1502_v48, %v1498_v14 }
 0x180   : > { %v1391_v9 = vcombine.low %v1383_v27, %v1390_v29  ;;  %v1521_v44 = vrot.slane %v1520_v41, 4  ;;  %v1500_v0 = vmul.u32 %v1497_v42, %v3486_v45  ;;  %v1508_v21 = vrot.slane %v1499_v13, 4 }
 0x181   : > { %v1571_v39 = vsel %vm1570_vm12, %v1563_v58, %v3726_v32  ;;  %v1436_v54 = vrot.slane %v1435_v33, 1  ;;  %v1441_v18 = vadd.s32 %v1440_v50, %v1439_v5  ;;  %v1504_v47 = vrot.slane %v1503_v43, 2  ;;  %v3743_v30 = vpop.permute.xlu1 %1640 }
 0x182   : > { %v1398_v34 = vrot.slane %v1391_v9, %v3300_v60  ;;  %v1522_v3 = vadd.s32 %v1521_v44, %v1520_v41  ;;  %v1509_v31 = vadd.s32 %v1508_v21, %v1499_v13  ;;  %v1514_v62 = vrot.slane %v1500_v0, 4  ;;  %v1639_v35 = vpop.permute.xlu0 %1638  ;;  %v3759_v21 = vld [vmem:[#allocation2 + $0x10] sm:$0xff] }
 0x183   : > { %v1574_v55 = vmul.u32 %v1571_v39, %v3509_v15  ;;  %v1437_v45 = vadd.s32 %v1436_v54, %v1435_v33  ;;  %v1442_v57 = vrot.slane %v1441_v18, 1  ;;  %v1505_v7 = vadd.s32 %v1504_v47, %v1503_v43 }
 0x184   : > { %1400 = vst.msk [vmem:[#allocation4 + $0x26] ss:$8 sm:$0xf] %vm3316_vm7, %v1398_v34  ;;  %v1577_v49 = vmul.u32 %v1569_v11, %v3576_v4  ;;  %v1523_v8 = vrot.slane %v1522_v3, 2  ;;  %v1510_v59 = vrot.slane %v1509_v31, 2  ;;  %v1515_v2 = vadd.s32 %v1514_v62, %v1500_v0  ;;  %v3757_v0 = vld [vmem:[#allocation2 + $0x8] sm:$0xff] }
 0x185   : > { %v1578_v52 = vrot.slane %v1574_v55, 4  ;;  %v1443_v36 = vadd.s32 %v1442_v57, %v1441_v18  ;;  %v1451_v29 = vcombine.low %v1431_v37, %v1437_v45  ;;  %v1506_v1 = vrot.slane %v1505_v7, 1  ;;  %v1645_v56 = vpop.permute.xlu1 %1644 }
 0x186   : > { %v1596_v16 = vsel %vm223_vm2, %v1577_v49, 0  ;;  %v1524_v15 = vadd.s32 %v1523_v8, %v1522_v3  ;;  %v1511_v58 = vadd.s32 %v1510_v59, %v1509_v31  ;;  %v1516_v28 = vrot.slane %v1515_v2, 2  ;;  %v1643_v53 = vpop.permute.xlu0 %1642  ;;  %v3767_v49 = vld [vmem:[#allocation2] sm:$0xff] }
 0x187   : > { %v1579_v6 = vadd.s32 %v1578_v52, %v1574_v55  ;;  %v1452_v14 = vcombine.low %v1443_v36, %v1450_v23  ;;  %v1459_v24 = vrot.slane %v1451_v29, %v3300_v60  ;;  %v1507_v25 = vadd.s32 %v1506_v1, %v1505_v7 }
 0x188   : > { %v1597_v27 = vrot.slane %v1596_v16, 4  ;;  %v1525_v10 = vrot.slane %v1524_v15, 1  ;;  %v1512_v5 = vrot.slane %v1511_v58, 1  ;;  %v1517_v48 = vadd.s32 %v1516_v28, %v1515_v2 }
 0x189   : > { %v1580_v41 = vrot.slane %v1579_v6, 2  ;;  %v1466_v37 = vrot.slane %v1452_v14, %v3300_v60  ;;  %v1572_v13 = vsel %vm1570_vm12, %v3726_v32, %v1567_v20  ;;  %v1573_v9 = vsel %vm1570_vm12, %v1567_v20, %v1569_v11  ;;  %v3755_v33 = vpop.permute.xlu1 %1716 }
 0x18a   : > { %v1598_v42 = vadd.s32 %v1597_v27, %v1596_v16  ;;  %v1526_v50 = vadd.s32 %v1525_v10, %v1524_v15  ;;  %v1513_v23 = vadd.s32 %v1512_v5, %v1511_v58  ;;  %v1518_v43 = vrot.slane %v1517_v48, 1  ;;  %v1715_v39 = vpop.permute.xlu0 %1714 }
 0x18b   : > { %v1581_v44 = vadd.s32 %v1580_v41, %v1579_v6  ;;  %v1467_v34 = vcombine.low %v1459_v24, %v1466_v37  ;;  %v1575_v18 = vmul.u32 %v1572_v13, %v3757_v0  ;;  %v1576_v47 = vmul.u32 %v1573_v9, %v3759_v21 }
 0x18c   : > { %v1599_v54 = vrot.slane %v1598_v42, 2  ;;  %v1519_v32 = vadd.s32 %v1518_v43, %v1517_v48  ;;  %v1527_v3 = vcombine.low %v1507_v25, %v1513_v23  ;;  %vm1646_vm13 = vcmask 703488  }
 0x18d   : > { %v1582_v11 = vrot.slane %v1581_v44, 1  ;;  %v1474_v20 = vrot.slane %v1467_v34, %v3300_v60  ;;  %v1584_v62 = vrot.slane %v1575_v18, 4  ;;  %v1590_v55 = vrot.slane %v1576_v47, 4  ;;  %v3771_v59 = vpop.permute.xlu1 %1720 }
 0x18e   : > { %v1600_v31 = vadd.s32 %v1599_v54, %v1598_v42  ;;  %v1528_v45 = vcombine.low %v1519_v32, %v1526_v50  ;;  %v1535_v57 = vrot.slane %v1527_v3, %v3300_v60  ;;  %v1647_v8 = vsel %vm1646_vm13, %v1639_v35, %v3743_v30  ;;  %v3773_v2 = vpop.permute.xlu0 %1718 }
 0x18f   : > { %v3765_v7 = vadd.s32 %v1582_v11, %v1581_v44  ;;  %1476 = vst.msk [vmem:[#allocation4 + $0x27] ss:$8 sm:$0xf] %vm3316_vm7, %v1474_v20  ;;  %v1585_v36 = vadd.s32 %v1584_v62, %v1575_v18  ;;  %v1591_v29 = vadd.s32 %v1590_v55, %v1576_v47  ;;  %v1650_v1 = vmul.u32 %v1647_v8, %v3767_v49  ;;  %v1713_v44 = vld [vmem:[#allocation2 + $0x18] sm:$0xff] }
 0x190   : > { %v1601_v52 = vrot.slane %v1600_v31, 1  ;;  %v1542_v16 = vrot.slane %v1528_v45, %v3300_v60  ;;  %v1653_v15 = vmul.u32 %v1645_v56, %v3576_v4  ;;  %v1648_v58 = vsel %vm1646_vm13, %v3743_v30, %v1643_v53 }
 0x191   : > { %v1649_v35 = vsel %vm1646_vm13, %v1643_v53, %v1645_v56  ;;  %v1586_v6 = vrot.slane %v1585_v36, 2  ;;  %v1592_v14 = vrot.slane %v1591_v29, 2  ;;  %v1654_v24 = vrot.slane %v1650_v1, 4  ;;  %v3789_v13 = vpop.permute.xlu1 %1793 }
 0x192   : > { %v1602_v28 = vadd.s32 %v1601_v52, %v1600_v31  ;;  %v1543_v25 = vcombine.low %v1535_v57, %v1542_v16  ;;  %v1672_v27 = vsel %vm223_vm2, %v1653_v15, 0  ;;  %v1651_v10 = vmul.u32 %v1648_v58, %v3757_v0  ;;  %v3786_v48 = vpop.permute.xlu0 %1791 }
 0x193   : > { %v1652_v5 = vmul.u32 %v1649_v35, %v3759_v21  ;;  %v1587_v41 = vadd.s32 %v1586_v6, %v1585_v36  ;;  %v1593_v4 = vadd.s32 %v1592_v14, %v1591_v29  ;;  %v1655_v37 = vadd.s32 %v1654_v24, %v1650_v1 }
 0x194   : > { %v1673_v42 = vrot.slane %v1672_v27, 4  ;;  %v1550_v30 = vrot.slane %v1543_v25, %v3300_v60  ;;  %v1660_v56 = vrot.slane %v1651_v10, 4  ;;  %vm1722_vm14 = vcmask 687104  }
 0x195   : > { %v1666_v53 = vrot.slane %v1652_v5, 4  ;;  %v1588_v9 = vrot.slane %v1587_v41, 1  ;;  %v1594_v50 = vrot.slane %v1593_v4, 1  ;;  %v1656_v23 = vrot.slane %v1655_v37, 2  ;;  %v1872_v24 = vpop.permute.xlu1 %1871 }
 0x196   : > { %v1674_v43 = vadd.s32 %v1673_v42, %v1672_v27  ;;  %1552 = vst.msk [vmem:[#allocation4 + $0x40] ss:$8 sm:$0xf] %vm3316_vm7, %v1550_v30  ;;  %v1661_v34 = vadd.s32 %v1660_v56, %v1651_v10  ;;  %v1723_v18 = vsel %vm1722_vm14, %v1715_v39, %v3755_v33  ;;  %v1729_v47 = vmul.u32 %v3771_v59, %v1713_v44  ;;  %v3796_v32 = vld [vmem:[#allocation4 + $0x28] sm:$0xff]  ;;  %v3798_v3 = vld [vmem:[#allocation4 + $0x20] sm:$0xff]  ;;  %v1796_v8 = vpop.permute.xlu0 %1795  ;;  %v3807_v6 = vld [vmem:[#allocation4 + $0x38] sm:$0xff] }
 0x197   : > { %v1667_v54 = vadd.s32 %v1666_v53, %v1652_v5  ;;  %v1589_v11 = vadd.s32 %v1588_v9, %v1587_v41  ;;  %v1595_v20 = vadd.s32 %v1594_v50, %v1593_v4  ;;  %v1657_v31 = vadd.s32 %v1656_v23, %v1655_v37  ;;  %2208 = vrot.lane.b32.xlu0 %v3796_v32, %s2993_s17  ;;  %v3809_v14 = vld [vmem:[#allocation4 + $0x30] sm:$0xff] }
 0x198   : > { %v1675_v62 = vrot.slane %v1674_v43, 2  ;;  %2206 = vrot.lane.b32.xlu1 %v3798_v3, %s2993_s17  ;;  %v1662_v55 = vrot.slane %v1661_v34, 2  ;;  %v1726_v39 = vmul.u32 %v1723_v18, %v3767_v49  ;;  %v1748_v57 = vsel %vm223_vm2, %v1729_v47, 0 }
 0x199   : > { %v1668_v45 = vrot.slane %v1667_v54, 2  ;;  %v1603_v52 = vcombine.low %v3765_v7, %v1589_v11  ;;  %v1604_v36 = vcombine.low %v1595_v20, %v1602_v28  ;;  %v1658_v29 = vrot.slane %v1657_v31, 1 }
 0x19a   : > { %v1676_v1 = vadd.s32 %v1675_v62, %v1674_v43  ;;  %v1663_v16 = vadd.s32 %v1662_v55, %v1661_v34  ;;  %v1730_v58 = vrot.slane %v1726_v39, 4  ;;  %v1749_v35 = vrot.slane %v1748_v57, 4  ;;  %v1874_v43 = vpop.permute.xlu0 %1873 }
 0x19b   : > { %v1669_v15 = vadd.s32 %v1668_v45, %v1667_v54  ;;  %v1611_v25 = vrot.slane %v1603_v52, %v3300_v60  ;;  %v1618_v27 = vrot.slane %v1604_v36, %v3300_v60  ;;  %v1659_v10 = vadd.s32 %v1658_v29, %v1657_v31  ;;  %2212 = vrot.lane.b32.xlu0 %v3807_v6, %s2993_s17 }
 0x19c   : > { %v1677_v5 = vrot.slane %v1676_v1, 1  ;;  %2210 = vrot.lane.b32.xlu1 %v3809_v14, %s2993_s17  ;;  %v1664_v7 = vrot.slane %v1663_v16, 1  ;;  %v1731_v41 = vadd.s32 %v1730_v58, %v1726_v39  ;;  %v1750_v4 = vadd.s32 %v1749_v35, %v1748_v57 }
 0x19d   : > { %v1670_v28 = vrot.slane %v1669_v15, 1  ;;  %v1619_v37 = vcombine.low %v1611_v25, %v1618_v27  ;;  %v1724_v30 = vsel %vm1722_vm14, %v3755_v33, %v3773_v2  ;;  %v1725_v56 = vsel %vm1722_vm14, %v3773_v2, %v3771_v59  ;;  %v1876_v59 = vpop.permute.xlu1 %1875 }
 0x19e   : > { %v1678_v42 = vadd.s32 %v1677_v5, %v1676_v1  ;;  %v1665_v53 = vadd.s32 %v1664_v7, %v1663_v16  ;;  %v1732_v50 = vrot.slane %v1731_v41, 2  ;;  %v1751_v23 = vrot.slane %v1750_v4, 2  ;;  %v1952_v25 = vpop.permute.xlu0 %1951 }
 0x19f   : > { %v1671_v9 = vadd.s32 %v1670_v28, %v1669_v15  ;;  %v1626_v44 = vrot.slane %v1619_v37, %v3300_v60  ;;  %v1727_v34 = vmul.u32 %v1724_v30, %v3757_v0  ;;  %v1728_v54 = vmul.u32 %v1725_v56, %v3759_v21 }
 0x1a0   : > { %v1802_v18 = vsel %vm1801_vm4, %v3786_v48, %v3789_v13  ;;  %v1679_v33 = vcombine.low %v1659_v10, %v1665_v53  ;;  %v1733_v11 = vadd.s32 %v1732_v50, %v1731_v41  ;;  %v1752_v20 = vadd.s32 %v1751_v23, %v1750_v4 }
 0x1a1   : > { %v1680_v47 = vcombine.low %v1671_v9, %v1678_v42  ;;  %1628 = vst.msk [vmem:[#allocation4 + $0x41] ss:$8 sm:$0xf] %vm3316_vm7, %v1626_v44  ;;  %v1736_v2 = vrot.slane %v1727_v34, 4  ;;  %v1742_v31 = vrot.slane %v1728_v54, 4  ;;  %v1806_v62 = vmul.u32 %v1802_v18, %v3767_v49 }
 0x1a2   : > { %v1803_v55 = vsel %vm1801_vm4, %v3789_v13, %v1796_v8  ;;  %v1687_v45 = vrot.slane %v1679_v33, %v3300_v60  ;;  %v1734_v48 = vrot.slane %v1733_v11, 1  ;;  %v1753_v57 = vrot.slane %v1752_v20, 1 }
 0x1a3   : > { %v1694_v39 = vrot.slane %v1680_v47, %v3300_v60  ;;  %v1737_v52 = vadd.s32 %v1736_v2, %v1727_v34  ;;  %v1743_v36 = vadd.s32 %v1742_v31, %v1728_v54  ;;  %v1810_v29 = vrot.slane %v1806_v62, 4  ;;  %v1956_v47 = vpop.permute.xlu0 %1955 }
 0x1a4   : > { %v1804_v1 = vsel %vm1801_vm4, %v1796_v8, %v3610_v61  ;;  %v1735_v15 = vadd.s32 %v1734_v48, %v1733_v11  ;;  %v1754_v58 = vadd.s32 %v1753_v57, %v1752_v20  ;;  %v1807_v35 = vmul.u32 %v1803_v55, %v3757_v0  ;;  %v1954_v61 = vpop.permute.xlu1 %1953 }
 0x1a5   : > { %v1695_v16 = vcombine.low %v1687_v45, %v1694_v39  ;;  %v1738_v27 = vrot.slane %v1737_v52, 2  ;;  %v1744_v13 = vrot.slane %v1743_v36, 2  ;;  %v1811_v10 = vadd.s32 %v1810_v29, %v1806_v62 }
 0x1a6   : > { %v1808_v5 = vmul.u32 %v1804_v1, %v3759_v21  ;;  %v1816_v28 = vrot.slane %v1807_v35, 4  ;;  %v1884_v41 = vsel %vm1881_vm6, %v1876_v59, %v3618_v40  ;;  %v1882_v4 = vsel %vm1881_vm6, %v1872_v24, %v1874_v43 }
 0x1a7   : > { %v1702_v7 = vrot.slane %v1695_v16, %v3300_v60  ;;  %v1739_v8 = vadd.s32 %v1738_v27, %v1737_v52  ;;  %v1745_v37 = vadd.s32 %v1744_v13, %v1743_v36  ;;  %v1812_v42 = vrot.slane %v1811_v10, 2 }
 0x1a8   : > { %v1822_v30 = vrot.slane %v1808_v5, 4  ;;  %v1817_v56 = vadd.s32 %v1816_v28, %v1807_v35  ;;  %v1888_v53 = vmul.u32 %v1884_v41, %v3759_v21  ;;  %v1883_v9 = vsel %vm1881_vm6, %v1874_v43, %v1876_v59  ;;  %v2032_v59 = vpop.permute.xlu1 %2031 }
 0x1a9   : > { %1704 = vst.msk [vmem:[#allocation4 + $0x42] ss:$8 sm:$0xf] %vm3316_vm7, %v1702_v7  ;;  %v1886_v50 = vmul.u32 %v1882_v4, %v3767_v49  ;;  %v1740_v23 = vrot.slane %v1739_v8, 1  ;;  %v1746_v44 = vrot.slane %v1745_v37, 1  ;;  %v1813_v40 = vadd.s32 %v1812_v42, %v1811_v10  ;;  %v2034_v4 = vpop.permute.xlu0 %2033 }
 0x1aa   : > { %v1823_v34 = vadd.s32 %v1822_v30, %v1808_v5  ;;  %v1818_v24 = vrot.slane %v1817_v56, 2  ;;  %v1902_v54 = vrot.slane %v1888_v53, 4  ;;  %v1887_v18 = vmul.u32 %v1883_v9, %v3757_v0 }
 0x1ab   : > { %v1890_v33 = vrot.slane %v1886_v50, 4  ;;  %v1741_v11 = vadd.s32 %v1740_v23, %v1739_v8  ;;  %v1747_v20 = vadd.s32 %v1746_v44, %v1745_v37  ;;  %v1814_v2 = vrot.slane %v1813_v40, 1 }
 0x1ac   : > { %v1824_v31 = vrot.slane %v1823_v34, 2  ;;  %v1819_v62 = vadd.s32 %v1818_v24, %v1817_v56  ;;  %v1903_v55 = vadd.s32 %v1902_v54, %v1888_v53  ;;  %v1896_v43 = vrot.slane %v1887_v18, 4  ;;  %v2036_v9 = vpop.permute.xlu1 %2035 }
 0x1ad   : > { %v1891_v45 = vadd.s32 %v1890_v33, %v1886_v50  ;;  %v1755_v39 = vcombine.low %v1735_v15, %v1741_v11  ;;  %v1756_v48 = vcombine.low %v1747_v20, %v1754_v58  ;;  %v1815_v57 = vadd.s32 %v1814_v2, %v1813_v40  ;;  %v2112_v2 = vpop.permute.xlu0 %2111 }
 0x1ae   : > { %v1825_v52 = vadd.s32 %v1824_v31, %v1823_v34  ;;  %v1820_v36 = vrot.slane %v1819_v62, 1  ;;  %v1904_v29 = vrot.slane %v1903_v55, 2  ;;  %v1897_v16 = vadd.s32 %v1896_v43, %v1887_v18 }
 0x1af   : > { %v1892_v1 = vrot.slane %v1891_v45, 2  ;;  %v1763_v35 = vrot.slane %v1755_v39, %v3300_v60  ;;  %v1770_v27 = vrot.slane %v1756_v48, %v3300_v60  ;;  %v1962_v10 = vsel %vm1961_vm8, %v1952_v25, %v1954_v61 }
 0x1b0   : > { %v1826_v13 = vrot.slane %v1825_v52, 1  ;;  %v1821_v5 = vadd.s32 %v1820_v36, %v1819_v62  ;;  %v1905_v7 = vadd.s32 %v1904_v29, %v1903_v55  ;;  %v1898_v41 = vrot.slane %v1897_v16, 2 }
 0x1b1   : > { %v1893_v28 = vadd.s32 %v1892_v1, %v1891_v45  ;;  %v1771_v15 = vcombine.low %v1763_v35, %v1770_v27  ;;  %v1966_v8 = vmul.u32 %v1962_v10, %v3767_v49  ;;  %v1963_v37 = vsel %vm1961_vm8, %v1954_v61, %v1956_v47 }
 0x1b2   : > { %v1827_v58 = vadd.s32 %v1826_v13, %v1825_v52  ;;  %v1835_v42 = vcombine.low %v1815_v57, %v1821_v5  ;;  %v1906_v30 = vrot.slane %v1905_v7, 1  ;;  %v1899_v53 = vadd.s32 %v1898_v41, %v1897_v16  ;;  %v2114_v52 = vpop.permute.xlu1 %2113 }
 0x1b3   : > { %v1894_v56 = vrot.slane %v1893_v28, 1  ;;  %v1778_v50 = vrot.slane %v1771_v15, %v3300_v60  ;;  %v1970_v23 = vrot.slane %v1966_v8, 4  ;;  %v1964_v44 = vsel %vm1961_vm8, %v1956_v47, %v3633_v51  ;;  %v2116_v15 = vpop.permute.xlu0 %2115 }
 0x1b4   : > { %v1836_v25 = vcombine.low %v1827_v58, %v3685_v46  ;;  %v1843_v40 = vrot.slane %v1835_v42, %v3300_v60  ;;  %v1907_v34 = vadd.s32 %v1906_v30, %v1905_v7  ;;  %v1900_v54 = vrot.slane %v1899_v53, 1 }
 0x1b5   : > { %v1895_v24 = vadd.s32 %v1894_v56, %v1893_v28  ;;  %1780 = vst.msk [vmem:[#allocation4 + $0x43] ss:$8 sm:$0xf] %vm3316_vm7, %v1778_v50  ;;  %v1971_v18 = vadd.s32 %v1970_v23, %v1966_v8  ;;  %v1967_v33 = vmul.u32 %v1963_v37, %v3757_v0  ;;  %v1968_v11 = vmul.u32 %v1964_v44, %v3759_v21 }
 0x1b6   : > { %v1850_v61 = vrot.slane %v1836_v25, %v3300_v60  ;;  %v1916_v46 = vcombine.low %v1907_v34, %v3690_v63  ;;  %v1901_v20 = vadd.s32 %v1900_v54, %v1899_v53  ;;  %v2044_v51 = vsel %vm2041_vm9, %v2036_v9, %v3640_v19 }
 0x1b7   : > { %v2042_v47 = vsel %vm2041_vm9, %v2032_v59, %v2034_v4  ;;  %v1972_v62 = vrot.slane %v1971_v18, 2  ;;  %v1976_v55 = vrot.slane %v1967_v33, 4  ;;  %v1982_v45 = vrot.slane %v1968_v11, 4 }
 0x1b8   : > { %v1851_v31 = vcombine.low %v1843_v40, %v1850_v61  ;;  %v1930_v43 = vrot.slane %v1916_v46, %v3300_v60  ;;  %v1915_v39 = vcombine.low %v1895_v24, %v1901_v20  ;;  %v2048_v48 = vmul.u32 %v2044_v51, %v3759_v21 }
 0x1b9   : > { %v2043_v57 = vsel %vm2041_vm9, %v2034_v4, %v2036_v9  ;;  %v1973_v36 = vadd.s32 %v1972_v62, %v1971_v18  ;;  %v1977_v29 = vadd.s32 %v1976_v55, %v1967_v33  ;;  %v1983_v19 = vadd.s32 %v1982_v45, %v1968_v11 }
 0x1ba   : > { %v1858_v63 = vrot.slane %v1851_v31, %v3300_v60  ;;  %v1923_v59 = vrot.slane %v1915_v39, %v3300_v60  ;;  %v2062_v1 = vrot.slane %v2048_v48, 4  ;;  %v2046_v16 = vmul.u32 %v2042_v47, %v3767_v49 }
 0x1bb   : > { %v2047_v35 = vmul.u32 %v2043_v57, %v3757_v0  ;;  %v1974_v27 = vrot.slane %v1973_v36, 1  ;;  %v1978_v13 = vrot.slane %v1977_v29, 2  ;;  %v1984_v10 = vrot.slane %v1983_v19, 2 }
 0x1bc   : > { %1860 = vst.msk [vmem:[#allocation4 + $0x44] ss:$8 sm:$0xf] %vm3316_vm7, %v1858_v63  ;;  %v2122_v5 = vsel %vm2121_vm10, %v2112_v2, %v2114_v52  ;;  %v1931_v7 = vcombine.low %v1923_v59, %v1930_v43  ;;  %v2063_v28 = vadd.s32 %v2062_v1, %v2048_v48  ;;  %v2050_v41 = vrot.slane %v2046_v16, 4 }
 0x1bd   : > { %v2056_v4 = vrot.slane %v2047_v35, 4  ;;  %v1975_v58 = vadd.s32 %v1974_v27, %v1973_v36  ;;  %v1979_v8 = vadd.s32 %v1978_v13, %v1977_v29  ;;  %v1985_v37 = vadd.s32 %v1984_v10, %v1983_v19 }
 0x1be   : > { %v2126_v42 = vmul.u32 %v2122_v5, %v3767_v49  ;;  %v1938_v30 = vrot.slane %v1931_v7, %v3300_v60  ;;  %v2064_v56 = vrot.slane %v2063_v28, 2  ;;  %v2051_v53 = vadd.s32 %v2050_v41, %v2046_v16 }
 0x1bf   : > { %v2057_v9 = vadd.s32 %v2056_v4, %v2047_v35  ;;  %v1980_v50 = vrot.slane %v1979_v8, 1  ;;  %v1986_v25 = vrot.slane %v1985_v37, 1  ;;  %v2123_v44 = vsel %vm2121_vm10, %v2114_v52, %v2116_v15 }
 0x1c0   : > { %v2130_v23 = vrot.slane %v2126_v42, 4  ;;  %1940 = vst.msk [vmem:[#allocation4 + $0x45] ss:$8 sm:$0xf] %vm3316_vm7, %v1938_v30  ;;  %v2065_v40 = vadd.s32 %v2064_v56, %v2063_v28  ;;  %v2052_v34 = vrot.slane %v2051_v53, 2  ;;  %v2124_v54 = vsel %vm2121_vm10, %v2116_v15, %v3650_v22 }
 0x1c1   : > { %v2058_v24 = vrot.slane %v2057_v9, 2  ;;  %v1981_v49 = vadd.s32 %v1980_v50, %v1979_v8  ;;  %v1987_v61 = vadd.s32 %v1986_v25, %v1985_v37  ;;  %v2127_v33 = vmul.u32 %v2123_v44, %v3757_v0 }
 0x1c2   : > { %v2131_v18 = vadd.s32 %v2130_v23, %v2126_v42  ;;  %v2066_v11 = vrot.slane %v2065_v40, 1  ;;  %v2053_v46 = vadd.s32 %v2052_v34, %v2051_v53  ;;  %v2128_v51 = vmul.u32 %v2124_v54, %v3759_v21  ;;  %v2829_v34 = vld [vmem:[#allocation4 + $0x8] sm:$0xff]  ;;  %v2831_v54 = vld [vmem:[#allocation4 + $0x18] sm:$0xff] }
 0x1c3   : > { %v2059_v20 = vadd.s32 %v2058_v24, %v2057_v9  ;;  %v1995_v47 = vcombine.low %v1975_v58, %v1981_v49  ;;  %v1996_v2 = vcombine.low %v1987_v61, %v3694_v12  ;;  %v2136_v62 = vrot.slane %v2127_v33, 4  ;;  %v2830_v24 = vld [vmem:[#allocation4] sm:$0xff]  ;;  %v2832_v49 = vld [vmem:[#allocation4 + $0x10] sm:$0xff]  ;;  %v2199_v61 = vpop.permute.xlu1 %2198 }
 0x1c4   : > { %v2132_v31 = vrot.slane %v2131_v18, 2  ;;  %v2067_v55 = vadd.s32 %v2066_v11, %v2065_v40  ;;  %v2054_v45 = vrot.slane %v2053_v46, 1  ;;  %v2142_v39 = vrot.slane %v2128_v51, 4 }
 0x1c5   : > { %v2060_v43 = vrot.slane %v2059_v20, 1  ;;  %v2003_v22 = vrot.slane %v1995_v47, %v3300_v60  ;;  %v2010_v48 = vrot.slane %v1996_v2, %v3300_v60  ;;  %v2137_v0 = vadd.s32 %v2136_v62, %v2127_v33 }
 0x1c6   : > { %v2133_v57 = vadd.s32 %v2132_v31, %v2131_v18  ;;  %v2076_v52 = vcombine.low %v2067_v55, %v3698_v26  ;;  %v2055_v63 = vadd.s32 %v2054_v45, %v2053_v46  ;;  %v2143_v21 = vadd.s32 %v2142_v39, %v2128_v51  ;;  %v2201_v18 = vpop.permute.xlu0 %2200 }
 0x1c7   : > { %v2061_v36 = vadd.s32 %v2060_v43, %v2059_v20  ;;  %v2011_v29 = vcombine.low %v2003_v22, %v2010_v48  ;;  %v2138_v19 = vrot.slane %v2137_v0, 2  ;;  %v2153_v13 = vrot.slane %v3696_v17, 1  ;;  %v2203_v33 = vpop.permute.xlu1 %2202 }
 0x1c8   : > { %v2090_v12 = vrot.slane %v2076_v52, %v3300_v60  ;;  %v2144_v1 = vrot.slane %v2143_v21, 2  ;;  %v2134_v35 = vrot.slane %v2133_v57, 1  ;;  %vm2230_vm2 = vcmask 1039360  }
 0x1c9   : > { %v2075_v59 = vcombine.low %v2055_v63, %v2061_v36  ;;  %v2018_v16 = vrot.slane %v2011_v29, %v3300_v60  ;;  %v2139_v27 = vadd.s32 %v2138_v19, %v2137_v0  ;;  %v2154_v15 = vadd.s32 %v2153_v13, %v3696_v17 }
 0x1ca   : > { %v2145_v5 = vadd.s32 %v2144_v1, %v2143_v21  ;;  %v2135_v41 = vadd.s32 %v2134_v35, %v2133_v57  ;;  %v2205_v11 = vpop.permute.xlu0 %2204  ;;  %v2231_v48 = vsel %vm2230_vm2, %v2199_v61, %v2201_v18  ;;  %v2232_v63 = vsel %vm2230_vm2, %v2201_v18, %v2203_v33 }
 0x1cb   : > { %v2083_v10 = vrot.slane %v2075_v59, %v3300_v60  ;;  %2020 = vst.msk [vmem:[#allocation4 + $0x46] ss:$8 sm:$0xf] %vm3316_vm7, %v2018_v16  ;;  %v2140_v26 = vrot.slane %v2139_v27, 1  ;;  %v2243_v57 = vadd.s32 %v2830_v24, %v2231_v48  ;;  %v2233_v36 = vsel %vm2230_vm2, %v2203_v33, %v2205_v11 }
 0x1cc   : > { %v2146_v28 = vrot.slane %v2145_v5, 1  ;;  %v2246_v19 = vadd.s32 %v2831_v54, %v2205_v11  ;;  %v2245_v59 = vadd.s32 %v2832_v49, %v2233_v36  ;;  %vm2323_vm15 = vcmask 392192  }
 0x1cd   : > { %v2091_v7 = vcombine.low %v2083_v10, %v2090_v12  ;;  %v2141_v4 = vadd.s32 %v2140_v26, %v2139_v27  ;;  %v2244_v12 = vadd.s32 %v2829_v34, %v2232_v63  ;;  %vm2336_vm0 = vcmask 385024  }
 0x1ce   : > { %v2147_v8 = vadd.s32 %v2146_v28, %v2145_v5  ;;  %vm2442_vm3 = vcmask 654336   ;;  %vm2597_vm4 = vsmask.f32 0  ;;  %vm2599_vm6 = vcmask 1042434  }
 0x1cf   : > { %v2098_v58 = vrot.slane %v2091_v7, %v3300_v60  ;;  %v2155_v37 = vcombine.low %v2135_v41, %v2141_v4  ;;  %vm2600_vm8 = vsmask.f32 2048  ;;  %vm2603_vm10 = vcmask 1044484  }
 0x1d0   : > { %v2156_v42 = vcombine.low %v2147_v8, %v2154_v15  ;;  %vm2604_vm1 = vsmask.f32 4096  ;;  %vm4122_vm11 = vmand %vm2599_vm6, %vm2600_vm8 }
 0x1d1   : > { %2100 = vst.msk [vmem:[#allocation4 + $0x47] ss:$8 sm:$0xf] %vm3316_vm7, %v2098_v58  ;;  %v2163_v30 = vrot.slane %v2155_v37, %v3300_v60  ;;  %vm4130_vm13 = vmand %vm2603_vm10, %vm2604_vm1 }
 0x1d2   : > { %v2170_v56 = vrot.slane %v2156_v42, %v3300_v60 }
 0x1d4   : > { %v2171_v53 = vcombine.low %v2163_v30, %v2170_v56 }
 0x1d6   : > { %v2178_v9 = vrot.slane %v2171_v53, %v3300_v60 }
 0x1d8   : > { %v3905_v50 = vld [vmem:[#allocation4 + $0x48] sm:$0xff]  ;;  %v3907_v25 = vld [vmem:[#allocation4 + $0x40] sm:$0xff]  ;;  %2180 = vst.msk [vmem:[#allocation4 + $0x60] ss:$8 sm:$0xf] %vm3316_vm7, %v2178_v9  ;;  %v3915_v17 = vld [vmem:[#allocation4 + $0x58] sm:$0xff] }
 0x1d9   : > { %2216 = vrot.lane.b32.xlu0 %v3905_v50, %s2993_s17  ;;  %2214 = vrot.lane.b32.xlu1 %v3907_v25, %s2993_s17  ;;  %v3917_v23 = vld [vmem:[#allocation4 + $0x50] sm:$0xff]  ;;  %vm2291_vm7 = vcmask 1031168  }
 0x1dd   : > { %2220 = vrot.lane.b32.xlu0 %v3915_v17, %s2993_s17  ;;  %2218 = vrot.lane.b32.xlu1 %v3917_v23, %s2993_s17 }
 0x1df   : > { %v3923_v60 = vld [vmem:[#allocation4 + $0x68] sm:$0x1]  ;;  %v3925_v38 = vld [vmem:[#allocation4 + $0x60] sm:$0x1]  ;;  %v3931_v44 = vld [vmem:[#allocation4 + $0x78] sm:$0x1] }
 0x1e0   : > { %v3933_v40 = vld [vmem:[#allocation4 + $0x70] sm:$0x1] }
 0x1e1   : > { %2224 = vrot.lane.b32.xlu0 %v3923_v60, %s2993_s17  ;;  %2222 = vrot.lane.b32.xlu1 %v3925_v38, %s2993_s17 }
 0x1e5   : > { %2228 = vrot.lane.b32.xlu0 %v3931_v44, %s2993_s17  ;;  %2226 = vrot.lane.b32.xlu1 %v3933_v40, %s2993_s17 }
 0x1e9   : > { %2261 = vrot.lane.b32.xlu0 %v2829_v34, %s2994_s22  ;;  %2259 = vrot.lane.b32.xlu1 %v2830_v24, %s2994_s22 }
 0x1ed   : > { %2265 = vrot.lane.b32.xlu0 %v2831_v54, %s2994_s22  ;;  %2263 = vrot.lane.b32.xlu1 %v2832_v49, %s2994_s22 }
 0x1f1   : > { %2269 = vrot.lane.b32.xlu0 %v3796_v32, %s2994_s22  ;;  %2267 = vrot.lane.b32.xlu1 %v3798_v3, %s2994_s22 }
 0x1f5   : > { %2273 = vrot.lane.b32.xlu0 %v3807_v6, %s2994_s22  ;;  %2271 = vrot.lane.b32.xlu1 %v3809_v14, %s2994_s22 }
 0x1f9   : > { %2277 = vrot.lane.b32.xlu0 %v3905_v50, %s2994_s22  ;;  %2275 = vrot.lane.b32.xlu1 %v3907_v25, %s2994_s22 }
 0x1fd   : > { %2281 = vrot.lane.b32.xlu0 %v3915_v17, %s2994_s22  ;;  %2279 = vrot.lane.b32.xlu1 %v3917_v23, %s2994_s22 }
 0x201   : > { %2285 = vrot.lane.b32.xlu0 %v3923_v60, %s2994_s22  ;;  %2283 = vrot.lane.b32.xlu1 %v3925_v38, %s2994_s22 }
 0x205   : > { %2289 = vrot.lane.b32.xlu0 %v3931_v44, %s2994_s22  ;;  %2287 = vrot.lane.b32.xlu1 %v3933_v40, %s2994_s22 }
 0x209   : > { %v2209_v20 = vpop.permute.xlu0 %2208 }
 0x20a   : > { %v2207_v46 = vpop.permute.xlu1 %2206 }
 0x20b   : > { %v2234_v35 = vsel %vm2230_vm2, %v2207_v46, %v2209_v20 }
 0x20c   : > { %v2247_v7 = vadd.s32 %v2234_v35, %v3798_v3 }
 0x20d   : > { %v2213_v47 = vpop.permute.xlu0 %2212 }
 0x20e   : > { %v2211_v51 = vpop.permute.xlu1 %2210  ;;  %v2250_v37 = vadd.s32 %v2213_v47, %v3807_v6 }
 0x20f   : > { %v2235_v4 = vsel %vm2230_vm2, %v2209_v20, %v2211_v51  ;;  %v2236_v15 = vsel %vm2230_vm2, %v2211_v51, %v2213_v47 }
 0x210   : > { %v2248_v3 = vadd.s32 %v2235_v4, %v3796_v32  ;;  %v2249_v42 = vadd.s32 %v2236_v15, %v3809_v14 }
 0x24b   : > { %v2215_v2 = vpop.permute.xlu1 %2214  ;;  %v2217_v31 = vpop.permute.xlu0 %2216 }
 0x24c   : > { %v2237_v53 = vsel %vm2230_vm2, %v2215_v2, %v2217_v31 }
 0x24d   : > { %v2251_v32 = vadd.s32 %v2237_v53, %v3907_v25 }
 0x24f   : > { %v2219_v62 = vpop.permute.xlu1 %2218  ;;  %v2221_v55 = vpop.permute.xlu0 %2220 }
 0x250   : > { %v2238_v18 = vsel %vm2230_vm2, %v2217_v31, %v2219_v62  ;;  %v2239_v33 = vsel %vm2230_vm2, %v2219_v62, %v2221_v55  ;;  %v2254_v20 = vadd.s32 %v2221_v55, %v3915_v17 }
 0x251   : > { %v2252_v25 = vadd.s32 %v2238_v18, %v3905_v50  ;;  %v2253_v51 = vadd.s32 %v2239_v33, %v3917_v23 }
 0x253   : > { %v3951_v45 = vpop.permute.xlu1 %2222  ;;  %v3953_v43 = vpop.permute.xlu0 %2224 }
 0x254   : > { %v2240_v31 = vsel %vm2230_vm2, %v3951_v45, %v3953_v43 }
 0x255   : > { %v2255_v23 = vadd.s32 %v2240_v31, %v3925_v38 }
 0x257   : > { %v3955_v39 = vpop.permute.xlu1 %2226  ;;  %v3957_v22 = vpop.permute.xlu0 %2228 }
 0x258   : > { %v2241_v45 = vsel %vm2230_vm2, %v3953_v43, %v3955_v39  ;;  %v2242_v63 = vsel %vm2230_vm2, %v3955_v39, %v3957_v22 }
 0x259   : > { %v2256_v38 = vadd.s32 %v2241_v45, %v3923_v60 }
 0x25b   : > { %v2260_v0 = vpop.permute.xlu1 %2259  ;;  %v2262_v52 = vpop.permute.xlu0 %2261 }
 0x25c   : > { %v2292_v21 = vsel %vm2291_vm7, %v2260_v0, %v2262_v52 }
 0x25d   : > { %v3963_v29 = vadd.s32 %v2292_v21, %v2243_v57 }
 0x25f   : > { %v2264_v1 = vpop.permute.xlu1 %2263  ;;  %v2266_v16 = vpop.permute.xlu0 %2265  ;;  %2354 = vrot.lane.b32.xlu1 %v3963_v29, %s2970_s27 }
 0x260   : > { %v2293_v27 = vsel %vm2291_vm7, %v2262_v52, %v2264_v1  ;;  %v2294_v13 = vsel %vm2291_vm7, %v2264_v1, %v2266_v16  ;;  %v2307_v10 = vadd.s32 %v2266_v16, %v2246_v19  ;;  %v2258_v19 = vadd.s32 %v3957_v22, %v3931_v44 }
 0x261   : > { %v3970_v5 = vadd.s32 %v2293_v27, %v2244_v12  ;;  %v3972_v26 = vadd.s32 %v2294_v13, %v2245_v59  ;;  %v2257_v12 = vadd.s32 %v2242_v63, %v3933_v40 }
 0x262   : > { %2324 = vst.msk [vmem:[#allocation5 + $0x18] sm:$0xff] %vm2323_vm15, %v2307_v10 }
 0x263   : > { %v2268_v28 = vpop.permute.xlu1 %2267  ;;  %v2270_v41 = vpop.permute.xlu0 %2269  ;;  %2356 = vrot.lane.b32.xlu0 %v3970_v5, %s2970_s27  ;;  %2358 = vrot.lane.b32.xlu1 %v3972_v26, %s2970_s27 }
 0x264   : > { %v2295_v58 = vsel %vm2291_vm7, %v2268_v28, %v2270_v41 }
 0x265   : > { %v3983_v8 = vadd.s32 %v2295_v58, %v2247_v7 }
 0x267   : > { %v2272_v30 = vpop.permute.xlu1 %2271  ;;  %v2274_v56 = vpop.permute.xlu0 %2273  ;;  %2362 = vrot.lane.b32.xlu1 %v3983_v8, %s2970_s27 }
 0x268   : > { %v2296_v9 = vsel %vm2291_vm7, %v2270_v41, %v2272_v30  ;;  %v2297_v34 = vsel %vm2291_vm7, %v2272_v30, %v2274_v56  ;;  %v2311_v24 = vadd.s32 %v2274_v56, %v2250_v37 }
 0x269   : > { %v3993_v54 = vadd.s32 %v2296_v9, %v2248_v3  ;;  %v3995_v49 = vadd.s32 %v2297_v34, %v2249_v42  ;;  %v3997_v6 = vld [vmem:[#allocation5 + $0x18] sm:$0xff] }
 0x26a   : > { %2328 = vst.msk [vmem:[#allocation5 + $0x38] sm:$0xff] %vm2323_vm15, %v2311_v24  ;;  %2360 = vrot.lane.b32.xlu0 %v3997_v6, %s2970_s27 }
 0x26b   : > { %v2276_v14 = vpop.permute.xlu1 %2275  ;;  %v2278_v61 = vpop.permute.xlu0 %2277  ;;  %2366 = vrot.lane.b32.xlu1 %v3995_v49, %s2970_s27 }
 0x26c   : > { %v2298_v11 = vsel %vm2291_vm7, %v2276_v14, %v2278_v61 }
 0x26d   : > { %v4008_v46 = vadd.s32 %v2298_v11, %v2251_v32 }
 0x26e   : > { %2364 = vrot.lane.b32.xlu0 %v3993_v54, %s2970_s27 }
 0x26f   : > { %v2280_v47 = vpop.permute.xlu1 %2279  ;;  %v2282_v2 = vpop.permute.xlu0 %2281  ;;  %2370 = vrot.lane.b32.xlu1 %v4008_v46, %s2970_s27 }
 0x270   : > { %v2299_v62 = vsel %vm2291_vm7, %v2278_v61, %v2280_v47  ;;  %v2300_v17 = vsel %vm2291_vm7, %v2280_v47, %v2282_v2  ;;  %v2315_v55 = vadd.s32 %v2282_v2, %v2254_v20 }
 0x271   : > { %v4022_v48 = vadd.s32 %v2299_v62, %v2252_v25  ;;  %v4024_v57 = vadd.s32 %v2300_v17, %v2253_v51  ;;  %v2351_v50 = vld [vmem:[#allocation5 + $0x38] sm:$0xff] }
 0x272   : > { %2332 = vst.msk [vmem:[#allocation5 + $0x58] sm:$0xff] %vm2323_vm15, %v2315_v55  ;;  %2368 = vrot.lane.b32.xlu0 %v2351_v50, %s2970_s27 }
 0x273   : > { %v2284_v0 = vpop.permute.xlu1 %2283  ;;  %v2286_v52 = vpop.permute.xlu0 %2285  ;;  %2374 = vrot.lane.b32.xlu1 %v4024_v57, %s2970_s27 }
 0x274   : > { %v2301_v36 = vsel %vm2291_vm7, %v2284_v0, %v2286_v52 }
 0x275   : > { %v2316_v21 = vadd.s32 %v2301_v36, %v2255_v23 }
 0x276   : > { %2372 = vrot.lane.b32.xlu0 %v4022_v48, %s2970_s27 }
 0x277   : > { %2333 = vst [vmem:[#allocation5 + $0x60] sm:$0x1] %v2316_v21  ;;  %v2288_v59 = vpop.permute.xlu1 %2287  ;;  %v2290_v43 = vpop.permute.xlu0 %2289 }
 0x278   : > { %v2302_v1 = vsel %vm2291_vm7, %v2286_v52, %v2288_v59  ;;  %v2303_v39 = vsel %vm2291_vm7, %v2288_v59, %v2290_v43  ;;  %v2319_v16 = vadd.s32 %v2290_v43, %v2258_v19 }
 0x279   : > { %v2317_v35 = vadd.s32 %v2302_v1, %v2256_v38  ;;  %v2318_v27 = vadd.s32 %v2303_v39, %v2257_v12  ;;  %v2352_v13 = vld [vmem:[#allocation5 + $0x58] sm:$0xff] }
 0x27a   : > { %2337 = vst.msk [vmem:[#allocation5 + $0x78] sm:$0x1] %vm2336_vm0, %v2319_v16  ;;  %2376 = vrot.lane.b32.xlu0 %v2352_v13, %s2970_s27 }
 0x27b   : > { %2334 = vst [vmem:[#allocation5 + $0x68] sm:$0x1] %v2317_v35  ;;  %2335 = vst [vmem:[#allocation5 + $0x70] sm:$0x1] %v2318_v27 }
 0x27e   : > { %v4047_v60 = vld [vmem:[#allocation5 + $0x60] sm:$0x1] }
 0x27f   : > { %2378 = vrot.lane.b32.xlu1 %v4047_v60, %s2970_s27 }
 0x281   : > { %v2353_v22 = vld [vmem:[#allocation5 + $0x78] sm:$0x1] }
 0x282   : > { %v4051_v44 = vld [vmem:[#allocation5 + $0x68] sm:$0x1]  ;;  %v4053_v40 = vld [vmem:[#allocation5 + $0x70] sm:$0x1] }
 0x283   : > { %2380 = vrot.lane.b32.xlu0 %v4051_v44, %s2970_s27  ;;  %2382 = vrot.lane.b32.xlu1 %v4053_v40, %s2970_s27 }
 0x287   : > { %2384 = vrot.lane.b32.xlu0 %v2353_v22, %s2970_s27  ;;  %2410 = vrot.lane.b32.xlu1 %v3963_v29, %s2995_s24  ;;  %s2734_s27 = smul.u32 24, %s3155_s4 }
 0x289   : > { %s197_s26 = scalar_lea.vmem [#allocation12], %s2734_s27 }
 0x28a   : > { %s2624_s7 = sshll.u32 %s197_s26, 4  ;;  %s4147_s7 = int_to_ptr.vmem [resolvable:$true] %s2624_s7 }
 0x28b   : > { %2412 = vrot.lane.b32.xlu0 %v3970_v5, %s2995_s24  ;;  %2414 = vrot.lane.b32.xlu1 %v3972_v26, %s2995_s24  ;;  %s2893_s19 = scalar_lea.vmem %s4147_s7, 384  ;;  %p2900_p8 = scmp.lt.s32.totalorder %s4147_s7, %s2898_s29 }
 0x28c   : > { %p2894_p6 = scmp.ne.s32.totalorder %s4147_s7, %s2893_s19  ;;  %p2901_p9 = scmp.lt.s32.totalorder %s2899_s3, %s2893_s19 }
 0x28e   : > { %p2895_p5 = pnand %p2894_p6, %p4214_p13  ;;  %p2902_p0 = por %p2901_p9, %p2900_p8 }
 0x28f   : > { %2416 = vrot.lane.b32.xlu0 %v3997_v6, %s2995_s24  ;;  %2418 = vrot.lane.b32.xlu1 %v3983_v8, %s2995_s24 }
 0x290   : > { %p2896_p7 = pneg %p2895_p5 }
 0x292   : > { %p2903_p1 = pnand %p2902_p0, %p2896_p7 }
 0x293   : > { %2420 = vrot.lane.b32.xlu0 %v3993_v54, %s2995_s24  ;;  %2422 = vrot.lane.b32.xlu1 %v3995_v49, %s2995_s24 }
 0x297   : > { %2424 = vrot.lane.b32.xlu0 %v2351_v50, %s2995_s24  ;;  %2426 = vrot.lane.b32.xlu1 %v4008_v46, %s2995_s24 }
 0x29b   : > { %2428 = vrot.lane.b32.xlu0 %v4022_v48, %s2995_s24  ;;  %2430 = vrot.lane.b32.xlu1 %v4024_v57, %s2995_s24 }
 0x29f   : > { %2432 = vrot.lane.b32.xlu0 %v2352_v13, %s2995_s24  ;;  %2434 = vrot.lane.b32.xlu1 %v4047_v60, %s2995_s24 }
 0x2a3   : > { %2436 = vrot.lane.b32.xlu0 %v4051_v44, %s2995_s24  ;;  %2438 = vrot.lane.b32.xlu1 %v4053_v40, %s2995_s24 }
 0x2a7   : > { %2440 = vrot.lane.b32.xlu0 %v2353_v22, %s2995_s24 }
 0x2d1   : > { %v2355_v10 = vpop.permute.xlu1 %2354 }
 0x2d5   : > { %v2359_v7 = vpop.permute.xlu1 %2358  ;;  %v2357_v28 = vpop.permute.xlu0 %2356 }
 0x2d6   : > { %v2386_v33 = vsel %vm411_vm5, %v2355_v10, %v2357_v28  ;;  %v2387_v20 = vsel %vm411_vm5, %v2357_v28, %v2359_v7 }
 0x2d7   : > { %v2398_v31 = vadd.s32 %v2386_v33, %v3963_v29  ;;  %v2399_v55 = vadd.s32 %v2387_v20, %v3970_v5 }
 0x2d9   : > { %v2363_v41 = vpop.permute.xlu1 %2362 }
 0x2dc   : > { %v2361_v4 = vpop.permute.xlu0 %2360 }
 0x2dd   : > { %v2367_v58 = vpop.permute.xlu1 %2366  ;;  %v2388_v52 = vsel %vm411_vm5, %v2359_v7, %v2361_v4 }
 0x2de   : > { %v2400_v12 = vadd.s32 %v2388_v52, %v3972_v26 }
 0x2e0   : > { %v2365_v15 = vpop.permute.xlu0 %2364 }
 0x2e1   : > { %v2371_v3 = vpop.permute.xlu1 %2370  ;;  %v2389_v11 = vsel %vm411_vm5, %v2363_v41, %v2365_v15  ;;  %v2390_v25 = vsel %vm411_vm5, %v2365_v15, %v2367_v58 }
 0x2e2   : > { %v2401_v62 = vadd.s32 %v2389_v11, %v3983_v8  ;;  %v2402_v50 = vadd.s32 %v2390_v25, %v3993_v54 }
 0x2e4   : > { %v2369_v37 = vpop.permute.xlu0 %2368 }
 0x2e5   : > { %v2375_v30 = vpop.permute.xlu1 %2374  ;;  %v2391_v45 = vsel %vm411_vm5, %v2367_v58, %v2369_v37 }
 0x2e6   : > { %v2403_v59 = vadd.s32 %v2391_v45, %v3995_v49 }
 0x2e8   : > { %v2373_v42 = vpop.permute.xlu0 %2372 }
 0x2e9   : > { %v2392_v63 = vsel %vm411_vm5, %v2371_v3, %v2373_v42  ;;  %v2393_v8 = vsel %vm411_vm5, %v2373_v42, %v2375_v30 }
 0x2ea   : > { %v2404_v43 = vadd.s32 %v2392_v63, %v4008_v46  ;;  %v2405_v1 = vadd.s32 %v2393_v8, %v4022_v48 }
 0x2ec   : > { %v2377_v53 = vpop.permute.xlu0 %2376 }
 0x2ed   : > { %v2394_v39 = vsel %vm411_vm5, %v2375_v30, %v2377_v53 }
 0x2ee   : > { %v2406_v46 = vadd.s32 %v2394_v39, %v4024_v57 }
 0x2f1   : > { %v2379_v56 = vpop.permute.xlu1 %2378 }
 0x2f5   : > { %v4073_v9 = vpop.permute.xlu1 %2382  ;;  %v2381_v34 = vpop.permute.xlu0 %2380 }
 0x2f6   : > { %v2395_v15 = vsel %vm411_vm5, %v2379_v56, %v2381_v34  ;;  %v2396_v53 = vsel %vm411_vm5, %v2381_v34, %v4073_v9 }
 0x2f7   : > { %v2407_v57 = vadd.s32 %v2395_v15, %v4047_v60  ;;  %v2408_v25 = vadd.s32 %v2396_v53, %v4051_v44 }
 0x2f9   : > { %v2411_v24 = vpop.permute.xlu1 %2410  ;;  %v4075_v6 = vpop.permute.xlu0 %2384 }
 0x2fd   : > { %v2415_v32 = vpop.permute.xlu1 %2414  ;;  %v2413_v14 = vpop.permute.xlu0 %2412 }
 0x2fe   : > { %v2443_v23 = vsel %vm2442_vm3, %v2411_v24, %v2413_v14  ;;  %v2444_v0 = vsel %vm2442_vm3, %v2413_v14, %v2415_v32 }
 0x2ff   : > { %v2455_v38 = vadd.s32 %v2443_v23, %v2398_v31  ;;  %v2456_v5 = vadd.s32 %v2444_v0, %v2399_v55 }
 0x301   : > { %v2419_v61 = vpop.permute.xlu1 %2418  ;;  %v2417_v18 = vpop.permute.xlu0 %2416  ;;  %v2467_v26 = vcvt.s32.f32 %v2455_v38  ;;  %v2468_v41 = vcvt.s32.f32 %v2456_v5 }
 0x302   : > { %v2445_v16 = vsel %vm2442_vm3, %v2415_v32, %v2417_v18 }
 0x303   : > { %v2457_v48 = vadd.s32 %v2445_v16, %v2400_v12  ;;  %v2480_v18 = vmul.f32 0.0013888889, %v2468_v41 }
 0x305   : > { %v2423_v51 = vpop.permute.xlu1 %2422  ;;  %v2421_v47 = vpop.permute.xlu0 %2420  ;;  %v2469_v20 = vcvt.s32.f32 %v2457_v48  ;;  %v2736_v60 = vround.rtne.f32 %v2480_v18 }
 0x306   : > { %v2446_v2 = vsel %vm2442_vm3, %v2419_v61, %v2421_v47  ;;  %v2447_v17 = vsel %vm2442_vm3, %v2421_v47, %v2423_v51  ;;  %v2479_v61 = vmul.f32 0.0013888889, %v2467_v26 }
 0x307   : > { %v2458_v36 = vadd.s32 %v2446_v2, %v2401_v62  ;;  %v2459_v19 = vadd.s32 %v2447_v17, %v2402_v50  ;;  %v2481_v45 = vmul.f32 0.0013888889, %v2469_v20  ;;  %v2504_v12 = vmax.f32 %v2736_v60, -128.0 }
 0x308   : > { %v2735_v23 = vround.rtne.f32 %v2479_v61 }
 0x309   : > { %v2427_v29 = vpop.permute.xlu1 %2426  ;;  %v2425_v21 = vpop.permute.xlu0 %2424  ;;  %v2470_v35 = vcvt.s32.f32 %v2458_v36  ;;  %v2471_v22 = vcvt.s32.f32 %v2459_v19  ;;  %v2516_v41 = vmin.f32 %v2504_v12, 127.0 }
 0x30a   : > { %v2448_v54 = vsel %vm2442_vm3, %v2423_v51, %v2425_v21  ;;  %v2397_v51 = vsel %vm411_vm5, %v4073_v9, %v4075_v6  ;;  %vm2596_vm5 = vcmask 1040384  }
 0x30b   : > { %v2460_v10 = vadd.s32 %v2448_v54, %v2403_v59  ;;  %v2482_v58 = vmul.f32 0.0013888889, %v2470_v35  ;;  %v2483_v24 = vmul.f32 0.0013888889, %v2471_v22  ;;  %v2409_v36 = vadd.s32 %v2397_v51, %v4053_v40  ;;  %vm4117_vm9 = vmand %vm2596_vm5, %vm2597_vm4 }
 0x30c   : > { %v2503_v54 = vmax.f32 %v2735_v23, -128.0  ;;  %v2528_v61 = vtrunc.f32 %v2516_v41  ;;  %vm2602_vm12 = vmor %vm4122_vm11, %vm4117_vm9 }
 0x30d   : > { %v2431_v27 = vpop.permute.xlu1 %2430  ;;  %v2429_v13 = vpop.permute.xlu0 %2428  ;;  %v2472_v32 = vcvt.s32.f32 %v2460_v10  ;;  %v2738_v47 = vround.rtne.f32 %v2482_v58  ;;  %v2739_v62 = vround.rtne.f32 %v2483_v24  ;;  %vm2606_vm14 = vmor %vm4130_vm13, %vm2602_vm12 }
 0x30e   : > { %v2449_v7 = vsel %vm2442_vm3, %v2427_v29, %v2429_v13  ;;  %v2450_v28 = vsel %vm2442_vm3, %v2429_v13, %v2431_v27  ;;  %v2515_v26 = vmin.f32 %v2503_v54, 127.0 }
 0x30f   : > { %v2461_v49 = vadd.s32 %v2449_v7, %v2404_v43  ;;  %v2462_v4 = vadd.s32 %v2450_v28, %v2405_v1  ;;  %v2484_v17 = vmul.f32 0.0013888889, %v2472_v32  ;;  %v2506_v9 = vmax.f32 %v2738_v47, -128.0 }
 0x310   : > { %v2507_v8 = vmax.f32 %v2739_v62, -128.0  ;;  %v2737_v1 = vround.rtne.f32 %v2481_v45 }
 0x311   : > { %v2473_v37 = vcvt.s32.f32 %v2461_v49  ;;  %v2474_v3 = vcvt.s32.f32 %v2462_v4  ;;  %v2435_v42 = vpop.permute.xlu1 %2434  ;;  %v2433_v30 = vpop.permute.xlu0 %2432  ;;  %v2740_v19 = vround.rtne.f32 %v2484_v17 }
 0x312   : > { %v2451_v14 = vsel %vm2442_vm3, %v2431_v27, %v2433_v30  ;;  %v2518_v27 = vmin.f32 %v2506_v9, 127.0  ;;  %v2519_v22 = vmin.f32 %v2507_v8, 127.0 }
 0x313   : > { %v2485_v33 = vmul.f32 0.0013888889, %v2473_v37  ;;  %v2463_v11 = vadd.s32 %v2451_v14, %v2406_v46  ;;  %v2486_v56 = vmul.f32 0.0013888889, %v2474_v3  ;;  %v2508_v10 = vmax.f32 %v2740_v19, -128.0 }
 0x314   : > { %v2505_v46 = vmax.f32 %v2737_v1, -128.0  ;;  %v2530_v37 = vtrunc.f32 %v2518_v27  ;;  %v2531_v30 = vtrunc.f32 %v2519_v22  ;;  %v2527_v14 = vtrunc.f32 %v2515_v26 }
 0x315   : > { %v2475_v34 = vcvt.s32.f32 %v2463_v11  ;;  %v2439_v2 = vpop.permute.xlu1 %2438  ;;  %v2437_v31 = vpop.permute.xlu0 %2436  ;;  %v2741_v0 = vround.rtne.f32 %v2485_v33  ;;  %v2742_v44 = vround.rtne.f32 %v2486_v56  ;;  %v2520_v53 = vmin.f32 %v2508_v10, 127.0  ;;  %v2607_v10 = vld [vmem:[%s197_s26 + $0x12] sm:$0x15] }
 0x316   : > { %v2452_v55 = vsel %vm2442_vm3, %v2435_v42, %v2437_v31  ;;  %v2453_v50 = vsel %vm2442_vm3, %v2437_v31, %v2439_v2  ;;  %v2517_v11 = vmin.f32 %v2505_v46, 127.0 }
 0x317   : > { %v2464_v52 = vadd.s32 %v2452_v55, %v2407_v57  ;;  %v2465_v63 = vadd.s32 %v2453_v50, %v2408_v25  ;;  %v2487_v6 = vmul.f32 0.0013888889, %v2475_v34  ;;  %v2509_v59 = vmax.f32 %v2741_v0, -128.0 }
 0x318   : > { %v2510_v39 = vmax.f32 %v2742_v44, -128.0  ;;  %v2539_v25 = vpack.c.f32.eXmY %v2527_v14, %v2530_v37, 312  ;;  %v2549_v34 = vpack.c.f32.eXmY %v2528_v61, %v2531_v30, 312  ;;  %v2529_v55 = vtrunc.f32 %v2517_v11 }
 0x319   : > { %v2476_v29 = vcvt.s32.f32 %v2464_v52  ;;  %v2441_v21 = vpop.permute.xlu0 %2440  ;;  %v2477_v38 = vcvt.s32.f32 %v2465_v63  ;;  %v2743_v13 = vround.rtne.f32 %v2487_v6  ;;  %v2521_v49 = vmin.f32 %v2509_v59, 127.0 }
 0x31a   : > { %v2454_v5 = vsel %vm2442_vm3, %v2439_v2, %v2441_v21  ;;  %v2522_v48 = vmin.f32 %v2510_v39, 127.0  ;;  %v2532_v2 = vtrunc.f32 %v2520_v53 }
 0x31b   : > { %v2488_v43 = vmul.f32 0.0013888889, %v2476_v29  ;;  %v2489_v16 = vmul.f32 0.0013888889, %v2477_v38  ;;  %v2466_v35 = vadd.s32 %v2454_v5, %v2409_v36  ;;  %v2511_v3 = vmax.f32 %v2743_v13, -128.0 }
 0x31c   : > { %v2533_v18 = vtrunc.f32 %v2521_v49  ;;  %v2534_v57 = vtrunc.f32 %v2522_v48  ;;  %v2559_v0 = vpack.c.f32.eXmY %v2529_v55, %v2532_v2, 312 }
 0x31d   : > { %v2744_v40 = vround.rtne.f32 %v2488_v43  ;;  %v2745_v7 = vround.rtne.f32 %v2489_v16  ;;  %v2478_v28 = vcvt.s32.f32 %v2466_v35  ;;  %v2523_v51 = vmin.f32 %v2511_v3, 127.0 }
 0x31f   : > { %v2512_v4 = vmax.f32 %v2744_v40, -128.0  ;;  %v2513_v15 = vmax.f32 %v2745_v7, -128.0  ;;  %v2490_v58 = vmul.f32 0.0013888889, %v2478_v28  ;;  %v2535_v60 = vtrunc.f32 %v2523_v51 }
 0x321   : > { %v2524_v42 = vmin.f32 %v2512_v4, 127.0  ;;  %v2525_v24 = vmin.f32 %v2513_v15, 127.0  ;;  %v2746_v32 = vround.rtne.f32 %v2490_v58 }
 0x323   : > { %v2536_v33 = vtrunc.f32 %v2524_v42  ;;  %v2537_v20 = vtrunc.f32 %v2525_v24  ;;  %v2514_v56 = vmax.f32 %v2746_v32, -128.0 }
 0x325   : > { %v2543_v47 = vpack.c.f32.eXmY %v2533_v18, %v2536_v33, 312  ;;  %v2553_v31 = vpack.c.f32.eXmY %v2534_v57, %v2537_v20, 312  ;;  %v2526_v62 = vmin.f32 %v2514_v56, 127.0 }
 0x327   : > { %v2547_v17 = vpack.c.b8 %v2543_v47, %v2539_v25  ;;  %v2557_v50 = vpack.c.b8 %v2553_v31, %v2549_v34  ;;  %v2538_v23 = vtrunc.f32 %v2526_v62 }
 0x329   : > { %v2569_v52 = vunpack.c.0.s8 %v2547_v17  ;;  %v2572_v44 = vunpack.c.1.s8 %v2547_v17  ;;  %v2575_v63 = vunpack.c.2.s8 %v2547_v17  ;;  %v2578_v36 = vunpack.c.3.s8 %v2547_v17 }
 0x32a   : > { %v2563_v6 = vpack.c.f32.eXmY %v2535_v60, %v2538_v23, 312  ;;  %v2570_v29 = vunpack.c.0.s8 %v2557_v50  ;;  %v2573_v21 = vunpack.c.1.s8 %v2557_v50  ;;  %v2576_v8 = vunpack.c.2.s8 %v2557_v50 }
 0x32b   : > { %v2579_v19 = vunpack.c.3.s8 %v2557_v50 }
 0x32c   : > { %v2567_v38 = vpack.c.b8 %v2563_v6, %v2559_v0  ;;  %v2581_v1 = vpack.c.b16 %v2570_v29, %v2569_v52  ;;  %v2584_v39 = vpack.c.b16 %v2573_v21, %v2572_v44  ;;  %v2587_v16 = vpack.c.b16 %v2576_v8, %v2575_v63 }
 0x32d   : > { %v2590_v35 = vpack.c.b16 %v2579_v19, %v2578_v36 }
 0x32e   : > { %v2571_v54 = vunpack.c.0.s8 %v2567_v38  ;;  %v2574_v12 = vunpack.c.1.s8 %v2567_v38  ;;  %v2577_v59 = vunpack.c.2.s8 %v2567_v38  ;;  %v2580_v43 = vunpack.c.3.s8 %v2567_v38 }
 0x330   : > { %v2582_v27 = vpack.c.b16 %v2571_v54, %v2571_v54  ;;  %v2585_v13 = vpack.c.b16 %v2574_v12, %v2574_v12  ;;  %v2588_v40 = vpack.c.b16 %v2577_v59, %v2577_v59  ;;  %v2591_v22 = vpack.c.b16 %v2580_v43, %v2580_v43 }
 0x332   : > { %v2583_v7 = vpack.c.b8 %v2582_v27, %v2581_v1  ;;  %v2586_v28 = vpack.c.b8 %v2585_v13, %v2584_v39  ;;  %v2589_v26 = vpack.c.b8 %v2588_v40, %v2587_v16  ;;  %v2592_v41 = vpack.c.b8 %v2591_v22, %v2590_v35 }
 0x334   : > { %v2608_v49 = vsel %vm2606_vm14, %v2592_v41, %v2607_v10  ;;  %2593 = vst [vmem:[%s197_s26] sm:$0x3f] %v2583_v7  ;;  %2594 = vst [vmem:[%s197_s26 + $0x6] sm:$0x3f] %v2586_v28 }
 0x335   : > { %2595 = vst [vmem:[%s197_s26 + $0xc] sm:$0x3f] %v2589_v26  ;;  %2609 = vst [vmem:[%s197_s26 + $0x12] sm:$0x15] %v2608_v49 }
 0x336   : > { %2906 = shalt.err (!%p2903_p1)
}
 0x337   : > { %s2907_s14 = scalar_lea.hbm %s4145_s28, 384  ;;  %s2911_s17 = scalar_lea.hbm %s4194_s2, 768 }
 0x338   : > { %p2908_p11 = scmp.ne.s32.totalorder %s4145_s28, %s2907_s14  ;;  %p2912_p4 = scmp.lt.u32.totalorder %s4145_s28, %s4194_s2 }
 0x339   : > { %p2913_p10 = scmp.lt.u32.totalorder %s2911_s17, %s2907_s14  ;;  %p2915_p6 = scmp.lt.u32.totalorder %s2907_s14, %s4145_s28 }
 0x33a   : > { %p2909_p12 = pnand %p2908_p11, %p4214_p13 }
 0x33b   : > { %p2914_p3 = por %p2913_p10, %p2912_p4 }
 0x33c   : > { %p2910_p2 = pneg %p2909_p12 }
 0x33d   : > { %p2916_p5 = por %p2915_p6, %p2914_p3 }
 0x33f   : > { %p2917_p7 = pnand %p2916_p5, %p2910_p2 }
 0x341   : > { %2920 = shalt.err (!%p2917_p7)
}
 0x342   : > { %s2997_s27 = smov 96  }
 0x343   : > { %2752 = dma.vmem_to_hbm [thread:$0]  (%p4214_p13), %s4147_s7, 384, %s4145_s28, %s2611_s6, %s2997_s27, %s2997_s27, %s2980_s5  }
 0x344 PF: > { %s2639_s25 = sand.u32 1, %s2951_s9   ;;  %p4215_p8 = scmp.ne.s32.totalorder %s4199_s21, 0 }
 0x345   : > { %p4216_p9 = scmp.ge.s32.totalorder %s2963_s12, 2  ;;  %s2640_s26 = scalar_lea.sflag [#allocation9], %s2639_s25 }
 0x347   : > { %p2762_p0 = pnand %p4216_p9, %p4215_p8 }
 0x349   : > { %2946 = dma.done.wait (!%p2762_p0), %s2640_s26, 384  }
 0x34a   : > { %2948 = vsyncadd (!%p2762_p0), %s2640_s26, 4294966912  ;;  %p18_p1 = scmp.ge.s32.totalorder %s3038_s15, 4   ;;  %s4217_s9 = smov %s2955_s10 }
 0x34b   : > { %s4218_s10 = smov %s2959_s11  ;;  %s4219_s11 = smov %s3050_s18 }
 0x34c   : > { %s4220_s12 = smov %s3038_s15  ;;  %20 = sbr.rel (!%p18_p1) target bundleno = 7 (0x7), region = 110 }
 0x353   :  { %2645 = vsyncpa [#allocation8], 1 }
 0x354   :  { %2647 = vsyncpa [#allocation8 + $0x1], 1 }
 0x355   :  { %2648 = vsyncpa [#allocation11], 1 }
 0x356   :  { %2650 = vsyncpa [#allocation11 + $0x1], 1 }
 0x357   :  { %2651 = vsyncpa [#allocation9], 1 }
 0x358   :  { %2653 = vsyncpa [#allocation9 + $0x1], 1 }

</bundles_post_ra>
